<compile_context>
chip_gen: v7x
topology: tpu7x:2x2x1
jax: 0.10.0
libtpu: 0.0.40
codegen_flags: <defaults>
</compile_context>

<pallas_src>
import functools

import jax
import jax.numpy as jnp
from jax import lax
from jax.experimental import pallas as pl
from jax.experimental.pallas import tpu as pltpu


# ----------------------------------------------------------------------------
# Small helpers
# ----------------------------------------------------------------------------
def _round_up(v, m):
    return (v + m - 1) // m * m


def _device_kind():
    try:
        return jax.devices()[0].device_kind.lower()
    except Exception:
        return ""


def _default_fold_kw():
    # v5e's MXU is 128 deep: K=C already saturates it, so the im2col concat is
    # a pure copy there.  Keep the K=3*C folding for the 256-deep v6e/v7x MXU.
    k = _device_kind()
    return not ("v5e" in k or "v5 lite" in k or "v5lite" in k)


def _default_vmem_limit_bytes():
    k = _device_kind()
    if "v7" in k:
        return 44 * 1024 * 1024        # 64 MiB physical on v7x: leave headroom
    if "v5" in k or "v6" in k:
        return 96 * 1024 * 1024        # 128 MiB physical
    return None                        # unknown generation: compiler default


# ----------------------------------------------------------------------------
# Fused residual-block kernel (one batch element per grid step)
# ----------------------------------------------------------------------------
def _residual_block_kernel(x_ref, w1_ref, b1_ref, w2_ref, b2_ref, *rest,
                           stride, use_projection, fold_kw):
    """Fused residual block.

    x_ref   : (1, H+2, W+2, Ci)  spatially halo-padded input (compute dtype)
    w1_ref  : (3, 3*Ci, Co)      conv1 weights (BN1 scale folded, kw folded in K)
    b1_ref  : (1, Co)            conv1+BN1 folded bias (f32)
    w2_ref  : (3, 3*Co, Co)      conv2 weights (BN2 scale folded, kw folded in K)
    b2_ref  : (1, Co)            conv2+BN2 folded bias (f32)
    wsc_ref : (Ci, Co)           1x1 projection weights      (projection only)
    bsc_ref : (1, Co)            1x1 projection bias (f32)   (projection only)
    o_ref   : (1, Ho, Wo, Co)    output (lane-dense Co)
    o1pad   : (Ho+2, Wp2, Co)    VMEM scratch: zero-padded out1 (compute dtype)
    """
    if use_projection:
        wsc_ref, bsc_ref, o_ref, o1pad_ref = rest
    else:
        o_ref, o1pad_ref = rest

    _, Ho, Wo, Co = o_ref.shape
    Ci = x_ref.shape[-1]
    Wp2 = o1pad_ref.shape[1]
    cdt = o1pad_ref.dtype

    def x_patch(kh, kw):
        # Input window feeding the conv1 output pixel grid for tap (kh, kw).
        if stride == 1:
            return x_ref[0, kh:kh + Ho, kw:kw + Wo, :]
        # stride > 1: keep the stride in the load itself (strided pl.ds).
        return x_ref[0, pl.ds(kh, Ho, stride=stride),
                     pl.ds(kw, Wo, stride=stride), :]

    # ---- conv1 + BN1 (scale folded into w1) + ReLU -------------------------
    acc1 = jnp.zeros((Ho * Wo, Co), jnp.float32)
    if fold_kw:
        # im2col K folding: 3 MXU matmuls with K = 3*Ci (v6e/v7x).
        for kh in range(3):
            patch = jnp.concatenate([x_patch(kh, kw) for kw in range(3)],
                                    axis=-1).reshape(Ho * Wo, 3 * Ci)
            acc1 += jnp.dot(patch, w1_ref[kh],
                            preferred_element_type=jnp.float32)
    else:
        # v5e path: 9 matmuls with K = Ci, no patch concatenation copies.
        for kh in range(3):
            wk = w1_ref[kh]                                   # (3*Ci, Co)
            for kw in range(3):
                patch = x_patch(kh, kw).reshape(Ho * Wo, Ci)
                acc1 += jnp.dot(patch, wk[kw * Ci:(kw + 1) * Ci],
                                preferred_element_type=jnp.float32)
    out1 = jnp.maximum(acc1 + b1_ref[...], 0.0).reshape(Ho, Wo, Co)

    # ---- zero-padded out1 stays in VMEM (no HBM round trip) ----------------
    # Store only the interior; re-zero the thin borders each step.
    o1pad_ref[0:1, :, :] = jnp.zeros((1, Wp2, Co), cdt)
    o1pad_ref[Ho + 1:Ho + 2, :, :] = jnp.zeros((1, Wp2, Co), cdt)
    o1pad_ref[1:1 + Ho, 0:1, :] = jnp.zeros((Ho, 1, Co), cdt)
    o1pad_ref[1:1 + Ho, 1 + Wo:Wp2, :] = jnp.zeros((Ho, Wp2 - 1 - Wo, Co), cdt)
    o1pad_ref[1:1 + Ho, 1:1 + Wo, :] = out1.astype(cdt)

    # ---- shortcut (fused: no separate conv1x1 pallas_call) -----------------
    if stride == 1:
        xs = x_ref[0, 1:1 + Ho, 1:1 + Wo, :]
    else:
        xs = x_ref[0, pl.ds(1, Ho, stride=stride),
                   pl.ds(1, Wo, stride=stride), :]
    xs = xs.reshape(Ho * Wo, Ci)
    if use_projection:
        sc = jnp.dot(xs, wsc_ref[...],
                     preferred_element_type=jnp.float32) + bsc_ref[...]
    else:
        sc = xs.astype(jnp.float32)       # identity: Ci == Co by construction

    # ---- conv2 + BN2 + shortcut + ReLU --------------------------------------
    acc2 = jnp.zeros((Ho * Wo, Co), jnp.float32)
    if fold_kw:
        for kh in range(3):
            rows = o1pad_ref[kh:kh + Ho]                      # (Ho, Wp2, Co)
            patch = jnp.concatenate(
                [rows[:, kw:kw + Wo, :] for kw in range(3)],
                axis=-1).reshape(Ho * Wo, 3 * Co)
            acc2 += jnp.dot(patch, w2_ref[kh],
                            preferred_element_type=jnp.float32)
    else:
        for kh in range(3):
            wk = w2_ref[kh]                                   # (3*Co, Co)
            for kw in range(3):
                patch = o1pad_ref[kh:kh + Ho, kw:kw + Wo, :].reshape(
                    Ho * Wo, Co)
                acc2 += jnp.dot(patch, wk[kw * Co:(kw + 1) * Co],
                                preferred_element_type=jnp.float32)

    out = jnp.maximum(acc2 + b2_ref[...] + sc, 0.0)
    o_ref[0] = out.reshape(Ho, Wo, Co).astype(o_ref.dtype)


# ----------------------------------------------------------------------------
# Wrapper: BN folding, channel padding, K-folded weight layout, pallas_call
# ----------------------------------------------------------------------------
def _fold_bn(w_hwio, conv_b, gamma, beta, mean, var, eps=1e-5):
    """Fold inference BatchNorm into conv weights (per-Cout scale) + bias."""
    scale = gamma / jnp.sqrt(var + eps)
    return w_hwio * scale, beta + (conv_b - mean) * scale


def _prep_conv3x3(w_hwio, bias, ci_pad, co_pad, compute_dtype):
    """Pad channels and fold the kw tap into the contraction dim K = 3*Cin."""
    _, _, ci, co = w_hwio.shape
    w = jnp.pad(w_hwio, ((0, 0), (0, 0), (0, ci_pad - ci), (0, co_pad - co)))
    w = w.reshape(3, 3 * ci_pad, co_pad)        # row index = kw*ci_pad + cin
    b = jnp.pad(bias, (0, co_pad - co)).reshape(1, co_pad)
    return w.astype(compute_dtype), b.astype(jnp.float32)


def residual_forward(x_nchw, params, stride=1, compute_dtype=jnp.bfloat16,
                     out_dtype=None, fold_kw=None):
    if out_dtype is None:
        out_dtype = compute_dtype
    if fold_kw is None:
        fold_kw = _default_fold_kw()

    x = jnp.transpose(x_nchw, (0, 2, 3, 1)).astype(jnp.float32)   # NCHW -> NHWC
    N, H, W, Cin = x.shape
    Cout = params["w1"].shape[-1]
    Ho = (H + 2 - 3) // stride + 1
    Wo = (W + 2 - 3) // stride + 1

    use_projection = params.get("w_sc") is not None
    if not use_projection:
        assert Cin == Cout, "identity shortcut needs matching channel counts"

    Co = _round_up(Cout, 128)                   # lane-dense output channels
    if use_projection and Cin < 64:
        Ci = Cin        # tiny stem Cin: skip the 32x HBM read inflation;
                        # only the weight K rows carry the zero padding.
    else:
        Ci = _round_up(Cin, 128)                # identity path => Ci == Co

    # BN folded into the conv weights / biases (inference running stats).
    w1f, b1f = _fold_bn(params["w1"], params["b1"], *params["bn1"])
    w2f, b2f = _fold_bn(params["w2"], params["b2"], *params["bn2"])
    w1p, b1p = _prep_conv3x3(w1f, b1f, Ci, Co, compute_dtype)
    w2p, b2p = _prep_conv3x3(w2f, b2f, Co, Co, compute_dtype)

    # Single HBM prep copy: spatial halo (+1 each side) merged with the
    # (possibly empty) channel pad; stored directly in compute dtype.
    x_pad = jnp.pad(x, ((0, 0), (1, 1), (1, 1), (0, Ci - Cin)))
    x_pad = x_pad.astype(compute_dtype)
    Hp, Wp = H + 2, W + 2
    Wp2 = _round_up(Wo + 2, 8)                  # sublane-friendly scratch width

    args = [x_pad, w1p, b1p, w2p, b2p]
    in_specs = [
        pl.BlockSpec((1, Hp, Wp, Ci), lambda n: (n, 0, 0, 0)),
        pl.BlockSpec((3, 3 * Ci, Co), lambda n: (0, 0, 0)),
        pl.BlockSpec((1, Co), lambda n: (0, 0)),
        pl.BlockSpec((3, 3 * Co, Co), lambda n: (0, 0, 0)),
        pl.BlockSpec((1, Co), lambda n: (0, 0)),
    ]
    if use_projection:
        wsc = jnp.pad(params["w_sc"], ((0, Ci - Cin), (0, Co - Cout)))
        bsc = jnp.pad(params["b_sc"], (0, Co - Cout)).reshape(1, Co)
        args += [wsc.astype(compute_dtype), bsc.astype(jnp.float32)]
        in_specs += [pl.BlockSpec((Ci, Co), lambda n: (0, 0)),
                     pl.BlockSpec((1, Co), lambda n: (0, 0))]

    # Advisory cost estimate (helps XLA schedule around the custom call).
    itemsize = jnp.dtype(compute_dtype).itemsize
    flops = 2 * N * Ho * Wo * Co * (9 * Ci + 9 * Co
                                    + (Ci if use_projection else 0))
    bytes_accessed = (
        N * Hp * Wp * Ci * itemsize
        + (int(w1p.size) + int(w2p.size)) * itemsize
        + (int(b1p.size) + int(b2p.size)) * 4
        + ((Ci * Co * itemsize + Co * 4) if use_projection else 0)
        + N * Ho * Wo * Co * jnp.dtype(out_dtype).itemsize)
    cost = pl.CostEstimate(flops=int(flops), transcendentals=0,
                           bytes_accessed=int(bytes_accessed))

    kernel = functools.partial(_residual_block_kernel, stride=stride,
                               use_projection=use_projection, fold_kw=fold_kw)
    out = pl.pallas_call(
        kernel,
        out_shape=jax.ShapeDtypeStruct((N, Ho, Wo, Co), out_dtype),
        grid=(N,),
        in_specs=in_specs,
        out_specs=pl.BlockSpec((1, Ho, Wo, Co), lambda n: (n, 0, 0, 0)),
        scratch_shapes=[pltpu.VMEM((Ho + 2, Wp2, Co), compute_dtype)],
        compiler_params=pltpu.CompilerParams(
            dimension_semantics=("parallel",),
            vmem_limit_bytes=_default_vmem_limit_bytes()),
        cost_estimate=cost,
    )(*args)

    # TODO(synk): NHWC consumers can take out[..., :Cout] directly (skipping
    # the transpose below); NCHW kept here to match the PyTorch module output.
    out = out[..., :Cout]                        # drop channel padding
    return jnp.transpose(out, (0, 3, 1, 2))      # NHWC -> NCHW


# ----------------------------------------------------------------------------
# Pure-JAX reference (sanity check)
# ----------------------------------------------------------------------------
def _ref_forward(x_nchw, params, stride=1, eps=1e-5):
    x = jnp.transpose(x_nchw, (0, 2, 3, 1)).astype(jnp.float32)
    dn = ("NHWC", "HWIO", "NHWC")

    def bn(y, bnp):
        g, b, m, v = bnp
        return g * (y - m) / jnp.sqrt(v + eps) + b

    y1 = lax.conv_general_dilated(x, params["w1"], (stride, stride),
                                  ((1, 1), (1, 1)), dimension_numbers=dn)
    y1 = jnp.maximum(bn(y1 + params["b1"], params["bn1"]), 0.0)
    y2 = lax.conv_general_dilated(y1, params["w2"], (1, 1),
                                  ((1, 1), (1, 1)), dimension_numbers=dn)
    y2 = bn(y2 + params["b2"], params["bn2"])
    if params.get("w_sc") is not None:
        sc = lax.conv_general_dilated(x, params["w_sc"][None, None],
                                      (stride, stride), ((0, 0), (0, 0)),
                                      dimension_numbers=dn) + params["b_sc"]
    else:
        sc = x[:, ::stride, ::stride, :]
    out = jnp.maximum(y2 + sc, 0.0)
    return jnp.transpose(out, (0, 3, 1, 2))


def _make_params(key, cin, cout, projection):
    ks = jax.random.split(key, 12)
    p = {
        "w1": 0.1 * jax.random.normal(ks[0], (3, 3, cin, cout), jnp.float32),
        "b1": 0.1 * jax.random.normal(ks[1], (cout,), jnp.float32),
        "bn1": (1.0 + 0.1 * jax.random.normal(ks[2], (cout,), jnp.float32),
                0.1 * jax.random.normal(ks[3], (cout,), jnp.float32),
                0.05 * jax.random.normal(ks[4], (cout,), jnp.float32),
                0.5 + jax.random.uniform(ks[5], (cout,), jnp.float32)),
        "w2": 0.1 * jax.random.normal(ks[6], (3, 3, cout, cout), jnp.float32),
        "b2": 0.1 * jax.random.normal(ks[7], (cout,), jnp.float32),
        "bn2": (1.0 + 0.1 * jax.random.normal(ks[8], (cout,), jnp.float32),
                0.1 * jax.random.normal(ks[9], (cout,), jnp.float32),
                0.05 * jax.random.normal(ks[10], (cout,), jnp.float32),
                0.5 + jax.random.uniform(ks[11], (cout,), jnp.float32)),
        "w_sc": None,
        "b_sc": None,
    }
    if projection:
        p["w_sc"] = 0.1 * jax.random.normal(ks[1], (cin, cout), jnp.float32)
        p["b_sc"] = 0.1 * jax.random.normal(ks[3], (cout,), jnp.float32)
    return p


# ----------------------------------------------------------------------------
if __name__ == "__main__":
    key = jax.random.PRNGKey(0)
    k_a, k_b, kx_a, kx_b = jax.random.split(key, 4)

    # --- Case A: projection shortcut (Cin != Cout), stride=1 ----------------
    N, Cin, H, W, Cout, stride = 2, 4, 16, 16, 8, 1
    x = jax.random.normal(kx_a, (N, Cin, H, W), jnp.float32)
    params = _make_params(k_a, Cin, Cout, projection=True)
    ref = _ref_forward(x, params, stride=stride)

    # f32 compute path (tight tolerance), both MXU K layouts (v6e/v7x + v5e).
    for fold in (True, False):
        out = jax.block_until_ready(
            residual_forward(x, params, stride=stride,
                             compute_dtype=jnp.float32,
                             out_dtype=jnp.float32, fold_kw=fold))
        assert out.shape == (N, Cout, H, W)
        assert jnp.allclose(out, ref, atol=1e-3, rtol=1e-3), \
            f"f32 mismatch vs reference (fold_kw={fold})"

    # Default bf16 MXU path (f32 accumulators), looser tolerance.
    out_bf16 = jax.block_until_ready(residual_forward(x, params, stride=stride))
    assert jnp.allclose(out_bf16.astype(jnp.float32), ref,
                        atol=5e-2, rtol=5e-2), "bf16 mismatch vs reference"

    # --- Case B: identity shortcut (Cin == Cout), stride=1 ------------------
    Cid = 8
    x2 = jax.random.normal(kx_b, (N, Cid, H, W), jnp.float32)
    params_id = _make_params(k_b, Cid, Cid, projection=False)
    ref2 = _ref_forward(x2, params_id, stride=1)
    out2 = jax.block_until_ready(
        residual_forward(x2, params_id, stride=1,
                         compute_dtype=jnp.float32, out_dtype=jnp.float32))
    assert out2.shape == (N, Cid, H, W)
    assert jnp.allclose(out2, ref2, atol=1e-3, rtol=1e-3), \
        "identity-shortcut mismatch vs reference"

    print("KERNEL_OK")
</pallas_src>

<mosaic_0001>
module attributes {stable_mosaic.version = 11 : i64} {
  func.func @_residual_block_kernel(%arg0: i32, %arg1: memref<1x18x18x4xf32, #tpu.memory_space<vmem>>, %arg2: memref<3x12x128xf32, #tpu.memory_space<vmem>>, %arg3: memref<1x128xf32, #tpu.memory_space<vmem>>, %arg4: memref<3x384x128xf32, #tpu.memory_space<vmem>>, %arg5: memref<1x128xf32, #tpu.memory_space<vmem>>, %arg6: memref<4x128xf32, #tpu.memory_space<vmem>>, %arg7: memref<1x128xf32, #tpu.memory_space<vmem>>, %arg8: memref<1x16x16x128xf32, #tpu.memory_space<vmem>>, %arg9: memref<18x24x128xf32, #tpu.memory_space<vmem>>) attributes {dimension_semantics = [#tpu.dimension_semantics<parallel>], iteration_bounds = array<i64: 2>, scalar_prefetch = 0 : i64, scratch_operands = 1 : i64, tpu.core_type = #tpu.core_type<tc>, window_params = [{transform_indices = @transform_0, window_bounds = array<i64: 1, 18, 18, 4>}, {pipeline_mode = #tpu.pipeline_mode<synchronous>, transform_indices = @transform_1, window_bounds = array<i64: 3, 12, 128>}, {pipeline_mode = #tpu.pipeline_mode<synchronous>, transform_indices = @transform_2, window_bounds = array<i64: 1, 128>}, {pipeline_mode = #tpu.pipeline_mode<synchronous>, transform_indices = @transform_3, window_bounds = array<i64: 3, 384, 128>}, {pipeline_mode = #tpu.pipeline_mode<synchronous>, transform_indices = @transform_4, window_bounds = array<i64: 1, 128>}, {pipeline_mode = #tpu.pipeline_mode<synchronous>, transform_indices = @transform_5, window_bounds = array<i64: 4, 128>}, {pipeline_mode = #tpu.pipeline_mode<synchronous>, transform_indices = @transform_6, window_bounds = array<i64: 1, 128>}, {transform_indices = @transform_7, window_bounds = array<i64: 1, 16, 16, 128>}]} {
    %cst = arith.constant 0.000000e+00 : f32
    %0 = vector.broadcast %cst : f32 to vector<256x128xf32>
    %c0 = arith.constant 0 : index
    %c0_0 = arith.constant 0 : index
    %c0_1 = arith.constant 0 : index
    %c0_2 = arith.constant 0 : index
    %1 = vector.load %arg1[%c0, %c0_0, %c0_1, %c0_2] : memref<1x18x18x4xf32, #tpu.memory_space<vmem>>, vector<1x16x16x4xf32>
    %2 = vector.shape_cast %1 : vector<1x16x16x4xf32> to vector<16x16x4xf32>
    %c0_3 = arith.constant 0 : index
    %c0_4 = arith.constant 0 : index
    %c1 = arith.constant 1 : index
    %c0_5 = arith.constant 0 : index
    %3 = vector.load %arg1[%c0_3, %c0_4, %c1, %c0_5] : memref<1x18x18x4xf32, #tpu.memory_space<vmem>>, vector<1x16x16x4xf32>
    %4 = vector.shape_cast %3 : vector<1x16x16x4xf32> to vector<16x16x4xf32>
    %c0_6 = arith.constant 0 : index
    %c0_7 = arith.constant 0 : index
    %c2 = arith.constant 2 : index
    %c0_8 = arith.constant 0 : index
    %5 = vector.load %arg1[%c0_6, %c0_7, %c2, %c0_8] : memref<1x18x18x4xf32, #tpu.memory_space<vmem>>, vector<1x16x16x4xf32>
    %6 = vector.shape_cast %5 : vector<1x16x16x4xf32> to vector<16x16x4xf32>
    %7 = tpu.concatenate %2, %4, %6 in 2 : vector<16x16x4xf32>, vector<16x16x4xf32>, vector<16x16x4xf32> -> vector<16x16x12xf32>
    %8 = vector.shape_cast %7 : vector<16x16x12xf32> to vector<256x12xf32>
    %c0_9 = arith.constant 0 : index
    %c0_10 = arith.constant 0 : index
    %c0_11 = arith.constant 0 : index
    %9 = vector.load %arg2[%c0_9, %c0_10, %c0_11] : memref<3x12x128xf32, #tpu.memory_space<vmem>>, vector<1x12x128xf32>
    %10 = vector.shape_cast %9 : vector<1x12x128xf32> to vector<12x128xf32>
    %cst_12 = arith.constant dense<0.000000e+00> : vector<256x128xf32>
    %11 = tpu.matmul %8, %10, %cst_12 {dimension_numbers = #tpu.dot_dimension_numbers<[1], [0], [0], [1], [0, 0, 1, 1], [], []>} : vector<256x12xf32>, vector<12x128xf32>, vector<256x128xf32> -> vector<256x128xf32>
    %12 = arith.addf %0, %11 : vector<256x128xf32>
    %c0_13 = arith.constant 0 : index
    %c1_14 = arith.constant 1 : index
    %c0_15 = arith.constant 0 : index
    %c0_16 = arith.constant 0 : index
    %13 = vector.load %arg1[%c0_13, %c1_14, %c0_15, %c0_16] : memref<1x18x18x4xf32, #tpu.memory_space<vmem>>, vector<1x16x16x4xf32>
    %14 = vector.shape_cast %13 : vector<1x16x16x4xf32> to vector<16x16x4xf32>
    %c0_17 = arith.constant 0 : index
    %c1_18 = arith.constant 1 : index
    %c1_19 = arith.constant 1 : index
    %c0_20 = arith.constant 0 : index
    %15 = vector.load %arg1[%c0_17, %c1_18, %c1_19, %c0_20] : memref<1x18x18x4xf32, #tpu.memory_space<vmem>>, vector<1x16x16x4xf32>
    %16 = vector.shape_cast %15 : vector<1x16x16x4xf32> to vector<16x16x4xf32>
    %c0_21 = arith.constant 0 : index
    %c1_22 = arith.constant 1 : index
    %c2_23 = arith.constant 2 : index
    %c0_24 = arith.constant 0 : index
    %17 = vector.load %arg1[%c0_21, %c1_22, %c2_23, %c0_24] : memref<1x18x18x4xf32, #tpu.memory_space<vmem>>, vector<1x16x16x4xf32>
    %18 = vector.shape_cast %17 : vector<1x16x16x4xf32> to vector<16x16x4xf32>
    %19 = tpu.concatenate %14, %16, %18 in 2 : vector<16x16x4xf32>, vector<16x16x4xf32>, vector<16x16x4xf32> -> vector<16x16x12xf32>
    %20 = vector.shape_cast %19 : vector<16x16x12xf32> to vector<256x12xf32>
    %c1_25 = arith.constant 1 : index
    %c0_26 = arith.constant 0 : index
    %c0_27 = arith.constant 0 : index
    %21 = vector.load %arg2[%c1_25, %c0_26, %c0_27] : memref<3x12x128xf32, #tpu.memory_space<vmem>>, vector<1x12x128xf32>
    %22 = vector.shape_cast %21 : vector<1x12x128xf32> to vector<12x128xf32>
    %cst_28 = arith.constant dense<0.000000e+00> : vector<256x128xf32>
    %23 = tpu.matmul %20, %22, %cst_28 {dimension_numbers = #tpu.dot_dimension_numbers<[1], [0], [0], [1], [0, 0, 1, 1], [], []>} : vector<256x12xf32>, vector<12x128xf32>, vector<256x128xf32> -> vector<256x128xf32>
    %24 = arith.addf %12, %23 : vector<256x128xf32>
    %c0_29 = arith.constant 0 : index
    %c2_30 = arith.constant 2 : index
    %c0_31 = arith.constant 0 : index
    %c0_32 = arith.constant 0 : index
    %25 = vector.load %arg1[%c0_29, %c2_30, %c0_31, %c0_32] : memref<1x18x18x4xf32, #tpu.memory_space<vmem>>, vector<1x16x16x4xf32>
    %26 = vector.shape_cast %25 : vector<1x16x16x4xf32> to vector<16x16x4xf32>
    %c0_33 = arith.constant 0 : index
    %c2_34 = arith.constant 2 : index
    %c1_35 = arith.constant 1 : index
    %c0_36 = arith.constant 0 : index
    %27 = vector.load %arg1[%c0_33, %c2_34, %c1_35, %c0_36] : memref<1x18x18x4xf32, #tpu.memory_space<vmem>>, vector<1x16x16x4xf32>
    %28 = vector.shape_cast %27 : vector<1x16x16x4xf32> to vector<16x16x4xf32>
    %c0_37 = arith.constant 0 : index
    %c2_38 = arith.constant 2 : index
    %c2_39 = arith.constant 2 : index
    %c0_40 = arith.constant 0 : index
    %29 = vector.load %arg1[%c0_37, %c2_38, %c2_39, %c0_40] : memref<1x18x18x4xf32, #tpu.memory_space<vmem>>, vector<1x16x16x4xf32>
    %30 = vector.shape_cast %29 : vector<1x16x16x4xf32> to vector<16x16x4xf32>
    %31 = tpu.concatenate %26, %28, %30 in 2 : vector<16x16x4xf32>, vector<16x16x4xf32>, vector<16x16x4xf32> -> vector<16x16x12xf32>
    %32 = vector.shape_cast %31 : vector<16x16x12xf32> to vector<256x12xf32>
    %c2_41 = arith.constant 2 : index
    %c0_42 = arith.constant 0 : index
    %c0_43 = arith.constant 0 : index
    %33 = vector.load %arg2[%c2_41, %c0_42, %c0_43] : memref<3x12x128xf32, #tpu.memory_space<vmem>>, vector<1x12x128xf32>
    %34 = vector.shape_cast %33 : vector<1x12x128xf32> to vector<12x128xf32>
    %cst_44 = arith.constant dense<0.000000e+00> : vector<256x128xf32>
    %35 = tpu.matmul %32, %34, %cst_44 {dimension_numbers = #tpu.dot_dimension_numbers<[1], [0], [0], [1], [0, 0, 1, 1], [], []>} : vector<256x12xf32>, vector<12x128xf32>, vector<256x128xf32> -> vector<256x128xf32>
    %36 = arith.addf %24, %35 : vector<256x128xf32>
    %c0_45 = arith.constant 0 : index
    %c0_46 = arith.constant 0 : index
    %37 = vector.load %arg3[%c0_45, %c0_46] : memref<1x128xf32, #tpu.memory_space<vmem>>, vector<1x128xf32>
    %38 = vector.broadcast %37 : vector<1x128xf32> to vector<256x128xf32>
    %39 = arith.addf %36, %38 : vector<256x128xf32>
    %cst_47 = arith.constant 0.000000e+00 : f32
    %40 = vector.broadcast %cst_47 : f32 to vector<256x128xf32>
    %41 = arith.maximumf %39, %40 : vector<256x128xf32>
    %42 = vector.shape_cast %41 : vector<256x128xf32> to vector<16x16x128xf32>
    %cst_48 = arith.constant 0.000000e+00 : f32
    %43 = vector.broadcast %cst_48 : f32 to vector<1x24x128xf32>
    %c0_49 = arith.constant 0 : index
    %c0_50 = arith.constant 0 : index
    %c0_51 = arith.constant 0 : index
    %44 = vector.load %arg9[%c0_49, %c0_50, %c0_51] : memref<18x24x128xf32, #tpu.memory_space<vmem>>, vector<1x24x128xf32>
    tpu.vector_store %arg9[%c0_49, %c0_50, %c0_51], %43 {strides = array<i32>} : memref<18x24x128xf32, #tpu.memory_space<vmem>>, vector<1x24x128xf32>,
    %cst_52 = arith.constant 0.000000e+00 : f32
    %45 = vector.broadcast %cst_52 : f32 to vector<1x24x128xf32>
    %c17 = arith.constant 17 : index
    %c0_53 = arith.constant 0 : index
    %c0_54 = arith.constant 0 : index
    %46 = vector.load %arg9[%c17, %c0_53, %c0_54] : memref<18x24x128xf32, #tpu.memory_space<vmem>>, vector<1x24x128xf32>
    tpu.vector_store %arg9[%c17, %c0_53, %c0_54], %45 {strides = array<i32>} : memref<18x24x128xf32, #tpu.memory_space<vmem>>, vector<1x24x128xf32>,
    %cst_55 = arith.constant 0.000000e+00 : f32
    %47 = vector.broadcast %cst_55 : f32 to vector<16x1x128xf32>
    %c1_56 = arith.constant 1 : index
    %c0_57 = arith.constant 0 : index
    %c0_58 = arith.constant 0 : index
    %48 = vector.load %arg9[%c1_56, %c0_57, %c0_58] : memref<18x24x128xf32, #tpu.memory_space<vmem>>, vector<16x1x128xf32>
    tpu.vector_store %arg9[%c1_56, %c0_57, %c0_58], %47 {strides = array<i32>} : memref<18x24x128xf32, #tpu.memory_space<vmem>>, vector<16x1x128xf32>,
    %cst_59 = arith.constant 0.000000e+00 : f32
    %49 = vector.broadcast %cst_59 : f32 to vector<16x7x128xf32>
    %c1_60 = arith.constant 1 : index
    %c17_61 = arith.constant 17 : index
    %c0_62 = arith.constant 0 : index
    %50 = vector.load %arg9[%c1_60, %c17_61, %c0_62] : memref<18x24x128xf32, #tpu.memory_space<vmem>>, vector<16x7x128xf32>
    tpu.vector_store %arg9[%c1_60, %c17_61, %c0_62], %49 {strides = array<i32>} : memref<18x24x128xf32, #tpu.memory_space<vmem>>, vector<16x7x128xf32>,
    %c1_63 = arith.constant 1 : index
    %c1_64 = arith.constant 1 : index
    %c0_65 = arith.constant 0 : index
    %51 = vector.load %arg9[%c1_63, %c1_64, %c0_65] : memref<18x24x128xf32, #tpu.memory_space<vmem>>, vector<16x16x128xf32>
    tpu.vector_store %arg9[%c1_63, %c1_64, %c0_65], %42 {strides = array<i32>} : memref<18x24x128xf32, #tpu.memory_space<vmem>>, vector<16x16x128xf32>,
    %c0_66 = arith.constant 0 : index
    %c1_67 = arith.constant 1 : index
    %c1_68 = arith.constant 1 : index
    %c0_69 = arith.constant 0 : index
    %52 = vector.load %arg1[%c0_66, %c1_67, %c1_68, %c0_69] : memref<1x18x18x4xf32, #tpu.memory_space<vmem>>, vector<1x16x16x4xf32>
    %53 = vector.shape_cast %52 : vector<1x16x16x4xf32> to vector<16x16x4xf32>
    %54 = vector.shape_cast %53 : vector<16x16x4xf32> to vector<256x4xf32>
    %c0_70 = arith.constant 0 : index
    %c0_71 = arith.constant 0 : index
    %55 = vector.load %arg6[%c0_70, %c0_71] : memref<4x128xf32, #tpu.memory_space<vmem>>, vector<4x128xf32>
    %cst_72 = arith.constant dense<0.000000e+00> : vector<256x128xf32>
    %56 = tpu.matmul %54, %55, %cst_72 {dimension_numbers = #tpu.dot_dimension_numbers<[1], [0], [0], [1], [0, 0, 1, 1], [], []>} : vector<256x4xf32>, vector<4x128xf32>, vector<256x128xf32> -> vector<256x128xf32>
    %c0_73 = arith.constant 0 : index
    %c0_74 = arith.constant 0 : index
    %57 = vector.load %arg7[%c0_73, %c0_74] : memref<1x128xf32, #tpu.memory_space<vmem>>, vector<1x128xf32>
    %58 = vector.broadcast %57 : vector<1x128xf32> to vector<256x128xf32>
    %59 = arith.addf %56, %58 : vector<256x128xf32>
    %cst_75 = arith.constant 0.000000e+00 : f32
    %60 = vector.broadcast %cst_75 : f32 to vector<256x128xf32>
    %c0_76 = arith.constant 0 : index
    %c0_77 = arith.constant 0 : index
    %c0_78 = arith.constant 0 : index
    %61 = vector.load %arg9[%c0_76, %c0_77, %c0_78] : memref<18x24x128xf32, #tpu.memory_space<vmem>>, vector<16x24x128xf32>
    %62 = vector.extract_strided_slice %61 {offsets = [0, 0, 0], sizes = [16, 16, 128], strides = [1, 1, 1]} : vector<16x24x128xf32> to vector<16x16x128xf32>
    %63 = vector.extract_strided_slice %61 {offsets = [0, 1, 0], sizes = [16, 16, 128], strides = [1, 1, 1]} : vector<16x24x128xf32> to vector<16x16x128xf32>
    %64 = vector.extract_strided_slice %61 {offsets = [0, 2, 0], sizes = [16, 16, 128], strides = [1, 1, 1]} : vector<16x24x128xf32> to vector<16x16x128xf32>
    %65 = tpu.concatenate %62, %63, %64 in 2 : vector<16x16x128xf32>, vector<16x16x128xf32>, vector<16x16x128xf32> -> vector<16x16x384xf32>
    %66 = vector.shape_cast %65 : vector<16x16x384xf32> to vector<256x384xf32>
    %c0_79 = arith.constant 0 : index
    %c0_80 = arith.constant 0 : index
    %c0_81 = arith.constant 0 : index
    %67 = vector.load %arg4[%c0_79, %c0_80, %c0_81] : memref<3x384x128xf32, #tpu.memory_space<vmem>>, vector<1x384x128xf32>
    %68 = vector.shape_cast %67 : vector<1x384x128xf32> to vector<384x128xf32>
    %cst_82 = arith.constant dense<0.000000e+00> : vector<256x128xf32>
    %69 = tpu.matmul %66, %68, %cst_82 {dimension_numbers = #tpu.dot_dimension_numbers<[1], [0], [0], [1], [0, 0, 1, 1], [], []>} : vector<256x384xf32>, vector<384x128xf32>, vector<256x128xf32> -> vector<256x128xf32>
    %70 = arith.addf %60, %69 : vector<256x128xf32>
    %c1_83 = arith.constant 1 : index
    %c0_84 = arith.constant 0 : index
    %c0_85 = arith.constant 0 : index
    %71 = vector.load %arg9[%c1_83, %c0_84, %c0_85] : memref<18x24x128xf32, #tpu.memory_space<vmem>>, vector<16x24x128xf32>
    %72 = vector.extract_strided_slice %71 {offsets = [0, 0, 0], sizes = [16, 16, 128], strides = [1, 1, 1]} : vector<16x24x128xf32> to vector<16x16x128xf32>
    %73 = vector.extract_strided_slice %71 {offsets = [0, 1, 0], sizes = [16, 16, 128], strides = [1, 1, 1]} : vector<16x24x128xf32> to vector<16x16x128xf32>
    %74 = vector.extract_strided_slice %71 {offsets = [0, 2, 0], sizes = [16, 16, 128], strides = [1, 1, 1]} : vector<16x24x128xf32> to vector<16x16x128xf32>
    %75 = tpu.concatenate %72, %73, %74 in 2 : vector<16x16x128xf32>, vector<16x16x128xf32>, vector<16x16x128xf32> -> vector<16x16x384xf32>
    %76 = vector.shape_cast %75 : vector<16x16x384xf32> to vector<256x384xf32>
    %c1_86 = arith.constant 1 : index
    %c0_87 = arith.constant 0 : index
    %c0_88 = arith.constant 0 : index
    %77 = vector.load %arg4[%c1_86, %c0_87, %c0_88] : memref<3x384x128xf32, #tpu.memory_space<vmem>>, vector<1x384x128xf32>
    %78 = vector.shape_cast %77 : vector<1x384x128xf32> to vector<384x128xf32>
    %cst_89 = arith.constant dense<0.000000e+00> : vector<256x128xf32>
    %79 = tpu.matmul %76, %78, %cst_89 {dimension_numbers = #tpu.dot_dimension_numbers<[1], [0], [0], [1], [0, 0, 1, 1], [], []>} : vector<256x384xf32>, vector<384x128xf32>, vector<256x128xf32> -> vector<256x128xf32>
    %80 = arith.addf %70, %79 : vector<256x128xf32>
    %c2_90 = arith.constant 2 : index
    %c0_91 = arith.constant 0 : index
    %c0_92 = arith.constant 0 : index
    %81 = vector.load %arg9[%c2_90, %c0_91, %c0_92] : memref<18x24x128xf32, #tpu.memory_space<vmem>>, vector<16x24x128xf32>
    %82 = vector.extract_strided_slice %81 {offsets = [0, 0, 0], sizes = [16, 16, 128], strides = [1, 1, 1]} : vector<16x24x128xf32> to vector<16x16x128xf32>
    %83 = vector.extract_strided_slice %81 {offsets = [0, 1, 0], sizes = [16, 16, 128], strides = [1, 1, 1]} : vector<16x24x128xf32> to vector<16x16x128xf32>
    %84 = vector.extract_strided_slice %81 {offsets = [0, 2, 0], sizes = [16, 16, 128], strides = [1, 1, 1]} : vector<16x24x128xf32> to vector<16x16x128xf32>
    %85 = tpu.concatenate %82, %83, %84 in 2 : vector<16x16x128xf32>, vector<16x16x128xf32>, vector<16x16x128xf32> -> vector<16x16x384xf32>
    %86 = vector.shape_cast %85 : vector<16x16x384xf32> to vector<256x384xf32>
    %c2_93 = arith.constant 2 : index
    %c0_94 = arith.constant 0 : index
    %c0_95 = arith.constant 0 : index
    %87 = vector.load %arg4[%c2_93, %c0_94, %c0_95] : memref<3x384x128xf32, #tpu.memory_space<vmem>>, vector<1x384x128xf32>
    %88 = vector.shape_cast %87 : vector<1x384x128xf32> to vector<384x128xf32>
    %cst_96 = arith.constant dense<0.000000e+00> : vector<256x128xf32>
    %89 = tpu.matmul %86, %88, %cst_96 {dimension_numbers = #tpu.dot_dimension_numbers<[1], [0], [0], [1], [0, 0, 1, 1], [], []>} : vector<256x384xf32>, vector<384x128xf32>, vector<256x128xf32> -> vector<256x128xf32>
    %90 = arith.addf %80, %89 : vector<256x128xf32>
    %c0_97 = arith.constant 0 : index
    %c0_98 = arith.constant 0 : index
    %91 = vector.load %arg5[%c0_97, %c0_98] : memref<1x128xf32, #tpu.memory_space<vmem>>, vector<1x128xf32>
    %92 = vector.broadcast %91 : vector<1x128xf32> to vector<256x128xf32>
    %93 = arith.addf %90, %92 : vector<256x128xf32>
    %94 = arith.addf %93, %59 : vector<256x128xf32>
    %cst_99 = arith.constant 0.000000e+00 : f32
    %95 = vector.broadcast %cst_99 : f32 to vector<256x128xf32>
    %96 = arith.maximumf %94, %95 : vector<256x128xf32>
    %97 = vector.shape_cast %96 : vector<256x128xf32> to vector<16x16x128xf32>
    %c0_100 = arith.constant 0 : index
    %c0_101 = arith.constant 0 : index
    %c0_102 = arith.constant 0 : index
    %c0_103 = arith.constant 0 : index
    %98 = vector.load %arg8[%c0_100, %c0_101, %c0_102, %c0_103] : memref<1x16x16x128xf32, #tpu.memory_space<vmem>>, vector<1x16x16x128xf32>
    %99 = vector.shape_cast %98 : vector<1x16x16x128xf32> to vector<16x16x128xf32>
    %100 = vector.shape_cast %97 : vector<16x16x128xf32> to vector<1x16x16x128xf32>
    tpu.vector_store %arg8[%c0_100, %c0_101, %c0_102, %c0_103], %100 {strides = array<i32>} : memref<1x16x16x128xf32, #tpu.memory_space<vmem>>, vector<1x16x16x128xf32>,
    return
  }
  func.func @transform_0(%arg0: i32) -> (i32, i32, i32, i32) {
    %c0_i32 = arith.constant 0 : i32
    %c0_i32_0 = arith.constant 0 : i32
    %c0_i32_1 = arith.constant 0 : i32
    %c0_i32_2 = arith.constant 0 : i32
    return %arg0, %c0_i32, %c0_i32_0, %c0_i32_1 : i32, i32, i32, i32
  }
  func.func @transform_1(%arg0: i32) -> (i32, i32, i32) {
    %c0_i32 = arith.constant 0 : i32
    %c0_i32_0 = arith.constant 0 : i32
    %c0_i32_1 = arith.constant 0 : i32
    %c0_i32_2 = arith.constant 0 : i32
    return %c0_i32, %c0_i32_0, %c0_i32_1 : i32, i32, i32
  }
  func.func @transform_2(%arg0: i32) -> (i32, i32) {
    %c0_i32 = arith.constant 0 : i32
    %c0_i32_0 = arith.constant 0 : i32
    %c0_i32_1 = arith.constant 0 : i32
    return %c0_i32, %c0_i32_0 : i32, i32
  }
  func.func @transform_3(%arg0: i32) -> (i32, i32, i32) {
    %c0_i32 = arith.constant 0 : i32
    %c0_i32_0 = arith.constant 0 : i32
    %c0_i32_1 = arith.constant 0 : i32
    %c0_i32_2 = arith.constant 0 : i32
    return %c0_i32, %c0_i32_0, %c0_i32_1 : i32, i32, i32
  }
  func.func @transform_4(%arg0: i32) -> (i32, i32) {
    %c0_i32 = arith.constant 0 : i32
    %c0_i32_0 = arith.constant 0 : i32
    %c0_i32_1 = arith.constant 0 : i32
    return %c0_i32, %c0_i32_0 : i32, i32
  }
  func.func @transform_5(%arg0: i32) -> (i32, i32) {
    %c0_i32 = arith.constant 0 : i32
    %c0_i32_0 = arith.constant 0 : i32
    %c0_i32_1 = arith.constant 0 : i32
    return %c0_i32, %c0_i32_0 : i32, i32
  }
  func.func @transform_6(%arg0: i32) -> (i32, i32) {
    %c0_i32 = arith.constant 0 : i32
    %c0_i32_0 = arith.constant 0 : i32
    %c0_i32_1 = arith.constant 0 : i32
    return %c0_i32, %c0_i32_0 : i32, i32
  }
  func.func @transform_7(%arg0: i32) -> (i32, i32, i32, i32) {
    %c0_i32 = arith.constant 0 : i32
    %c0_i32_0 = arith.constant 0 : i32
    %c0_i32_1 = arith.constant 0 : i32
    %c0_i32_2 = arith.constant 0 : i32
    return %arg0, %c0_i32, %c0_i32_0, %c0_i32_1 : i32, i32, i32, i32
  }
}

</mosaic_0001>

<bundles_post_ra>
// kernel: tpu_custom_call.1
= control target key start
LH: loop header
LB: loop body
LE: loop exit
PB: predicated region body
PF: predicated region fallthrough
CT: control target
= control target key end

     0   :  { %12 = vsyncpa [#allocation4], 0  ;;  %s10131_s0 = inlined_call_operand.vmem [shape: f32[2,18,18,4], index: 0, kind: input, shape index: {}]   ;;  %s10132_s1 = inlined_call_operand.vmem [shape: f32[3,12,128], index: 1, kind: input, shape index: {}]   ;;  %s10133_s2 = inlined_call_operand.vmem [shape: f32[1,128], index: 2, kind: input, shape index: {}]   ;;  %s10134_s3 = inlined_call_operand.hbm [shape: f32[3,384,128], index: 3, kind: input, shape index: {}]   ;;  %s10135_s4 = inlined_call_operand.vmem [shape: f32[1,128], index: 4, kind: input, shape index: {}]   ;;  %s10136_s5 = inlined_call_operand.vmem [shape: f32[4,128], index: 5, kind: input, shape index: {}]   ;;  %s10137_s6 = inlined_call_operand.vmem [shape: f32[1,128], index: 6, kind: input, shape index: {}]   ;;  %s10138_s7 = inlined_call_operand.hbm [shape: f32[2,16,16,128], index: 7, kind: output, shape index: {}]  }
   0x1   :  { %13 = vsyncpa [#allocation5], 0 }
   0x2   :  { %15 = vsyncpa [#allocation5 + $0x1], 0  ;;  %s7455_s24 = smov 0   ;;  %s7457_s25 = smov 0  }
   0x3   :  { %s7459_s26 = smov 0   ;;  %s7461_s27 = smov 0  }
   0x4 LB: > { %s7476_s28 = sadd.s32 4294967295, %s7403_s27   ;;  %s5779_s29 = sadd.s32 4294967294, %s7403_s27   ;;  %s7403_s27 = sphi %s7461_s27, %s10346_s27   ;;  %s7399_s26 = sphi %s7459_s26, %s10345_s26   ;;  %s7395_s25 = sphi %s7457_s25, %s10344_s25   ;;  %s7391_s24 = sphi %s7455_s24, %s10343_s24  }
   0x5   : > { %s7480_s30 = sadd.s32 1, %s7403_s27   ;;  %s180_s8 = sadd.s32 1, %s7399_s26 }
   0x6   : > { %s177_s9 = ssub.s32 %s7403_s27, %s7480_s30  ;;  %p190_p0 = scmp.ne.s32.totalorder %s7399_s26, %s7395_s25 }
   0x7   : > { %p178_p1 = scmp.eq.s32.totalorder %s177_s9, 0  ;;  %p191_p2 = scmp.eq.s32.totalorder %s7476_s28, 1 }
   0x8   : > { %p196_p3 = scmp.ne.s32.totalorder %s7395_s25, %s7391_s24  ;;  %p197_p4 = scmp.eq.s32.totalorder %s5779_s29, 1 }
   0x9   : > { %s7491_s10 = scalar_select %p178_p1, %s7399_s26, %s180_s8  }
   0xa   : > { %p7493_p5 = por %p191_p2, %p190_p0  ;;  %p7497_p6 = por %p197_p4, %p196_p3 }
   0xb   : > { %p5780_p7 = scmp.ge.s32.totalorder %s7403_s27, 1  ;;  %p204_p8 = scmp.lt.s32.totalorder %s7403_s27, 3 }
   0xc   : > { %s10161_s11 = scalar_select %p7493_p5, 1, 0 }
   0xd   : > { %s10162_s12 = scalar_select %p7497_p6, 1, 0 }
   0xe   : > { %p10139_p9 = scmp.eq.s32.totalorder %s7476_s28, 0  ;;  %p7504_p10 = pnand %p5780_p7, %p204_p8 }
   0xf   : > { %s7405_s14 = smov [#allocation3]   ;;  %s7309_s19 = scalar_lea.hbm %s10134_s3, 18432 }
  0x10   : > { %s10163_s13 = scalar_select %p7504_p10, 1, 0 }
  0x11   : > { %s222_s15 = sshll.u32 %s7405_s14, 4  ;;  %p7210_p11 = pneg %p7504_p10  ;;  %s223_s15 = int_to_ptr.vmem [resolvable:$true] %s222_s15 }
  0x12   : > { %p7310_p13 = scmp.ne.s32.totalorder %s10134_s3, %s7309_s19  ;;  %p7316_p3 = scmp.lt.u32.totalorder %s7309_s19, %s10134_s3 }
  0x13   : > { %p7512_p12 = pnand %p10139_p9, %p7210_p11 }
  0x15   : > { %p7311_p0 = pneg %p7512_p12 }
  0x17   : > { %p7312_p1 = pnand %p7311_p0, %p7310_p13 }
  0x19   : > { %p7313_p2 = pneg %p7312_p1 }
  0x1b   : > { %p7318_p4 = pnand %p7316_p3, %p7313_p2 }
  0x1d   : > { %7321 = shalt.err (!%p7318_p4)
}
  0x1e   : > { %s7322_s29 = scalar_lea.vmem %s223_s15, 18432  ;;  %p7330_p9 = scmp.lt.s32.totalorder %s223_s15, %s223_s15 }
  0x1f   : > { %p7323_p7 = scmp.ne.s32.totalorder %s223_s15, %s7322_s29  ;;  %p7331_p6 = scmp.lt.s32.totalorder %s7322_s29, %s7322_s29 }
  0x21   : > { %p7325_p8 = pnand %p7323_p7, %p7311_p0  ;;  %p7332_p5 = por %p7331_p6, %p7330_p9 }
  0x23   : > { %p7326_p11 = pneg %p7325_p8 }
  0x25   : > { %p7333_p10 = pnand %p7332_p5, %p7326_p11 }
  0x27   : > { %7336 = shalt.err (!%p7333_p10)
}
  0x28   : > { %s7406_s8 = smov 128   ;;  %s7407_s9 = smov 8  }
  0x29   : > { %7213 = dma.hbm_to_vmem [thread:$0]  (!%p7512_p12), %s10134_s3, 18432, %s223_s15, [#allocation4], %s7406_s8, %s7406_s8, %s7407_s9  }
  0x2a   : > { %p10165_p13 = scmp.ne.s32.totalorder %s10163_s13, 0 }
  0x2c   : > { %255 = sbr.rel (%p10165_p13) target bundleno = 1286 (0x506), region = 48 }
  0x33   : > { %p10166_p1 = scmp.eq.s32.totalorder %s7476_s28, 0 }
  0x35   : > { %7382 = dma.done.wait (%p10166_p1), [#allocation4], 18432   ;;  %p10167_p0 = pmov %p10166_p1 }
  0x36   : > { %p287_p5 = scmp.lt.s32.totalorder %s7476_s28, 1  ;;  %s7408_s13 = smov 8   ;;  %vm1229_vm0 = vcmask 1043456   ;;  %v5883_v14 = vld [vmem:[%s10132_s1 + $0x10] sm:$0xff]  ;;  %v5884_v15 = vld [vmem:[%s10132_s1 + $0x18] sm:$0xf] }
  0x37   : > { %7384 = vsyncadd (%p10167_p0), [#allocation4], 4294948864  ;;  %s7409_s15 = smov 4   ;;  %v6881_v16 = vpack.c.bf16 %v5884_v15, %v5883_v14  ;;  %vm7410_vm1 = vmmov 1   ;;  %vm644_vm3 = vcmask 31744   ;;  %vm677_vm4 = vcmask 64512  }
  0x38   : > { %s288_s18 = scalar_select %p287_p5, %s7476_s28, 1  ;;  %vm7618_vm2 = vmpackc.low %vm1229_vm0, %vm7410_vm1  ;;  %vm1132_vm5 = vcmask 97280   ;;  %vm3161_vm6 = vcmask 1046528   ;;  %vm3274_vm7 = vcmask 1045504  }
  0x39   : > { %6883 = vmatprep.subr.msk.bf16.mxu0 %vm7618_vm2, %v6881_v16  ;;  %s284_s14 = sand.u32 1, %s7395_s25   ;;  %s6155_s23 = sshll.u32 %s7476_s28, 12 }
  0x3a   : > { %s7203_s19 = smul.u32 432, %s288_s18  ;;  %6886 = vmatpush3.bf16.msk.msra.mxu0 %vm7618_vm2, %v6881_v16  ;;  %s5785_s16 = sshll.u32 %s284_s14, 8 }
  0x3b   : > { %s9911_s22 = scalar_lea.vmem [#allocation6], %s5785_s16  ;;  %s10082_s8 = scalar_lea.hbm %s10138_s7, %s6155_s23 }
  0x3c   : > { %s7543_s21 = scalar_lea.vmem %s10131_s0, %s7203_s19  ;;  %s5705_s29 = sshll.u32 %s9911_s22, 4  ;;  %s10084_s29 = int_to_ptr.vmem [resolvable:$true] %s5705_s29 }
  0x3d   : > { %v7546_v0 = vld [vmem:[%s7543_s21 + $0x1a] sm:$0xff]  ;;  %v7556_v2 = vld [vmem:[%s7543_s21 + $0x22] sm:$0xff]  ;;  %v7569_v5 = vld [vmem:[%s7543_s21 + $0x31] sm:$0xff]  ;;  %s10089_s9 = scalar_lea.sflag [#allocation5], %s284_s14  ;;  %s7337_s28 = scalar_lea.vmem %s10084_s29, 4096 }
  0x3e   : > { %v7549_v1 = vld [vmem:[%s7543_s21 + $0x19] sm:$0xff]  ;;  %969 = vrot.lane.b32.xlu1 %v7546_v0, %s7408_s13  ;;  %v7559_v3 = vld [vmem:[%s7543_s21 + $0x21] sm:$0xff]  ;;  %v7586_v8 = vld [vmem:[%s7543_s21 + $0x51] sm:$0xff]  ;;  %p7338_p6 = scmp.ne.s32.totalorder %s10084_s29, %s7337_s28  ;;  %p10341_p9 = scmp.ne.s32.totalorder %s10161_s11, 0 }
  0x3f   : > { %841 = vrot.lane.b32.xlu0 %v7549_v1, %s7409_s15  ;;  %v7566_v4 = vld [vmem:[%s7543_s21 + $0x39] sm:$0xff]  ;;  %v7589_v9 = vld [vmem:[%s7543_s21 + $0x49] sm:$0xff]  ;;  %v7609_v13 = vld [vmem:[%s7543_s21 + $0x61] sm:$0xff]  ;;  %s7413_s17 = smov [#allocation6]  }
  0x40   : > { %v7576_v6 = vld [vmem:[%s7543_s21 + $0x3a] sm:$0xff]  ;;  %v7579_v7 = vld [vmem:[%s7543_s21 + $0x32] sm:$0xff]  ;;  %v7599_v11 = vld [vmem:[%s7543_s21 + $0x4a] sm:$0xff]  ;;  %p7339_p10 = pnand %p7338_p6, %p10341_p9  ;;  %s7341_s18 = sshll.u32 %s7413_s17, 4  ;;  %s7342_s18 = int_to_ptr.vmem [resolvable:$false] %s7341_s18 }
  0x41   : > { %v7596_v10 = vld [vmem:[%s7543_s21 + $0x52] sm:$0xff]  ;;  %v7606_v12 = vld [vmem:[%s7543_s21 + $0x69] sm:$0xff]  ;;  %v7641_v20 = vld [vmem:[%s7543_s21 + $0x81] sm:$0xff]  ;;  %s7343_s19 = scalar_lea.vmem %s7342_s18, 8192  ;;  %p7344_p2 = scmp.lt.s32.totalorder %s10084_s29, %s7342_s18 }
  0x42   : > { %971 = vrot.lane.b32.xlu1 %v7556_v2, %s7408_s13  ;;  %v7627_v18 = vld [vmem:[%s7543_s21 + $0x6a] sm:$0xff]  ;;  %v7630_v19 = vld [vmem:[%s7543_s21 + $0x62] sm:$0xff]  ;;  %v7644_v21 = vld [vmem:[%s7543_s21 + $0x79] sm:$0xff]  ;;  %p7340_p12 = pneg %p7339_p10  ;;  %p7345_p3 = scmp.lt.s32.totalorder %s7343_s19, %s7337_s28 }
  0x43   : > { %843 = vrot.lane.b32.xlu0 %v7559_v3, %s7409_s15  ;;  %v7651_v22 = vld [vmem:[%s7543_s21 + $0x82] sm:$0xff]  ;;  %v7654_v23 = vld [vmem:[%s7543_s21 + $0x7a] sm:$0xff]  ;;  %v7664_v25 = vld [vmem:[%s7543_s21 + $0x91] sm:$0xff] }
  0x44   : > { %v7661_v24 = vld [vmem:[%s7543_s21 + $0x99] sm:$0xff]  ;;  %v7681_v28 = vld [vmem:[%s7543_s21 + $0xb1] sm:$0xff]  ;;  %v7684_v29 = vld [vmem:[%s7543_s21 + $0xa9] sm:$0xff]  ;;  %p7346_p4 = por %p7345_p3, %p7344_p2 }
  0x45   : > { %v7671_v26 = vld [vmem:[%s7543_s21 + $0x9a] sm:$0xff]  ;;  %v7674_v27 = vld [vmem:[%s7543_s21 + $0x92] sm:$0xff]  ;;  %v7694_v31 = vld [vmem:[%s7543_s21 + $0xaa] sm:$0xff] }
  0x46   : > { %847 = vrot.lane.b32.xlu1 %v7566_v4, %s7409_s15  ;;  %v7691_v30 = vld [vmem:[%s7543_s21 + $0xb2] sm:$0xff]  ;;  %v7701_v32 = vld [vmem:[%s7543_s21 + $0xc9] sm:$0xff]  ;;  %v7704_v33 = vld [vmem:[%s7543_s21 + $0xc1] sm:$0xff]  ;;  %p7347_p7 = pnand %p7346_p4, %p7340_p12 }
  0x47   : > { %845 = vrot.lane.b32.xlu0 %v7569_v5, %s7409_s15  ;;  %v7711_v34 = vld [vmem:[%s7543_s21 + $0xca] sm:$0xff]  ;;  %v7714_v35 = vld [vmem:[%s7543_s21 + $0xc2] sm:$0xff]  ;;  %v7724_v37 = vld [vmem:[%s7543_s21 + $0xd9] sm:$0xff] }
  0x48   : > { %v7721_v36 = vld [vmem:[%s7543_s21 + $0xe1] sm:$0xff]  ;;  %v7741_v40 = vld [vmem:[%s7543_s21 + $0xf9] sm:$0xff]  ;;  %v7744_v41 = vld [vmem:[%s7543_s21 + $0xf1] sm:$0xff] }
  0x49   : > { %v7731_v38 = vld [vmem:[%s7543_s21 + $0xe2] sm:$0xff]  ;;  %v7734_v39 = vld [vmem:[%s7543_s21 + $0xda] sm:$0xff]  ;;  %v7754_v43 = vld [vmem:[%s7543_s21 + $0xf2] sm:$0xff] }
  0x4a   : > { %975 = vrot.lane.b32.xlu1 %v7576_v6, %s7408_s13  ;;  %v7751_v42 = vld [vmem:[%s7543_s21 + $0xfa] sm:$0xff]  ;;  %v7761_v44 = vld [vmem:[%s7543_s21 + $0x111] sm:$0xff]  ;;  %v7764_v45 = vld [vmem:[%s7543_s21 + $0x109] sm:$0xff] }
  0x4b   : > { %973 = vrot.lane.b32.xlu0 %v7579_v7, %s7408_s13  ;;  %v7771_v46 = vld [vmem:[%s7543_s21 + $0x112] sm:$0xff]  ;;  %v7774_v47 = vld [vmem:[%s7543_s21 + $0x10a] sm:$0xff]  ;;  %v7784_v49 = vld [vmem:[%s7543_s21 + $0x121] sm:$0xff] }
  0x4c   : > { %v7781_v48 = vld [vmem:[%s7543_s21 + $0x129] sm:$0xff]  ;;  %v7801_v52 = vld [vmem:[%s7543_s21 + $0x141] sm:$0xff]  ;;  %v7804_v53 = vld [vmem:[%s7543_s21 + $0x139] sm:$0xff] }
  0x4d   : > { %v7791_v50 = vld [vmem:[%s7543_s21 + $0x12a] sm:$0xff]  ;;  %v7794_v51 = vld [vmem:[%s7543_s21 + $0x122] sm:$0xff]  ;;  %10170 = vst [vmem:[#allocation9_spill] sm:$0xff] %v7804_v53  ;;  %v7814_v55 = vld [vmem:[%s7543_s21 + $0x13a] sm:$0xff] }
  0x4e   : > { %851 = vrot.lane.b32.xlu1 %v7586_v8, %s7409_s15  ;;  %v7811_v54 = vld [vmem:[%s7543_s21 + $0x142] sm:$0xff]  ;;  %10172 = vst [vmem:[#allocation11_spill] sm:$0xff] %v7814_v55  ;;  %v7821_v56 = vld [vmem:[%s7543_s21 + $0x159] sm:$0xff]  ;;  %v7824_v57 = vld [vmem:[%s7543_s21 + $0x151] sm:$0xff] }
  0x4f   : > { %849 = vrot.lane.b32.xlu0 %v7589_v9, %s7409_s15  ;;  %10171 = vst [vmem:[#allocation10_spill] sm:$0xff] %v7811_v54  ;;  %10173 = vst [vmem:[#allocation12_spill] sm:$0xff] %v7821_v56  ;;  %v7831_v58 = vld [vmem:[%s7543_s21 + $0x15a] sm:$0xff]  ;;  %v7834_v59 = vld [vmem:[%s7543_s21 + $0x152] sm:$0xff] }
  0x50   : > { %10174 = vst [vmem:[#allocation13_spill] sm:$0xff] %v7824_v57  ;;  %10175 = vst [vmem:[#allocation14_spill] sm:$0xff] %v7831_v58  ;;  %v7841_v60 = vld [vmem:[%s7543_s21 + $0x171] sm:$0xff]  ;;  %v7844_v61 = vld [vmem:[%s7543_s21 + $0x169] sm:$0xff] }
  0x51   : > { %10176 = vst [vmem:[#allocation15_spill] sm:$0xff] %v7834_v59  ;;  %10177 = vst [vmem:[#allocation16_spill] sm:$0xff] %v7841_v60  ;;  %v7851_v62 = vld [vmem:[%s7543_s21 + $0x18] sm:$0xff]  ;;  %v7857_v14 = vld [vmem:[%s7543_s21 + $0x16a] sm:$0xff] }
  0x52   : > { %979 = vrot.lane.b32.xlu1 %v7596_v10, %s7408_s13  ;;  %10178 = vst [vmem:[#allocation17_spill] sm:$0xff] %v7844_v61  ;;  %10179 = vst [vmem:[#allocation18_spill] sm:$0xff] %v7851_v62  ;;  %v7854_v63 = vld [vmem:[%s7543_s21 + $0x172] sm:$0xff] }
  0x53   : > { %977 = vrot.lane.b32.xlu0 %v7599_v11, %s7408_s13  ;;  %10180 = vst [vmem:[#allocation19_spill] sm:$0xff] %v7854_v63  ;;  %10181 = vst [vmem:[#allocation20_spill] sm:$0xff] %v7857_v14 }
  0x56   : > { %855 = vrot.lane.b32.xlu1 %v7606_v12, %s7409_s15 }
  0x57   : > { %853 = vrot.lane.b32.xlu0 %v7609_v13, %s7409_s15 }
  0x5a   : > { %983 = vrot.lane.b32.xlu1 %v7627_v18, %s7408_s13 }
  0x5b   : > { %981 = vrot.lane.b32.xlu0 %v7630_v19, %s7408_s13 }
  0x5e   : > { %859 = vrot.lane.b32.xlu1 %v7641_v20, %s7409_s15 }
  0x5f   : > { %857 = vrot.lane.b32.xlu0 %v7644_v21, %s7409_s15 }
  0x62   : > { %987 = vrot.lane.b32.xlu1 %v7651_v22, %s7408_s13 }
  0x63   : > { %985 = vrot.lane.b32.xlu0 %v7654_v23, %s7408_s13 }
  0x66   : > { %863 = vrot.lane.b32.xlu1 %v7661_v24, %s7409_s15 }
  0x67   : > { %861 = vrot.lane.b32.xlu0 %v7664_v25, %s7409_s15 }
  0x6a   : > { %991 = vrot.lane.b32.xlu1 %v7671_v26, %s7408_s13 }
  0x6b   : > { %989 = vrot.lane.b32.xlu0 %v7674_v27, %s7408_s13 }
  0x6e   : > { %867 = vrot.lane.b32.xlu1 %v7681_v28, %s7409_s15 }
  0x6f   : > { %865 = vrot.lane.b32.xlu0 %v7684_v29, %s7409_s15 }
  0x72   : > { %995 = vrot.lane.b32.xlu1 %v7691_v30, %s7408_s13 }
  0x73   : > { %993 = vrot.lane.b32.xlu0 %v7694_v31, %s7408_s13 }
  0x76   : > { %871 = vrot.lane.b32.xlu1 %v7701_v32, %s7409_s15 }
  0x77   : > { %869 = vrot.lane.b32.xlu0 %v7704_v33, %s7409_s15 }
  0x7a   : > { %999 = vrot.lane.b32.xlu1 %v7711_v34, %s7408_s13 }
  0x7b   : > { %997 = vrot.lane.b32.xlu0 %v7714_v35, %s7408_s13 }
  0x7e   : > { %875 = vrot.lane.b32.xlu1 %v7721_v36, %s7409_s15 }
  0x7f   : > { %873 = vrot.lane.b32.xlu0 %v7724_v37, %s7409_s15 }
  0x82   : > { %1003 = vrot.lane.b32.xlu1 %v7731_v38, %s7408_s13 }
  0x83   : > { %1001 = vrot.lane.b32.xlu0 %v7734_v39, %s7408_s13 }
  0x86   : > { %879 = vrot.lane.b32.xlu1 %v7741_v40, %s7409_s15 }
  0x87   : > { %877 = vrot.lane.b32.xlu0 %v7744_v41, %s7409_s15 }
  0x8a   : > { %1007 = vrot.lane.b32.xlu1 %v7751_v42, %s7408_s13 }
  0x8b   : > { %1005 = vrot.lane.b32.xlu0 %v7754_v43, %s7408_s13 }
  0x8e   : > { %883 = vrot.lane.b32.xlu1 %v7761_v44, %s7409_s15 }
  0x8f   : > { %881 = vrot.lane.b32.xlu0 %v7764_v45, %s7409_s15 }
  0x92   : > { %1011 = vrot.lane.b32.xlu1 %v7771_v46, %s7408_s13 }
  0x93   : > { %1009 = vrot.lane.b32.xlu0 %v7774_v47, %s7408_s13 }
  0x96   : > { %887 = vrot.lane.b32.xlu1 %v7781_v48, %s7409_s15 }
  0x97   : > { %885 = vrot.lane.b32.xlu0 %v7784_v49, %s7409_s15 }
  0x9a   : > { %1015 = vrot.lane.b32.xlu1 %v7791_v50, %s7408_s13 }
  0x9b   : > { %1013 = vrot.lane.b32.xlu0 %v7794_v51, %s7408_s13 }
  0x9e   : > { %891 = vrot.lane.b32.xlu1 %v7801_v52, %s7409_s15 }
  0x9f   : > { %889 = vrot.lane.b32.xlu0 %v7804_v53, %s7409_s15 }
  0xa2   : > { %1019 = vrot.lane.b32.xlu1 %v7811_v54, %s7408_s13 }
  0xa3   : > { %1017 = vrot.lane.b32.xlu0 %v7814_v55, %s7408_s13 }
  0xa6   : > { %895 = vrot.lane.b32.xlu1 %v7821_v56, %s7409_s15  ;;  %v5849_v56 = vld [vmem:[%s7543_s21 + $0x181] sm:$0xff] }
  0xa7   : > { %893 = vrot.lane.b32.xlu0 %v7824_v57, %s7409_s15  ;;  %v7873_v57 = vld [vmem:[%s7543_s21 + $0x20] sm:$0xff] }
  0xa8   : > { %10182 = vst [vmem:[#allocation21_spill] sm:$0xff] %v7873_v57 }
  0xaa   : > { %1023 = vrot.lane.b32.xlu1 %v7831_v58, %s7408_s13 }
  0xab   : > { %1021 = vrot.lane.b32.xlu0 %v7834_v59, %s7408_s13  ;;  %v711_v59 = vld [vmem:[%s10132_s1 + $0x8] sm:$0xf] }
  0xae   : > { %899 = vrot.lane.b32.xlu1 %v7841_v60, %s7409_s15 }
  0xaf   : > { %897 = vrot.lane.b32.xlu0 %v7844_v61, %s7409_s15  ;;  %v710_v61 = vld [vmem:[%s10132_s1] sm:$0xff] }
  0xb0   : > { %v970_v15 = vpop.permute.xlu1 %969 }
  0xb1   : > { %v842_v16 = vpop.permute.xlu0 %841 }
  0xb2   : > { %v1065_v60 = vsel %vm644_vm3, %v7851_v62, %v842_v16  ;;  %1027 = vrot.lane.b32.xlu1 %v7854_v63, %s7408_s13  ;;  %v6887_v16 = vpack.c.bf16 %v711_v59, %v710_v61  ;;  %v5850_v62 = vld [vmem:[%s7543_s21 + $0x189] sm:$0xff]  ;;  %v7891_v63 = vld [vmem:[%s7543_s21 + $0x38] sm:$0xff] }
  0xb3   : > { %1025 = vrot.lane.b32.xlu0 %v7857_v14, %s7408_s13  ;;  %v1097_v58 = vsel %vm677_vm4, %v1065_v60, %v970_v15  ;;  %v5881_v60 = vld [vmem:[%s7543_s21 + $0x182] sm:$0xff]  ;;  %10183 = vst [vmem:[#allocation22_spill] sm:$0xff] %v7891_v63 }
  0xb4   : > { %6439 = vmatprep.mubr.msk.f32.mxu0 %vm1132_vm5, %v1097_v58  ;;  %v972_v55 = vpop.permute.xlu1 %971  ;;  %6889 = vmatprep.subr.msk.bf16.mxu0 %vm7618_vm2, %v6887_v16  ;;  %v5882_v58 = vld [vmem:[%s7543_s21 + $0x18a] sm:$0xff] }
  0xb5   : > { %v844_v54 = vpop.permute.xlu0 %843 }
  0xb6   : > { %v1066_v14 = vsel %vm644_vm3, %v7873_v57, %v844_v54  ;;  %903 = vrot.lane.b32.xlu1 %v5850_v62, %s7409_s15  ;;  %v7894_v54 = vld [vmem:[%s7543_s21 + $0x30] sm:$0xff] }
  0xb7   : > { %901 = vrot.lane.b32.xlu0 %v5849_v56, %s7409_s15  ;;  %v1098_v59 = vsel %vm677_vm4, %v1066_v14, %v972_v55  ;;  %10184 = vst [vmem:[#allocation23_spill] sm:$0xff] %v7894_v54  ;;  %v325_v55 = vld [vmem:[%s7543_s21 + $0x9] sm:$0xff] }
  0xb8   : > { %6440 = vmatmul.mubr.msk.f32.vlgmr.msra.gmra.mrb[0].mxu0 %vm1132_vm5, %v1098_v59  ;;  %v848_v61 = vpop.permute.xlu1 %847  ;;  %v324_v59 = vld [vmem:[%s7543_s21 + $0x1] sm:$0xff] }
  0xb9   : > { %v846_v15 = vpop.permute.xlu0 %845  ;;  %6892 = vmatpush3.bf16.msk.msra.mxu0 %vm7618_vm2, %v6887_v16  ;;  %v1068_v56 = vsel %vm644_vm3, %v7891_v63, %v848_v61  ;;  %v356_v63 = vld [vmem:[%s7543_s21 + $0x2] sm:$0xff] }
  0xba   : > { %1031 = vrot.lane.b32.xlu1 %v5882_v58, %s7408_s13  ;;  %v1067_v62 = vsel %vm644_vm3, %v7894_v54, %v846_v15  ;;  %v357_v58 = vld [vmem:[%s7543_s21 + $0xa] sm:$0xff] }
  0xbb   : > { %1029 = vrot.lane.b32.xlu0 %v5881_v60, %s7408_s13  ;;  %v7913_v15 = vld [vmem:[%s7543_s21 + $0x50] sm:$0xff]  ;;  %v7916_v54 = vld [vmem:[%s7543_s21 + $0x48] sm:$0xff] }
  0xbc   : > { %v976_v14 = vpop.permute.xlu1 %975 }
  0xbd   : > { %v974_v16 = vpop.permute.xlu0 %973  ;;  %v1100_v57 = vsel %vm677_vm4, %v1068_v56, %v976_v14 }
  0xbe   : > { %v1099_v53 = vsel %vm677_vm4, %v1067_v62, %v974_v16  ;;  %422 = vrot.lane.b32.xlu1 %v325_v55, %s7409_s15 }
  0xbf   : > { %6442 = vmatprep.mubr.msk.f32.mxu0 %vm1132_vm5, %v1099_v53  ;;  %420 = vrot.lane.b32.xlu0 %v324_v59, %s7409_s15  ;;  %v7933_v59 = vld [vmem:[%s7543_s21 + $0x68] sm:$0xff] }
  0xc0   : > { %6443 = vmatmul.mubr.msk.f32.gmra.mrb[2].mxu0 %vm1132_vm5, %v1100_v57  ;;  %v852_v60 = vpop.permute.xlu1 %851 }
  0xc1   : > { %v850_v61 = vpop.permute.xlu0 %849  ;;  %v1070_v53 = vsel %vm644_vm3, %v7913_v15, %v852_v60 }
  0xc2   : > { %550 = vrot.lane.b32.xlu1 %v357_v58, %s7408_s13  ;;  %v1069_v57 = vsel %vm644_vm3, %v7916_v54, %v850_v61  ;;  %v7936_v58 = vld [vmem:[%s7543_s21 + $0x60] sm:$0xff] }
  0xc3   : > { %548 = vrot.lane.b32.xlu0 %v356_v63, %s7408_s13 }
  0xc4   : > { %v980_v55 = vpop.permute.xlu1 %979 }
  0xc5   : > { %v978_v56 = vpop.permute.xlu0 %977  ;;  %v1102_v62 = vsel %vm677_vm4, %v1070_v53, %v980_v55  ;;  %v7955_v55 = vld [vmem:[%s7543_s21 + $0x80] sm:$0xff] }
  0xc6   : > { %v1101_v14 = vsel %vm677_vm4, %v1069_v57, %v978_v56  ;;  %426 = vrot.lane.b32.xlu1 %v7559_v3, %s7409_s15  ;;  %v7958_v56 = vld [vmem:[%s7543_s21 + $0x78] sm:$0xff] }
  0xc7   : > { %6445 = vmatprep.mubr.msk.f32.mxu0 %vm1132_vm5, %v1101_v14  ;;  %424 = vrot.lane.b32.xlu0 %v7549_v1, %s7409_s15 }
  0xc8   : > { %6446 = vmatmul.mubr.msk.f32.gmra.mrb[4].mxu0 %vm1132_vm5, %v1102_v62  ;;  %v856_v63 = vpop.permute.xlu1 %855 }
  0xc9   : > { %v854_v16 = vpop.permute.xlu0 %853  ;;  %v1072_v3 = vsel %vm644_vm3, %v7933_v59, %v856_v63 }
  0xca   : > { %554 = vrot.lane.b32.xlu1 %v7556_v2, %s7408_s13  ;;  %v1071_v1 = vsel %vm644_vm3, %v7936_v58, %v854_v16 }
  0xcb   : > { %552 = vrot.lane.b32.xlu0 %v7546_v0, %s7408_s13 }
  0xcc   : > { %v984_v60 = vpop.permute.xlu1 %983 }
  0xcd   : > { %v982_v61 = vpop.permute.xlu0 %981  ;;  %v1104_v53 = vsel %vm677_vm4, %v1072_v3, %v984_v60 }
  0xce   : > { %v1103_v57 = vsel %vm677_vm4, %v1071_v1, %v982_v61  ;;  %430 = vrot.lane.b32.xlu1 %v7566_v4, %s7409_s15 }
  0xcf   : > { %6448 = vmatprep.mubr.msk.f32.mxu0 %vm1132_vm5, %v1103_v57  ;;  %428 = vrot.lane.b32.xlu0 %v7569_v5, %s7409_s15  ;;  %v7980_v57 = vld [vmem:[%s7543_s21 + $0x90] sm:$0xff] }
  0xd0   : > { %6449 = vmatmul.mubr.msk.f32.gmra.mrb[6].mxu0 %vm1132_vm5, %v1104_v53  ;;  %v860_v0 = vpop.permute.xlu1 %859  ;;  %v7977_v53 = vld [vmem:[%s7543_s21 + $0x98] sm:$0xff]  ;;  %10185 = vst [vmem:[#allocation24_spill] sm:$0xff] %v7980_v57 }
  0xd1   : > { %v858_v2 = vpop.permute.xlu0 %857  ;;  %v1074_v62 = vsel %vm644_vm3, %v7955_v55, %v860_v0 }
  0xd2   : > { %558 = vrot.lane.b32.xlu1 %v7576_v6, %s7408_s13  ;;  %v1073_v14 = vsel %vm644_vm3, %v7958_v56, %v858_v2 }
  0xd3   : > { %556 = vrot.lane.b32.xlu0 %v7579_v7, %s7408_s13 }
  0xd4   : > { %v988_v63 = vpop.permute.xlu1 %987 }
  0xd5   : > { %v986_v16 = vpop.permute.xlu0 %985  ;;  %v1106_v3 = vsel %vm677_vm4, %v1074_v62, %v988_v63 }
  0xd6   : > { %v1105_v1 = vsel %vm677_vm4, %v1073_v14, %v986_v16  ;;  %434 = vrot.lane.b32.xlu1 %v7586_v8, %s7409_s15 }
  0xd7   : > { %6451 = vmatprep.mubr.msk.f32.mxu0 %vm1132_vm5, %v1105_v1  ;;  %432 = vrot.lane.b32.xlu0 %v7589_v9, %s7409_s15 }
  0xd8   : > { %6452 = vmatmul.mubr.msk.f32.gmra.mrb[8].mxu0 %vm1132_vm5, %v1106_v3  ;;  %v864_v60 = vpop.permute.xlu1 %863 }
  0xd9   : > { %v862_v61 = vpop.permute.xlu0 %861  ;;  %v1076_v0 = vsel %vm644_vm3, %v7977_v53, %v864_v60  ;;  %v7999_v60 = vld [vmem:[%s7543_s21 + $0xb0] sm:$0xff] }
  0xda   : > { %562 = vrot.lane.b32.xlu1 %v7596_v10, %s7408_s13  ;;  %v1075_v2 = vsel %vm644_vm3, %v7980_v57, %v862_v61  ;;  %10186 = vst [vmem:[#allocation25_spill] sm:$0xff] %v7999_v60  ;;  %v8002_v61 = vld [vmem:[%s7543_s21 + $0xa8] sm:$0xff] }
  0xdb   : > { %560 = vrot.lane.b32.xlu0 %v7599_v11, %s7408_s13  ;;  %v8021_v57 = vld [vmem:[%s7543_s21 + $0xc8] sm:$0xff] }
  0xdc   : > { %v992_v62 = vpop.permute.xlu1 %991 }
  0xdd   : > { %v990_v14 = vpop.permute.xlu0 %989  ;;  %v1108_v63 = vsel %vm677_vm4, %v1076_v0, %v992_v62 }
  0xde   : > { %v1107_v16 = vsel %vm677_vm4, %v1075_v2, %v990_v14  ;;  %438 = vrot.lane.b32.xlu1 %v7606_v12, %s7409_s15 }
  0xdf   : > { %6454 = vmatprep.mubr.msk.f32.mxu0 %vm1132_vm5, %v1107_v16  ;;  %436 = vrot.lane.b32.xlu0 %v7609_v13, %s7409_s15 }
  0xe0   : > { %6455 = vmatmul.mubr.msk.f32.gmra.mrb[10].mxu0 %vm1132_vm5, %v1108_v63  ;;  %v868_v3 = vpop.permute.xlu1 %867 }
  0xe1   : > { %v866_v1 = vpop.permute.xlu0 %865  ;;  %v1078_v0 = vsel %vm644_vm3, %v7999_v60, %v868_v3 }
  0xe2   : > { %566 = vrot.lane.b32.xlu1 %v7627_v18, %s7408_s13  ;;  %v1077_v2 = vsel %vm644_vm3, %v8002_v61, %v866_v1  ;;  %v8024_v1 = vld [vmem:[%s7543_s21 + $0xc0] sm:$0xff] }
  0xe3   : > { %564 = vrot.lane.b32.xlu0 %v7630_v19, %s7408_s13 }
  0xe4   : > { %v996_v62 = vpop.permute.xlu1 %995 }
  0xe5   : > { %v994_v14 = vpop.permute.xlu0 %993  ;;  %v1110_v63 = vsel %vm677_vm4, %v1078_v0, %v996_v62 }
  0xe6   : > { %v1109_v16 = vsel %vm677_vm4, %v1077_v2, %v994_v14  ;;  %442 = vrot.lane.b32.xlu1 %v7641_v20, %s7409_s15 }
  0xe7   : > { %6457 = vmatprep.mubr.msk.f32.mxu0 %vm1132_vm5, %v1109_v16  ;;  %440 = vrot.lane.b32.xlu0 %v7644_v21, %s7409_s15 }
  0xe8   : > { %6458 = vmatmul.mubr.msk.f32.gmra.mrb[12].mxu0 %vm1132_vm5, %v1110_v63  ;;  %v872_v3 = vpop.permute.xlu1 %871  ;;  %v8043_v63 = vld [vmem:[%s7543_s21 + $0xe0] sm:$0xff] }
  0xe9   : > { %v870_v60 = vpop.permute.xlu0 %869  ;;  %v1080_v20 = vsel %vm644_vm3, %v8021_v57, %v872_v3 }
  0xea   : > { %570 = vrot.lane.b32.xlu1 %v7651_v22, %s7408_s13  ;;  %v1079_v21 = vsel %vm644_vm3, %v8024_v1, %v870_v60  ;;  %v8046_v60 = vld [vmem:[%s7543_s21 + $0xd8] sm:$0xff] }
  0xeb   : > { %568 = vrot.lane.b32.xlu0 %v7654_v23, %s7408_s13 }
  0xec   : > { %v1000_v0 = vpop.permute.xlu1 %999 }
  0xed   : > { %v998_v2 = vpop.permute.xlu0 %997  ;;  %v1112_v62 = vsel %vm677_vm4, %v1080_v20, %v1000_v0 }
  0xee   : > { %v1111_v14 = vsel %vm677_vm4, %v1079_v21, %v998_v2  ;;  %446 = vrot.lane.b32.xlu1 %v7661_v24, %s7409_s15 }
  0xef   : > { %6460 = vmatprep.mubr.msk.f32.mxu0 %vm1132_vm5, %v1111_v14  ;;  %444 = vrot.lane.b32.xlu0 %v7664_v25, %s7409_s15  ;;  %v8073_v14 = vld [vmem:[%s7543_s21 + $0xf8] sm:$0xff] }
  0xf0   : > { %6461 = vmatmul.mubr.msk.f32.gmra.mrb[14].mxu0 %vm1132_vm5, %v1112_v62  ;;  %v876_v22 = vpop.permute.xlu1 %875 }
  0xf1   : > { %v874_v23 = vpop.permute.xlu0 %873  ;;  %v1082_v24 = vsel %vm644_vm3, %v8043_v63, %v876_v22 }
  0xf2   : > { %574 = vrot.lane.b32.xlu1 %v7671_v26, %s7408_s13  ;;  %v1081_v25 = vsel %vm644_vm3, %v8046_v60, %v874_v23  ;;  %v6047_v26 = vld [vmem:[%s10132_s1 + $0x20] sm:$0xff] }
  0xf3   : > { %572 = vrot.lane.b32.xlu0 %v7674_v27, %s7408_s13  ;;  %v6048_v27 = vld [vmem:[%s10132_s1 + $0x28] sm:$0xf] }
  0xf4   : > { %v1004_v16 = vpop.permute.xlu1 %1003  ;;  %v8070_v0 = vpack.c.bf16 %v6048_v27, %v6047_v26 }
  0xf5   : > { %v1002_v3 = vpop.permute.xlu0 %1001  ;;  %v1114_v20 = vsel %vm677_vm4, %v1082_v24, %v1004_v16 }
  0xf6   : > { %v1113_v21 = vsel %vm677_vm4, %v1081_v25, %v1002_v3  ;;  %450 = vrot.lane.b32.xlu1 %v7681_v28, %s7409_s15  ;;  %v8076_v28 = vld [vmem:[%s7543_s21 + $0xf0] sm:$0xff]  ;;  %6895 = vmatprep.subr.msk.bf16.mxu0 %vm7618_vm2, %v8070_v0 }
  0xf7   : > { %6463 = vmatprep.mubr.msk.f32.mxu0 %vm1132_vm5, %v1113_v21  ;;  %448 = vrot.lane.b32.xlu0 %v7684_v29, %s7409_s15  ;;  %v8098_v3 = vld [vmem:[%s7543_s21 + $0x110] sm:$0xff] }
  0xf8   : > { %6464 = vmatmul.mubr.msk.f32.gmra.mrb[16].mxu0 %vm1132_vm5, %v1114_v20  ;;  %v880_v2 = vpop.permute.xlu1 %879  ;;  %v8101_v20 = vld [vmem:[%s7543_s21 + $0x108] sm:$0xff] }
  0xf9   : > { %v878_v62 = vpop.permute.xlu0 %877  ;;  %v1084_v29 = vsel %vm644_vm3, %v8073_v14, %v880_v2 }
  0xfa   : > { %578 = vrot.lane.b32.xlu1 %v7691_v30, %s7408_s13  ;;  %v1083_v22 = vsel %vm644_vm3, %v8076_v28, %v878_v62  ;;  %v8120_v62 = vld [vmem:[%s7543_s21 + $0x128] sm:$0xff] }
  0xfb   : > { %576 = vrot.lane.b32.xlu0 %v7694_v31, %s7408_s13 }
  0xfc   : > { %v1008_v23 = vpop.permute.xlu1 %1007 }
  0xfd   : > { %v1006_v24 = vpop.permute.xlu0 %1005  ;;  %v1116_v25 = vsel %vm677_vm4, %v1084_v29, %v1008_v23  ;;  %v8123_v29 = vld [vmem:[%s7543_s21 + $0x120] sm:$0xff] }
  0xfe   : > { %v1115_v16 = vsel %vm677_vm4, %v1083_v22, %v1006_v24  ;;  %454 = vrot.lane.b32.xlu1 %v7701_v32, %s7409_s15 }
  0xff   : > { %6466 = vmatprep.mubr.msk.f32.mxu0 %vm1132_vm5, %v1115_v16  ;;  %452 = vrot.lane.b32.xlu0 %v7704_v33, %s7409_s15  ;;  %v8142_v16 = vld [vmem:[%s7543_s21 + $0x140] sm:$0xff] }
 0x100   : > { %6467 = vmatmul.mubr.msk.f32.gmra.mrb[18].mxu0 %vm1132_vm5, %v1116_v25  ;;  %v884_v30 = vpop.permute.xlu1 %883 }
 0x101   : > { %v882_v31 = vpop.permute.xlu0 %881  ;;  %v1086_v32 = vsel %vm644_vm3, %v8098_v3, %v884_v30  ;;  %v8145_v30 = vld [vmem:[%s7543_s21 + $0x138] sm:$0xff] }
 0x102   : > { %582 = vrot.lane.b32.xlu1 %v7711_v34, %s7408_s13  ;;  %v1085_v33 = vsel %vm644_vm3, %v8101_v20, %v882_v31 }
 0x103   : > { %580 = vrot.lane.b32.xlu0 %v7714_v35, %s7408_s13 }
 0x104   : > { %v1012_v21 = vpop.permute.xlu1 %1011 }
 0x105   : > { %v1010_v26 = vpop.permute.xlu0 %1009  ;;  %v1118_v27 = vsel %vm677_vm4, %v1086_v32, %v1012_v21 }
 0x106   : > { %v1117_v2 = vsel %vm677_vm4, %v1085_v33, %v1010_v26  ;;  %458 = vrot.lane.b32.xlu1 %v7721_v36, %s7409_s15  ;;  %v8164_v26 = vld [vmem:[%s7543_s21 + $0x158] sm:$0xff] }
 0x107   : > { %6469 = vmatprep.mubr.msk.f32.mxu0 %vm1132_vm5, %v1117_v2  ;;  %456 = vrot.lane.b32.xlu0 %v7724_v37, %s7409_s15 }
 0x108   : > { %6470 = vmatmul.mubr.msk.f32.gmra.mrb[20].mxu0 %vm1132_vm5, %v1118_v27  ;;  %v888_v34 = vpop.permute.xlu1 %887  ;;  %v8167_v27 = vld [vmem:[%s7543_s21 + $0x150] sm:$0xff] }
 0x109   : > { %v886_v35 = vpop.permute.xlu0 %885  ;;  %v1088_v36 = vsel %vm644_vm3, %v8120_v62, %v888_v34 }
 0x10a   : > { %586 = vrot.lane.b32.xlu1 %v7731_v38, %s7408_s13  ;;  %v1087_v37 = vsel %vm644_vm3, %v8123_v29, %v886_v35 }
 0x10b   : > { %584 = vrot.lane.b32.xlu0 %v7734_v39, %s7408_s13 }
 0x10c   : > { %v1016_v22 = vpop.permute.xlu1 %1015 }
 0x10d   : > { %v1014_v23 = vpop.permute.xlu0 %1013  ;;  %v1120_v24 = vsel %vm677_vm4, %v1088_v36, %v1016_v22  ;;  %v8189_v22 = vld [vmem:[%s7543_s21 + $0x168] sm:$0xff] }
 0x10e   : > { %v1119_v25 = vsel %vm677_vm4, %v1087_v37, %v1014_v23  ;;  %462 = vrot.lane.b32.xlu1 %v7741_v40, %s7409_s15  ;;  %v8186_v37 = vld [vmem:[%s7543_s21 + $0x170] sm:$0xff] }
 0x10f   : > { %6472 = vmatprep.mubr.msk.f32.mxu0 %vm1132_vm5, %v1119_v25  ;;  %460 = vrot.lane.b32.xlu0 %v7744_v41, %s7409_s15 }
 0x110   : > { %6473 = vmatmul.mubr.msk.f32.gmra.mrb[22].mxu0 %vm1132_vm5, %v1120_v24  ;;  %v892_v38 = vpop.permute.xlu1 %891 }
 0x111   : > { %v890_v39 = vpop.permute.xlu0 %889  ;;  %v1090_v40 = vsel %vm644_vm3, %v8142_v16, %v892_v38 }
 0x112   : > { %590 = vrot.lane.b32.xlu1 %v7751_v42, %s7408_s13  ;;  %v1089_v41 = vsel %vm644_vm3, %v8145_v30, %v890_v39 }
 0x113   : > { %588 = vrot.lane.b32.xlu0 %v7754_v43, %s7408_s13 }
 0x114   : > { %v1020_v31 = vpop.permute.xlu1 %1019 }
 0x115   : > { %v1018_v32 = vpop.permute.xlu0 %1017  ;;  %v1122_v33 = vsel %vm677_vm4, %v1090_v40, %v1020_v31  ;;  %v5818_v40 = vld [vmem:[%s7543_s21 + $0x188] sm:$0xff]  ;;  %v10188_v31 = vld [vmem:[#allocation10_spill] sm:$0xff] }
 0x116   : > { %v1121_v21 = vsel %vm677_vm4, %v1089_v41, %v1018_v32  ;;  %466 = vrot.lane.b32.xlu1 %v7761_v44, %s7409_s15  ;;  %v5817_v41 = vld [vmem:[%s7543_s21 + $0x180] sm:$0xff] }
 0x117   : > { %6475 = vmatprep.mubr.msk.f32.mxu0 %vm1132_vm5, %v1121_v21  ;;  %464 = vrot.lane.b32.xlu0 %v7764_v45, %s7409_s15  ;;  %v10189_v32 = vld [vmem:[#allocation11_spill] sm:$0xff] }
 0x118   : > { %6476 = vmatmul.mubr.msk.f32.gmra.mrb[24].mxu0 %vm1132_vm5, %v1122_v33  ;;  %v896_v42 = vpop.permute.xlu1 %895 }
 0x119   : > { %v894_v43 = vpop.permute.xlu0 %893  ;;  %v1092_v44 = vsel %vm644_vm3, %v8164_v26, %v896_v42 }
 0x11a   : > { %594 = vrot.lane.b32.xlu1 %v7771_v46, %s7408_s13  ;;  %v1091_v45 = vsel %vm644_vm3, %v8167_v27, %v894_v43 }
 0x11b   : > { %592 = vrot.lane.b32.xlu0 %v7774_v47, %s7408_s13 }
 0x11c   : > { %v1024_v2 = vpop.permute.xlu1 %1023 }
 0x11d   : > { %v1022_v34 = vpop.permute.xlu0 %1021  ;;  %v1124_v35 = vsel %vm677_vm4, %v1092_v44, %v1024_v2  ;;  %v10191_v2 = vld [vmem:[#allocation13_spill] sm:$0xff] }
 0x11e   : > { %v1123_v36 = vsel %vm677_vm4, %v1091_v45, %v1022_v34  ;;  %470 = vrot.lane.b32.xlu1 %v7781_v48, %s7409_s15  ;;  %v10190_v45 = vld [vmem:[#allocation12_spill] sm:$0xff] }
 0x11f   : > { %6478 = vmatprep.mubr.msk.f32.mxu0 %vm1132_vm5, %v1123_v36  ;;  %468 = vrot.lane.b32.xlu0 %v7784_v49, %s7409_s15 }
 0x120   : > { %6479 = vmatmul.mubr.msk.f32.gmra.mrb[26].mxu0 %vm1132_vm5, %v1124_v35  ;;  %v900_v46 = vpop.permute.xlu1 %899  ;;  %v293_v35 = vld [vmem:[%s7543_s21 + $0x8] sm:$0xff] }
 0x121   : > { %v898_v47 = vpop.permute.xlu0 %897  ;;  %v1094_v48 = vsel %vm644_vm3, %v8186_v37, %v900_v46  ;;  %v292_v46 = vld [vmem:[%s7543_s21] sm:$0xff] }
 0x122   : > { %598 = vrot.lane.b32.xlu1 %v7791_v50, %s7408_s13  ;;  %v1093_v49 = vsel %vm644_vm3, %v8189_v22, %v898_v47  ;;  %v10187_v50 = vld [vmem:[#allocation9_spill] sm:$0xff]  ;;  %v10192_v47 = vld [vmem:[#allocation14_spill] sm:$0xff] }
 0x123   : > { %596 = vrot.lane.b32.xlu0 %v7794_v51, %s7408_s13 }
 0x124   : > { %v1028_v23 = vpop.permute.xlu1 %1027 }
 0x125   : > { %v1026_v24 = vpop.permute.xlu0 %1025  ;;  %v1126_v25 = vsel %vm677_vm4, %v1094_v48, %v1028_v23  ;;  %v10193_v48 = vld [vmem:[#allocation15_spill] sm:$0xff] }
 0x126   : > { %v1125_v38 = vsel %vm677_vm4, %v1093_v49, %v1026_v24  ;;  %474 = vrot.lane.b32.xlu1 %v7801_v52, %s7409_s15 }
 0x127   : > { %6481 = vmatprep.mubr.msk.f32.mxu0 %vm1132_vm5, %v1125_v38  ;;  %472 = vrot.lane.b32.xlu0 %v10187_v50, %s7409_s15 }
 0x128   : > { %6482 = vmatmul.mubr.msk.f32.gmra.mrb[28].mxu0 %vm1132_vm5, %v1126_v25  ;;  %v904_v51 = vpop.permute.xlu1 %903 }
 0x129   : > { %v902_v39 = vpop.permute.xlu0 %901  ;;  %v1096_v33 = vsel %vm644_vm3, %v5818_v40, %v904_v51  ;;  %v10194_v51 = vld [vmem:[#allocation16_spill] sm:$0xff] }
 0x12a   : > { %602 = vrot.lane.b32.xlu1 %v10188_v31, %s7408_s13  ;;  %v1095_v52 = vsel %vm644_vm3, %v5817_v41, %v902_v39  ;;  %v10195_v39 = vld [vmem:[#allocation17_spill] sm:$0xff]  ;;  %v10196_v31 = vld [vmem:[#allocation19_spill] sm:$0xff] }
 0x12b   : > { %600 = vrot.lane.b32.xlu0 %v10189_v32, %s7408_s13  ;;  %v10197_v32 = vld [vmem:[#allocation20_spill] sm:$0xff] }
 0x12c   : > { %v1032_v21 = vpop.permute.xlu1 %1031 }
 0x12d   : > { %v1030_v42 = vpop.permute.xlu0 %1029  ;;  %v1128_v43 = vsel %vm677_vm4, %v1096_v33, %v1032_v21  ;;  %v10198_v33 = vld [vmem:[#allocation21_spill] sm:$0xff] }
 0x12e   : > { %v1127_v44 = vsel %vm677_vm4, %v1095_v52, %v1030_v42  ;;  %478 = vrot.lane.b32.xlu1 %v10190_v45, %s7409_s15  ;;  %v10199_v42 = vld [vmem:[#allocation18_spill] sm:$0xff] }
 0x12f   : > { %6484 = vmatprep.mubr.msk.f32.mxu0 %vm1132_vm5, %v1127_v44  ;;  %476 = vrot.lane.b32.xlu0 %v10191_v2, %s7409_s15 }
 0x130   : > { %6485 = vmatmul.mubr.msk.f32.gmra.mrb[30].mxu0 %vm1132_vm5, %v1128_v43  ;;  %v423_v34 = vpop.permute.xlu1 %422 }
 0x131   : > { %v421_v36 = vpop.permute.xlu0 %420  ;;  %v646_v49 = vsel %vm644_vm3, %v293_v35, %v423_v34  ;;  %v10200_v34 = vld [vmem:[#allocation22_spill] sm:$0xff] }
 0x132   : > { %606 = vrot.lane.b32.xlu1 %v10192_v47, %s7408_s13  ;;  %v645_v24 = vsel %vm644_vm3, %v292_v46, %v421_v36 }
 0x133   : > { %604 = vrot.lane.b32.xlu0 %v10193_v48, %s7408_s13 }
 0x134   : > { %v551_v23 = vpop.permute.xlu1 %550 }
 0x135   : > { %v679_v25 = vsel %vm677_vm4, %v646_v49, %v551_v23  ;;  %v549_v38 = vpop.permute.xlu0 %548 }
 0x136   : > { %v678_v50 = vsel %vm677_vm4, %v645_v24, %v549_v38  ;;  %482 = vrot.lane.b32.xlu1 %v10194_v51, %s7409_s15 }
 0x137   : > { %480 = vrot.lane.b32.xlu0 %v10195_v39, %s7409_s15  ;;  %6491 = vmatprep.mubr.msk.f32.mxu0 %vm1132_vm5, %v678_v50 }
 0x138   : > { %6492 = vmatmul.mubr.msk.f32.vlgmr.msra.gmra.mrb[0].mxu0 %vm1132_vm5, %v679_v25  ;;  %v427_v40 = vpop.permute.xlu1 %426 }
 0x139   : > { %v425_v41 = vpop.permute.xlu0 %424  ;;  %6898 = vmatpush3.bf16.msk.msra.mxu0 %vm7618_vm2, %v8070_v0  ;;  %v648_v52 = vsel %vm644_vm3, %v10198_v33, %v427_v40  ;;  %v8317_v40 = vld [vmem:[%s7543_s21 + $0x99] sm:$0xff] }
 0x13a   : > { %610 = vrot.lane.b32.xlu1 %v10196_v31, %s7408_s13  ;;  %v647_v43 = vsel %vm644_vm3, %v10199_v42, %v425_v41 }
 0x13b   : > { %608 = vrot.lane.b32.xlu0 %v10197_v32, %s7408_s13  ;;  %v8322_v32 = vld [vmem:[%s7543_s21 + $0x91] sm:$0xff] }
 0x13c   : > { %v555_v21 = vpop.permute.xlu1 %554 }
 0x13d   : > { %v681_v44 = vsel %vm677_vm4, %v648_v52, %v555_v21  ;;  %v553_v45 = vpop.permute.xlu0 %552 }
 0x13e   : > { %v680_v2 = vsel %vm677_vm4, %v647_v43, %v553_v45  ;;  %1913 = vrot.lane.b32.xlu1 %v7566_v4, %s7409_s15  ;;  %v10201_v4 = vld [vmem:[#allocation23_spill] sm:$0xff]  ;;  %v8339_v45 = vld [vmem:[%s7543_s21 + $0xb1] sm:$0xff] }
 0x13f   : > { %1911 = vrot.lane.b32.xlu0 %v7569_v5, %s7409_s15  ;;  %6494 = vmatprep.mubr.msk.f32.mxu0 %vm1132_vm5, %v680_v2 }
 0x140   : > { %6495 = vmatmul.mubr.msk.f32.gmra.mrb[2].mxu0 %vm1132_vm5, %v681_v44  ;;  %v431_v17 = vpop.permute.xlu1 %430 }
 0x141   : > { %v429_v0 = vpop.permute.xlu0 %428  ;;  %v650_v35 = vsel %vm644_vm3, %v10200_v34, %v431_v17  ;;  %v10202_v34 = vld [vmem:[#allocation24_spill] sm:$0xff] }
 0x142   : > { %2041 = vrot.lane.b32.xlu1 %v7576_v6, %s7408_s13  ;;  %v649_v46 = vsel %vm644_vm3, %v10201_v4, %v429_v0  ;;  %v8344_v0 = vld [vmem:[%s7543_s21 + $0xa9] sm:$0xff] }
 0x143   : > { %2039 = vrot.lane.b32.xlu0 %v7579_v7, %s7408_s13 }
 0x144   : > { %v559_v36 = vpop.permute.xlu1 %558 }
 0x145   : > { %v683_v5 = vsel %vm677_vm4, %v650_v35, %v559_v36  ;;  %v557_v47 = vpop.permute.xlu0 %556 }
 0x146   : > { %v682_v48 = vsel %vm677_vm4, %v649_v46, %v557_v47  ;;  %1917 = vrot.lane.b32.xlu1 %v7586_v8, %s7409_s15  ;;  %v6025_v47 = vld [vmem:[%s7543_s21 + $0xaa] sm:$0xff] }
 0x147   : > { %1915 = vrot.lane.b32.xlu0 %v7589_v9, %s7409_s15  ;;  %6497 = vmatprep.mubr.msk.f32.mxu0 %vm1132_vm5, %v682_v48 }
 0x148   : > { %6498 = vmatmul.mubr.msk.f32.gmra.mrb[4].mxu0 %vm1132_vm5, %v683_v5  ;;  %v435_v6 = vpop.permute.xlu1 %434 }
 0x149   : > { %v433_v7 = vpop.permute.xlu0 %432  ;;  %v652_v49 = vsel %vm644_vm3, %v7913_v15, %v435_v6  ;;  %v8300_v15 = vld [vmem:[%s7543_s21 + $0x79] sm:$0xff]  ;;  %v8361_v6 = vld [vmem:[%s7543_s21 + $0xc9] sm:$0xff] }
 0x14a   : > { %2045 = vrot.lane.b32.xlu1 %v7596_v10, %s7408_s13  ;;  %v651_v9 = vsel %vm644_vm3, %v7916_v54, %v433_v7  ;;  %v8295_v54 = vld [vmem:[%s7543_s21 + $0x81] sm:$0xff]  ;;  %v10203_v7 = vld [vmem:[#allocation25_spill] sm:$0xff] }
 0x14b   : > { %2043 = vrot.lane.b32.xlu0 %v7599_v11, %s7408_s13 }
 0x14c   : > { %v563_v8 = vpop.permute.xlu1 %562 }
 0x14d   : > { %v685_v23 = vsel %vm677_vm4, %v652_v49, %v563_v8  ;;  %v561_v24 = vpop.permute.xlu0 %560 }
 0x14e   : > { %v684_v25 = vsel %vm677_vm4, %v651_v9, %v561_v24  ;;  %1921 = vrot.lane.b32.xlu1 %v7606_v12, %s7409_s15  ;;  %v8366_v9 = vld [vmem:[%s7543_s21 + $0xc1] sm:$0xff] }
 0x14f   : > { %1919 = vrot.lane.b32.xlu0 %v7609_v13, %s7409_s15  ;;  %6500 = vmatprep.mubr.msk.f32.mxu0 %vm1132_vm5, %v684_v25 }
 0x150   : > { %6501 = vmatmul.mubr.msk.f32.gmra.mrb[6].mxu0 %vm1132_vm5, %v685_v23  ;;  %v439_v10 = vpop.permute.xlu1 %438 }
 0x151   : > { %v437_v11 = vpop.permute.xlu0 %436  ;;  %v654_v12 = vsel %vm644_vm3, %v7933_v59, %v439_v10 }
 0x152   : > { %2049 = vrot.lane.b32.xlu1 %v7627_v18, %s7408_s13  ;;  %v653_v38 = vsel %vm644_vm3, %v7936_v58, %v437_v11  ;;  %v6021_v58 = vld [vmem:[%s7543_s21 + $0x7a] sm:$0xff]  ;;  %v6028_v11 = vld [vmem:[%s7543_s21 + $0xca] sm:$0xff] }
 0x153   : > { %2047 = vrot.lane.b32.xlu0 %v7630_v19, %s7408_s13  ;;  %v6022_v19 = vld [vmem:[%s7543_s21 + $0x82] sm:$0xff] }
 0x154   : > { %v567_v13 = vpop.permute.xlu1 %566 }
 0x155   : > { %v687_v50 = vsel %vm677_vm4, %v654_v12, %v567_v13  ;;  %v565_v18 = vpop.permute.xlu0 %564 }
 0x156   : > { %v686_v51 = vsel %vm677_vm4, %v653_v38, %v565_v18  ;;  %1925 = vrot.lane.b32.xlu1 %v8295_v54, %s7409_s15  ;;  %v8383_v38 = vld [vmem:[%s7543_s21 + $0xe1] sm:$0xff] }
 0x157   : > { %1923 = vrot.lane.b32.xlu0 %v8300_v15, %s7409_s15  ;;  %6503 = vmatprep.mubr.msk.f32.mxu0 %vm1132_vm5, %v686_v51  ;;  %v8388_v51 = vld [vmem:[%s7543_s21 + $0xd9] sm:$0xff] }
 0x158   : > { %6504 = vmatmul.mubr.msk.f32.gmra.mrb[8].mxu0 %vm1132_vm5, %v687_v50  ;;  %v443_v59 = vpop.permute.xlu1 %442 }
 0x159   : > { %v441_v39 = vpop.permute.xlu0 %440  ;;  %v656_v41 = vsel %vm644_vm3, %v7955_v55, %v443_v59  ;;  %v6024_v55 = vld [vmem:[%s7543_s21 + $0x9a] sm:$0xff] }
 0x15a   : > { %2053 = vrot.lane.b32.xlu1 %v6022_v19, %s7408_s13  ;;  %v655_v33 = vsel %vm644_vm3, %v7958_v56, %v441_v39  ;;  %v6023_v56 = vld [vmem:[%s7543_s21 + $0x92] sm:$0xff] }
 0x15b   : > { %2051 = vrot.lane.b32.xlu0 %v6021_v58, %s7408_s13 }
 0x15c   : > { %v571_v31 = vpop.permute.xlu1 %570 }
 0x15d   : > { %v689_v52 = vsel %vm677_vm4, %v656_v41, %v571_v31  ;;  %v569_v21 = vpop.permute.xlu0 %568 }
 0x15e   : > { %v688_v42 = vsel %vm677_vm4, %v655_v33, %v569_v21  ;;  %1929 = vrot.lane.b32.xlu1 %v8317_v40, %s7409_s15  ;;  %v8405_v33 = vld [vmem:[%s7543_s21 + $0xf9] sm:$0xff] }
 0x15f   : > { %1927 = vrot.lane.b32.xlu0 %v8322_v32, %s7409_s15  ;;  %6506 = vmatprep.mubr.msk.f32.mxu0 %vm1132_vm5, %v688_v42  ;;  %v8410_v42 = vld [vmem:[%s7543_s21 + $0xf1] sm:$0xff] }
 0x160   : > { %6507 = vmatmul.mubr.msk.f32.gmra.mrb[10].mxu0 %vm1132_vm5, %v689_v52  ;;  %v447_v43 = vpop.permute.xlu1 %446 }
 0x161   : > { %v445_v44 = vpop.permute.xlu0 %444  ;;  %v658_v2 = vsel %vm644_vm3, %v7977_v53, %v447_v43  ;;  %v6026_v53 = vld [vmem:[%s7543_s21 + $0xb2] sm:$0xff] }
 0x162   : > { %2057 = vrot.lane.b32.xlu1 %v6024_v55, %s7408_s13  ;;  %v657_v35 = vsel %vm644_vm3, %v10202_v34, %v445_v44  ;;  %v8427_v34 = vld [vmem:[%s7543_s21 + $0x111] sm:$0xff] }
 0x163   : > { %2055 = vrot.lane.b32.xlu0 %v6023_v56, %s7408_s13 }
 0x164   : > { %v575_v17 = vpop.permute.xlu1 %574 }
 0x165   : > { %v691_v36 = vsel %vm677_vm4, %v658_v2, %v575_v17  ;;  %v573_v4 = vpop.permute.xlu0 %572 }
 0x166   : > { %v690_v46 = vsel %vm677_vm4, %v657_v35, %v573_v4  ;;  %1933 = vrot.lane.b32.xlu1 %v8339_v45, %s7409_s15  ;;  %v8432_v4 = vld [vmem:[%s7543_s21 + $0x109] sm:$0xff] }
 0x167   : > { %1931 = vrot.lane.b32.xlu0 %v8344_v0, %s7409_s15  ;;  %6509 = vmatprep.mubr.msk.f32.mxu0 %vm1132_vm5, %v690_v46 }
 0x168   : > { %6510 = vmatmul.mubr.msk.f32.gmra.mrb[12].mxu0 %vm1132_vm5, %v691_v36  ;;  %v451_v5 = vpop.permute.xlu1 %450 }
 0x169   : > { %v449_v48 = vpop.permute.xlu0 %448  ;;  %v660_v49 = vsel %vm644_vm3, %v10203_v7, %v451_v5 }
 0x16a   : > { %2061 = vrot.lane.b32.xlu1 %v6026_v53, %s7408_s13  ;;  %v659_v23 = vsel %vm644_vm3, %v8002_v61, %v449_v48  ;;  %v6027_v61 = vld [vmem:[%s7543_s21 + $0xc2] sm:$0xff] }
 0x16b   : > { %2059 = vrot.lane.b32.xlu0 %v6025_v47, %s7408_s13 }
 0x16c   : > { %v579_v8 = vpop.permute.xlu1 %578 }
 0x16d   : > { %v693_v24 = vsel %vm677_vm4, %v660_v49, %v579_v8  ;;  %v577_v25 = vpop.permute.xlu0 %576  ;;  %v8449_v49 = vld [vmem:[%s7543_s21 + $0x129] sm:$0xff] }
 0x16e   : > { %v692_v10 = vsel %vm677_vm4, %v659_v23, %v577_v25  ;;  %1937 = vrot.lane.b32.xlu1 %v8361_v6, %s7409_s15 }
 0x16f   : > { %1935 = vrot.lane.b32.xlu0 %v8366_v9, %s7409_s15  ;;  %6512 = vmatprep.mubr.msk.f32.mxu0 %vm1132_vm5, %v692_v10 }
 0x170   : > { %6513 = vmatmul.mubr.msk.f32.gmra.mrb[14].mxu0 %vm1132_vm5, %v693_v24  ;;  %v455_v12 = vpop.permute.xlu1 %454  ;;  %v8454_v24 = vld [vmem:[%s7543_s21 + $0x121] sm:$0xff] }
 0x171   : > { %v453_v13 = vpop.permute.xlu0 %452  ;;  %v662_v50 = vsel %vm644_vm3, %v8021_v57, %v455_v12  ;;  %v6030_v57 = vld [vmem:[%s7543_s21 + $0xe2] sm:$0xff] }
 0x172   : > { %2065 = vrot.lane.b32.xlu1 %v6028_v11, %s7408_s13  ;;  %v661_v19 = vsel %vm644_vm3, %v8024_v1, %v453_v13  ;;  %v6029_v1 = vld [vmem:[%s7543_s21 + $0xda] sm:$0xff] }
 0x173   : > { %2063 = vrot.lane.b32.xlu0 %v6027_v61, %s7408_s13 }
 0x174   : > { %v583_v18 = vpop.permute.xlu1 %582 }
 0x175   : > { %v695_v59 = vsel %vm677_vm4, %v662_v50, %v583_v18  ;;  %v581_v58 = vpop.permute.xlu0 %580  ;;  %v8471_v50 = vld [vmem:[%s7543_s21 + $0x141] sm:$0xff] }
 0x176   : > { %v694_v39 = vsel %vm677_vm4, %v661_v19, %v581_v58  ;;  %1941 = vrot.lane.b32.xlu1 %v8383_v38, %s7409_s15 }
 0x177   : > { %1939 = vrot.lane.b32.xlu0 %v8388_v51, %s7409_s15  ;;  %6515 = vmatprep.mubr.msk.f32.mxu0 %vm1132_vm5, %v694_v39 }
 0x178   : > { %6516 = vmatmul.mubr.msk.f32.gmra.mrb[16].mxu0 %vm1132_vm5, %v695_v59  ;;  %v459_v41 = vpop.permute.xlu1 %458  ;;  %v8476_v59 = vld [vmem:[%s7543_s21 + $0x139] sm:$0xff] }
 0x179   : > { %v457_v31 = vpop.permute.xlu0 %456  ;;  %v664_v52 = vsel %vm644_vm3, %v8043_v63, %v459_v41  ;;  %v6032_v63 = vld [vmem:[%s7543_s21 + $0xfa] sm:$0xff] }
 0x17a   : > { %2069 = vrot.lane.b32.xlu1 %v6030_v57, %s7408_s13  ;;  %v663_v55 = vsel %vm644_vm3, %v8046_v60, %v457_v31  ;;  %v6031_v60 = vld [vmem:[%s7543_s21 + $0xf2] sm:$0xff] }
 0x17b   : > { %2067 = vrot.lane.b32.xlu0 %v6029_v1, %s7408_s13 }
 0x17c   : > { %v587_v21 = vpop.permute.xlu1 %586 }
 0x17d   : > { %v697_v43 = vsel %vm677_vm4, %v664_v52, %v587_v21  ;;  %v585_v56 = vpop.permute.xlu0 %584  ;;  %v8493_v52 = vld [vmem:[%s7543_s21 + $0x159] sm:$0xff] }
 0x17e   : > { %v696_v44 = vsel %vm677_vm4, %v663_v55, %v585_v56  ;;  %1945 = vrot.lane.b32.xlu1 %v8405_v33, %s7409_s15 }
 0x17f   : > { %1943 = vrot.lane.b32.xlu0 %v8410_v42, %s7409_s15  ;;  %6518 = vmatprep.mubr.msk.f32.mxu0 %vm1132_vm5, %v696_v44 }
 0x180   : > { %6519 = vmatmul.mubr.msk.f32.gmra.mrb[18].mxu0 %vm1132_vm5, %v697_v43  ;;  %v463_v2 = vpop.permute.xlu1 %462  ;;  %v8498_v43 = vld [vmem:[%s7543_s21 + $0x151] sm:$0xff] }
 0x181   : > { %v461_v17 = vpop.permute.xlu0 %460  ;;  %v666_v35 = vsel %vm644_vm3, %v8073_v14, %v463_v2  ;;  %v6034_v14 = vld [vmem:[%s7543_s21 + $0x112] sm:$0xff] }
 0x182   : > { %2073 = vrot.lane.b32.xlu1 %v6032_v63, %s7408_s13  ;;  %v665_v46 = vsel %vm644_vm3, %v8076_v28, %v461_v17  ;;  %v6033_v28 = vld [vmem:[%s7543_s21 + $0x10a] sm:$0xff] }
 0x183   : > { %2071 = vrot.lane.b32.xlu0 %v6031_v60, %s7408_s13 }
 0x184   : > { %v591_v36 = vpop.permute.xlu1 %590 }
 0x185   : > { %v699_v53 = vsel %vm677_vm4, %v666_v35, %v591_v36  ;;  %v589_v5 = vpop.permute.xlu0 %588  ;;  %v8515_v35 = vld [vmem:[%s7543_s21 + $0x171] sm:$0xff] }
 0x186   : > { %v698_v47 = vsel %vm677_vm4, %v665_v46, %v589_v5  ;;  %1949 = vrot.lane.b32.xlu1 %v8427_v34, %s7409_s15 }
 0x187   : > { %1947 = vrot.lane.b32.xlu0 %v8432_v4, %s7409_s15  ;;  %6521 = vmatprep.mubr.msk.f32.mxu0 %vm1132_vm5, %v698_v47 }
 0x188   : > { %6522 = vmatmul.mubr.msk.f32.gmra.mrb[20].mxu0 %vm1132_vm5, %v699_v53  ;;  %v467_v48 = vpop.permute.xlu1 %466  ;;  %v8520_v53 = vld [vmem:[%s7543_s21 + $0x169] sm:$0xff] }
 0x189   : > { %v465_v7 = vpop.permute.xlu0 %464  ;;  %v668_v8 = vsel %vm644_vm3, %v8098_v3, %v467_v48  ;;  %v6036_v3 = vld [vmem:[%s7543_s21 + $0x12a] sm:$0xff] }
 0x18a   : > { %2077 = vrot.lane.b32.xlu1 %v6034_v14, %s7408_s13  ;;  %v667_v25 = vsel %vm644_vm3, %v8101_v20, %v465_v7  ;;  %v6035_v20 = vld [vmem:[%s7543_s21 + $0x122] sm:$0xff] }
 0x18b   : > { %2075 = vrot.lane.b32.xlu0 %v6033_v28, %s7408_s13 }
 0x18c   : > { %v595_v23 = vpop.permute.xlu1 %594 }
 0x18d   : > { %v701_v10 = vsel %vm677_vm4, %v668_v8, %v595_v23  ;;  %v593_v11 = vpop.permute.xlu0 %592  ;;  %v8537_v8 = vld [vmem:[%s7543_s21 + $0x189] sm:$0xff] }
 0x18e   : > { %v700_v12 = vsel %vm677_vm4, %v667_v25, %v593_v11  ;;  %1953 = vrot.lane.b32.xlu1 %v8449_v49, %s7409_s15 }
 0x18f   : > { %1951 = vrot.lane.b32.xlu0 %v8454_v24, %s7409_s15  ;;  %6524 = vmatprep.mubr.msk.f32.mxu0 %vm1132_vm5, %v700_v12 }
 0x190   : > { %6525 = vmatmul.mubr.msk.f32.gmra.mrb[22].mxu0 %vm1132_vm5, %v701_v10  ;;  %v471_v61 = vpop.permute.xlu1 %470  ;;  %v8542_v10 = vld [vmem:[%s7543_s21 + $0x181] sm:$0xff] }
 0x191   : > { %v469_v13 = vpop.permute.xlu0 %468  ;;  %v670_v18 = vsel %vm644_vm3, %v8120_v62, %v471_v61  ;;  %v6038_v62 = vld [vmem:[%s7543_s21 + $0x142] sm:$0xff] }
 0x192   : > { %2081 = vrot.lane.b32.xlu1 %v6036_v3, %s7408_s13  ;;  %v669_v58 = vsel %vm644_vm3, %v8123_v29, %v469_v13  ;;  %v6037_v29 = vld [vmem:[%s7543_s21 + $0x13a] sm:$0xff]  ;;  %v5951_v13 = vld [vmem:[%s7543_s21 + $0x30] sm:$0xff] }
 0x193   : > { %2079 = vrot.lane.b32.xlu0 %v6035_v20, %s7408_s13  ;;  %v6044_v20 = vld [vmem:[%s7543_s21 + $0x18a] sm:$0xff] }
 0x194   : > { %v599_v19 = vpop.permute.xlu1 %598 }
 0x195   : > { %v703_v39 = vsel %vm677_vm4, %v670_v18, %v599_v19  ;;  %v597_v57 = vpop.permute.xlu0 %596  ;;  %v6043_v18 = vld [vmem:[%s7543_s21 + $0x182] sm:$0xff] }
 0x196   : > { %v702_v41 = vsel %vm677_vm4, %v669_v58, %v597_v57  ;;  %1957 = vrot.lane.b32.xlu1 %v8471_v50, %s7409_s15  ;;  %v2733_v19 = vld [vmem:[%s10136_s5] sm:$0xf]  ;;  %v3387_v57 = vld [vmem:[#allocation3] sm:$0xff] }
 0x197   : > { %1955 = vrot.lane.b32.xlu0 %v8476_v59, %s7409_s15  ;;  %6527 = vmatprep.mubr.msk.f32.mxu0 %vm1132_vm5, %v702_v41  ;;  %v3388_v41 = vld [vmem:[#allocation3 + $0x8] sm:$0xff] }
 0x198   : > { %6528 = vmatmul.mubr.msk.f32.gmra.mrb[24].mxu0 %vm1132_vm5, %v703_v39  ;;  %v475_v1 = vpop.permute.xlu1 %474  ;;  %v10159_v39 = vmov 0.0|0.0   ;;  %6591 = vmatprep.subr.msk.mxu1 %vm1229_vm0, %v2733_v19 }
 0x199   : > { %v473_v31 = vpop.permute.xlu0 %472  ;;  %v672_v21 = vsel %vm644_vm3, %v8142_v16, %v475_v1  ;;  %v6040_v16 = vld [vmem:[%s7543_s21 + $0x15a] sm:$0xff]  ;;  %6979 = vmatprep.subr.bf16.mxu0 %v10159_v39  ;;  %6592 = vmatpush3.msk.msra.mxu1 %vm1229_vm0, %v2733_v19 }
 0x19a   : > { %2085 = vrot.lane.b32.xlu1 %v6038_v62, %s7408_s13  ;;  %v671_v56 = vsel %vm644_vm3, %v8145_v30, %v473_v31  ;;  %v6039_v30 = vld [vmem:[%s7543_s21 + $0x152] sm:$0xff]  ;;  %v6084_v1 = vld [vmem:[%s7543_s21 + $0x21] sm:$0xff]  ;;  %6899 = vmatprep.subr.bf16.mxu1 %v10159_v39 }
 0x19b   : > { %2083 = vrot.lane.b32.xlu0 %v6037_v29, %s7408_s13  ;;  %v6083_v62 = vld [vmem:[%s7543_s21 + $0x19] sm:$0xff]  ;;  %v3756_v29 = vld [vmem:[#allocation3 + $0x180] sm:$0xff] }
 0x19c   : > { %v603_v55 = vpop.permute.xlu1 %602  ;;  %v3757_v31 = vld [vmem:[#allocation3 + $0x188] sm:$0xff]  ;;  %6593 = vmatprep.mubr.msk.f32.mxu1 %vm644_vm3, %v6083_v62  ;;  %v3762_v19 = vld [vmem:[#allocation3 + $0x1b0] sm:$0xff] }
 0x19d   : > { %v705_v44 = vsel %vm677_vm4, %v672_v21, %v603_v55  ;;  %v601_v63 = vpop.permute.xlu0 %600  ;;  %v6014_v21 = vld [vmem:[%s7543_s21 + $0x1a1] sm:$0xff]  ;;  %v6900_v55 = vpack.c.bf16 %v3757_v31, %v3756_v29  ;;  %6594 = vmatmul.mubr.msk.f32.vlgmr.msra.gmra.mrb[0].mxu1 %vm644_vm3, %v6084_v1 }
 0x19e   : > { %v704_v2 = vsel %vm677_vm4, %v671_v56, %v601_v63  ;;  %1961 = vrot.lane.b32.xlu1 %v8493_v52, %s7409_s15  ;;  %v6085_v56 = vld [vmem:[%s7543_s21 + $0x31] sm:$0xff] }
 0x19f   : > { %1959 = vrot.lane.b32.xlu0 %v8498_v43, %s7409_s15  ;;  %6530 = vmatprep.mubr.msk.f32.mxu0 %vm1132_vm5, %v704_v2  ;;  %v6013_v2 = vld [vmem:[%s7543_s21 + $0x199] sm:$0xff] }
 0x1a0   : > { %6531 = vmatmul.mubr.msk.f32.gmra.mrb[26].mxu0 %vm1132_vm5, %v705_v44  ;;  %v479_v60 = vpop.permute.xlu1 %478  ;;  %6901 = vmatpush1.bf16.msra.mxu1 %v6900_v55  ;;  %v3393_v55 = vld [vmem:[#allocation3 + $0x30] sm:$0xff] }
 0x1a1   : > { %v477_v17 = vpop.permute.xlu0 %476  ;;  %v674_v36 = vsel %vm644_vm3, %v8164_v26, %v479_v60  ;;  %v6042_v26 = vld [vmem:[%s7543_s21 + $0x172] sm:$0xff]  ;;  %v3758_v60 = vld [vmem:[#allocation3 + $0x190] sm:$0xff]  ;;  %6596 = vmatprep.mubr.msk.f32.mxu1 %vm644_vm3, %v6085_v56  ;;  %6902 = vmatprep.subr.bf16.mxu1 %v10159_v39  ;;  %v6090_v56 = vld [vmem:[%s7543_s21 + $0x69] sm:$0xff] }
 0x1a2   : > { %2089 = vrot.lane.b32.xlu1 %v6040_v16, %s7408_s13  ;;  %v673_v5 = vsel %vm644_vm3, %v8167_v27, %v477_v17  ;;  %v6041_v27 = vld [vmem:[%s7543_s21 + $0x16a] sm:$0xff]  ;;  %v6980_v16 = vpack.c.bf16 %v3388_v41, %v3387_v57  ;;  %v6089_v57 = vld [vmem:[%s7543_s21 + $0x61] sm:$0xff] }
 0x1a3   : > { %2087 = vrot.lane.b32.xlu0 %v6039_v30, %s7408_s13  ;;  %v3759_v30 = vld [vmem:[#allocation3 + $0x198] sm:$0xff] }
 0x1a4   : > { %v607_v46 = vpop.permute.xlu1 %606 }
 0x1a5   : > { %v707_v47 = vsel %vm677_vm4, %v674_v36, %v607_v46  ;;  %v605_v14 = vpop.permute.xlu0 %604 }
 0x1a6   : > { %v706_v48 = vsel %vm677_vm4, %v673_v5, %v605_v14  ;;  %1965 = vrot.lane.b32.xlu1 %v8515_v35, %s7409_s15  ;;  %v3389_v5 = vld [vmem:[#allocation3 + $0x10] sm:$0xff]  ;;  %v6903_v14 = vpack.c.bf16 %v3759_v30, %v3758_v60  ;;  %v3765_v60 = vld [vmem:[#allocation3 + $0x1c8] sm:$0xff] }
 0x1a7   : > { %1963 = vrot.lane.b32.xlu0 %v8520_v53, %s7409_s15  ;;  %6533 = vmatprep.mubr.msk.f32.mxu0 %vm1132_vm5, %v706_v48 }
 0x1a8   : > { %6534 = vmatmul.mubr.msk.f32.gmra.mrb[28].mxu0 %vm1132_vm5, %v707_v47  ;;  %v483_v28 = vpop.permute.xlu1 %482  ;;  %v6086_v47 = vld [vmem:[%s7543_s21 + $0x39] sm:$0xff]  ;;  %6904 = vmatpush1.bf16.msra.mxu1 %v6903_v14 }
 0x1a9   : > { %v481_v7 = vpop.permute.xlu0 %480  ;;  %v676_v23 = vsel %vm644_vm3, %v8186_v37, %v483_v28  ;;  %v5952_v37 = vld [vmem:[%s7543_s21 + $0x38] sm:$0xff]  ;;  %v3760_v28 = vld [vmem:[#allocation3 + $0x1a0] sm:$0xff]  ;;  %6597 = vmatmul.mubr.msk.f32.gmra.mrb[2].mxu1 %vm644_vm3, %v6086_v47  ;;  %6905 = vmatprep.subr.bf16.mxu1 %v10159_v39 }
 0x1aa   : > { %2093 = vrot.lane.b32.xlu1 %v6042_v26, %s7408_s13  ;;  %v675_v11 = vsel %vm644_vm3, %v8189_v22, %v481_v7  ;;  %v3390_v26 = vld [vmem:[#allocation3 + $0x18] sm:$0xff]  ;;  %v3396_v47 = vld [vmem:[#allocation3 + $0x48] sm:$0xff] }
 0x1ab   : > { %2091 = vrot.lane.b32.xlu0 %v6041_v27, %s7408_s13  ;;  %v3761_v27 = vld [vmem:[#allocation3 + $0x1a8] sm:$0xff]  ;;  %v6046_v7 = vld [vmem:[%s7543_s21 + $0x1a2] sm:$0xff] }
 0x1ac   : > { %v611_v25 = vpop.permute.xlu1 %610 }
 0x1ad   : > { %v709_v12 = vsel %vm677_vm4, %v676_v23, %v611_v25  ;;  %v609_v3 = vpop.permute.xlu0 %608  ;;  %v5954_v23 = vld [vmem:[%s7543_s21 + $0x50] sm:$0xff] }
 0x1ae   : > { %v708_v61 = vsel %vm677_vm4, %v675_v11, %v609_v3  ;;  %1969 = vrot.lane.b32.xlu1 %v8537_v8, %s7409_s15  ;;  %v6045_v11 = vld [vmem:[%s7543_s21 + $0x19a] sm:$0xff] }
 0x1af   : > { %1967 = vrot.lane.b32.xlu0 %v8542_v10, %s7409_s15  ;;  %6536 = vmatprep.mubr.msk.f32.mxu0 %vm1132_vm5, %v708_v61  ;;  %v6983_v61 = vpack.c.bf16 %v3390_v26, %v3389_v5  ;;  %v3395_v5 = vld [vmem:[#allocation3 + $0x40] sm:$0xff]  ;;  %v3766_v26 = vld [vmem:[#allocation3 + $0x1d0] sm:$0xff] }
 0x1b0   : > { %6537 = vmatmul.mubr.msk.f32.gmra.mrb[30].mxu0 %vm1132_vm5, %v709_v12  ;;  %v1914_v22 = vpop.permute.xlu1 %1913  ;;  %v6087_v12 = vld [vmem:[%s7543_s21 + $0x49] sm:$0xff] }
 0x1b1   : > { %v1912_v58 = vpop.permute.xlu0 %1911  ;;  %v2136_v44 = vsel %vm644_vm3, %v5952_v37, %v1914_v22  ;;  %v3391_v37 = vld [vmem:[#allocation3 + $0x20] sm:$0xff]  ;;  %6599 = vmatprep.mubr.msk.f32.mxu1 %vm644_vm3, %v6087_v12 }
 0x1b2   : > { %2097 = vrot.lane.b32.xlu1 %v6044_v20, %s7408_s13  ;;  %v2135_v17 = vsel %vm644_vm3, %v5951_v13, %v1912_v58  ;;  %v3392_v20 = vld [vmem:[#allocation3 + $0x28] sm:$0xff]  ;;  %v6906_v13 = vpack.c.bf16 %v3761_v27, %v3760_v28  ;;  %v3763_v58 = vld [vmem:[#allocation3 + $0x1b8] sm:$0xff] }
 0x1b3   : > { %2095 = vrot.lane.b32.xlu0 %v6043_v18, %s7408_s13  ;;  %v6088_v22 = vld [vmem:[%s7543_s21 + $0x51] sm:$0xff]  ;;  %v5953_v18 = vld [vmem:[%s7543_s21 + $0x48] sm:$0xff]  ;;  %v6986_v1 = vpack.c.bf16 %v3392_v20, %v3391_v37 }
 0x1b4   : > { %v2042_v63 = vpop.permute.xlu1 %2041  ;;  %6600 = vmatmul.mubr.msk.f32.gmra.mrb[4].mxu1 %vm644_vm3, %v6088_v22  ;;  %v3767_v28 = vld [vmem:[#allocation3 + $0x1d8] sm:$0xff]  ;;  %v3769_v20 = vld [vmem:[#allocation3 + $0x1e8] sm:$0xff] }
 0x1b5   : > { %v2168_v36 = vsel %vm677_vm4, %v2136_v44, %v2042_v63  ;;  %v2040_v46 = vpop.permute.xlu0 %2039  ;;  %6907 = vmatpush1.bf16.msra.mxu1 %v6906_v13  ;;  %v6909_v44 = vpack.c.bf16 %v3763_v58, %v3762_v19  ;;  %6602 = vmatprep.mubr.msk.f32.mxu1 %vm644_vm3, %v6089_v57  ;;  %v3398_v37 = vld [vmem:[#allocation3 + $0x58] sm:$0xff]  ;;  %v5958_v13 = vld [vmem:[%s7543_s21 + $0x80] sm:$0xff]  ;;  %v3399_v58 = vld [vmem:[#allocation3 + $0x60] sm:$0xff] }
 0x1b6   : > { %v2167_v48 = vsel %vm677_vm4, %v2135_v17, %v2040_v46  ;;  %1973 = vrot.lane.b32.xlu1 %v6014_v21, %s7409_s15  ;;  %6908 = vmatprep.subr.bf16.mxu1 %v10159_v39  ;;  %v5956_v17 = vld [vmem:[%s7543_s21 + $0x68] sm:$0xff]  ;;  %v3400_v57 = vld [vmem:[#allocation3 + $0x68] sm:$0xff] }
 0x1b7   : > { %1971 = vrot.lane.b32.xlu0 %v6013_v2, %s7409_s15  ;;  %6543 = vmatprep.mubr.msk.f32.mxu0 %vm1132_vm5, %v2167_v48  ;;  %v3394_v2 = vld [vmem:[#allocation3 + $0x38] sm:$0xff]  ;;  %v5955_v48 = vld [vmem:[%s7543_s21 + $0x60] sm:$0xff] }
 0x1b8   : > { %6544 = vmatmul.mubr.msk.f32.vlgmr.msra.gmra.mrb[0].mxu0 %vm1132_vm5, %v2168_v36  ;;  %v1918_v25 = vpop.permute.xlu1 %1917  ;;  %6603 = vmatmul.mubr.msk.f32.gmra.mrb[6].mxu1 %vm644_vm3, %v6090_v56  ;;  %v6989_v46 = vpack.c.bf16 %v3394_v2, %v3393_v55  ;;  %v3402_v2 = vld [vmem:[#allocation3 + $0x78] sm:$0xff] }
 0x1b9   : > { %v1916_v3 = vpop.permute.xlu0 %1915  ;;  %6981 = vmatpush1.bf16.msra.mxu0 %v6980_v16  ;;  %v2138_v41 = vsel %vm644_vm3, %v5954_v23, %v1918_v25  ;;  %v3764_v16 = vld [vmem:[#allocation3 + $0x1c0] sm:$0xff]  ;;  %6910 = vmatpush1.bf16.msra.mxu1 %v6909_v44  ;;  %v6992_v23 = vpack.c.bf16 %v3396_v47, %v3395_v5  ;;  %v3401_v44 = vld [vmem:[#allocation3 + $0x70] sm:$0xff]  ;;  %v3404_v5 = vld [vmem:[#allocation3 + $0x88] sm:$0xff] }
 0x1ba   : > { %2101 = vrot.lane.b32.xlu1 %v6046_v7, %s7408_s13  ;;  %6982 = vmatprep.subr.bf16.mxu0 %v10159_v39  ;;  %v2137_v29 = vsel %vm644_vm3, %v5953_v18, %v1916_v3  ;;  %v6912_v14 = vpack.c.bf16 %v3765_v60, %v3764_v16  ;;  %v3397_v3 = vld [vmem:[#allocation3 + $0x50] sm:$0xff]  ;;  %v3773_v16 = vld [vmem:[#allocation3 + $0x208] sm:$0xff]  ;;  %v5959_v47 = vld [vmem:[%s7543_s21 + $0x90] sm:$0xff] }
 0x1bb   : > { %2099 = vrot.lane.b32.xlu0 %v6045_v11, %s7408_s13  ;;  %6605 = vmatprep.mubr.msk.f32.mxu1 %vm644_vm3, %v8300_v15  ;;  %v6915_v15 = vpack.c.bf16 %v3767_v28, %v3766_v26  ;;  %v6995_v19 = vpack.c.bf16 %v3398_v37, %v3397_v3  ;;  %v3777_v3 = vld [vmem:[#allocation3 + $0x228] sm:$0xff] }
 0x1bc   : > { %v2046_v62 = vpop.permute.xlu1 %2045  ;;  %6911 = vmatprep.subr.bf16.mxu1 %v10159_v39  ;;  %6606 = vmatmul.mubr.msk.f32.gmra.mrb[8].mxu1 %vm644_vm3, %v8295_v54  ;;  %v3768_v54 = vld [vmem:[#allocation3 + $0x1e0] sm:$0xff] }
 0x1bd   : > { %v2170_v31 = vsel %vm677_vm4, %v2138_v41, %v2046_v62  ;;  %v2044_v21 = vpop.permute.xlu0 %2043  ;;  %6984 = vmatpush1.bf16.msra.mxu0 %v6983_v61  ;;  %6913 = vmatpush1.bf16.msra.mxu1 %v6912_v14  ;;  %v5957_v41 = vld [vmem:[%s7543_s21 + $0x78] sm:$0xff]  ;;  %v3770_v62 = vld [vmem:[#allocation3 + $0x1f0] sm:$0xff] }
 0x1be   : > { %v2169_v63 = vsel %vm677_vm4, %v2137_v29, %v2044_v21  ;;  %6985 = vmatprep.subr.bf16.mxu0 %v10159_v39  ;;  %6608 = vmatprep.mubr.msk.f32.mxu1 %vm644_vm3, %v8322_v32  ;;  %v6918_v32 = vpack.c.bf16 %v3769_v20, %v3768_v54  ;;  %v3774_v14 = vld [vmem:[#allocation3 + $0x210] sm:$0xff]  ;;  %v3407_v20 = vld [vmem:[#allocation3 + $0xa0] sm:$0xff] }
 0x1bf   : > { %6546 = vmatprep.mubr.msk.f32.mxu0 %vm1132_vm5, %v2169_v63  ;;  %6914 = vmatprep.subr.bf16.mxu1 %v10159_v39 }
 0x1c0   : > { %6547 = vmatmul.mubr.msk.f32.gmra.mrb[2].mxu0 %vm1132_vm5, %v2170_v31  ;;  %v1922_v30 = vpop.permute.xlu1 %1921  ;;  %6609 = vmatmul.mubr.msk.f32.gmra.mrb[10].mxu1 %vm644_vm3, %v8317_v40  ;;  %v6998_v31 = vpack.c.bf16 %v3400_v57, %v3399_v58 }
 0x1c1   : > { %v1920_v36 = vpop.permute.xlu0 %1919  ;;  %6987 = vmatpush1.bf16.msra.mxu0 %v6986_v1  ;;  %v2140_v27 = vsel %vm644_vm3, %v5956_v17, %v1922_v30  ;;  %6916 = vmatpush1.bf16.msra.mxu1 %v6915_v15  ;;  %v3771_v1 = vld [vmem:[#allocation3 + $0x1f8] sm:$0xff]  ;;  %v5960_v30 = vld [vmem:[%s7543_s21 + $0x98] sm:$0xff] }
 0x1c2   : > { %6988 = vmatprep.subr.bf16.mxu0 %v10159_v39  ;;  %v2139_v25 = vsel %vm644_vm3, %v5955_v48, %v1920_v36  ;;  %6611 = vmatprep.mubr.msk.f32.mxu1 %vm644_vm3, %v8344_v0  ;;  %v6921_v0 = vpack.c.bf16 %v3771_v1, %v3770_v62  ;;  %v7001_v36 = vpack.c.bf16 %v3402_v2, %v3401_v44  ;;  %v3775_v48 = vld [vmem:[#allocation3 + $0x218] sm:$0xff]  ;;  %v3411_v44 = vld [vmem:[#allocation3 + $0xc0] sm:$0xff] }
 0x1c3   : > { %6917 = vmatprep.subr.bf16.mxu1 %v10159_v39 }
 0x1c4   : > { %v2050_v7 = vpop.permute.xlu1 %2049  ;;  %6612 = vmatmul.mubr.msk.f32.gmra.mrb[12].mxu1 %vm644_vm3, %v8339_v45  ;;  %v3772_v45 = vld [vmem:[#allocation3 + $0x200] sm:$0xff] }
 0x1c5   : > { %v2172_v11 = vsel %vm677_vm4, %v2140_v27, %v2050_v7  ;;  %v2048_v12 = vpop.permute.xlu0 %2047  ;;  %6990 = vmatpush1.bf16.msra.mxu0 %v6989_v46  ;;  %6919 = vmatpush1.bf16.msra.mxu1 %v6918_v32  ;;  %v3403_v46 = vld [vmem:[#allocation3 + $0x80] sm:$0xff] }
 0x1c6   : > { %v2171_v61 = vsel %vm677_vm4, %v2139_v25, %v2048_v12  ;;  %6991 = vmatprep.subr.bf16.mxu0 %v10159_v39  ;;  %6614 = vmatprep.mubr.msk.f32.mxu1 %vm644_vm3, %v8366_v9  ;;  %v6924_v9 = vpack.c.bf16 %v3773_v16, %v3772_v45  ;;  %v7004_v28 = vpack.c.bf16 %v3404_v5, %v3403_v46  ;;  %v3405_v25 = vld [vmem:[#allocation3 + $0x90] sm:$0xff]  ;;  %v3406_v12 = vld [vmem:[#allocation3 + $0x98] sm:$0xff] }
 0x1c7   : > { %6549 = vmatprep.mubr.msk.f32.mxu0 %vm1132_vm5, %v2171_v61  ;;  %6920 = vmatprep.subr.bf16.mxu1 %v10159_v39  ;;  %v5962_v61 = vld [vmem:[%s7543_s21 + $0xb0] sm:$0xff]  ;;  %v7007_v54 = vpack.c.bf16 %v3406_v12, %v3405_v25  ;;  %v5969_v12 = vld [vmem:[%s7543_s21 + $0x108] sm:$0xff] }
 0x1c8   : > { %6550 = vmatmul.mubr.msk.f32.gmra.mrb[4].mxu0 %vm1132_vm5, %v2172_v11  ;;  %v1926_v22 = vpop.permute.xlu1 %1925  ;;  %6615 = vmatmul.mubr.msk.f32.gmra.mrb[14].mxu1 %vm644_vm3, %v8361_v6 }
 0x1c9   : > { %v1924_v18 = vpop.permute.xlu0 %1923  ;;  %6993 = vmatpush1.bf16.msra.mxu0 %v6992_v23  ;;  %v2142_v40 = vsel %vm644_vm3, %v5958_v13, %v1926_v22  ;;  %6922 = vmatpush1.bf16.msra.mxu1 %v6921_v0  ;;  %v3408_v22 = vld [vmem:[#allocation3 + $0xa8] sm:$0xff]  ;;  %v5961_v13 = vld [vmem:[%s7543_s21 + $0xa8] sm:$0xff] }
 0x1ca   : > { %6994 = vmatprep.subr.bf16.mxu0 %v10159_v39  ;;  %v2141_v21 = vsel %vm644_vm3, %v5957_v41, %v1924_v18  ;;  %6617 = vmatprep.mubr.msk.f32.mxu1 %vm644_vm3, %v8388_v51  ;;  %v6927_v51 = vpack.c.bf16 %v3775_v48, %v3774_v14  ;;  %v3778_v18 = vld [vmem:[#allocation3 + $0x230] sm:$0xff]  ;;  %v7010_v57 = vpack.c.bf16 %v3408_v22, %v3407_v20  ;;  %v5972_v22 = vld [vmem:[%s7543_s21 + $0x128] sm:$0xff] }
 0x1cb   : > { %6923 = vmatprep.subr.bf16.mxu1 %v10159_v39 }
 0x1cc   : > { %v2054_v29 = vpop.permute.xlu1 %2053  ;;  %6618 = vmatmul.mubr.msk.f32.gmra.mrb[16].mxu1 %vm644_vm3, %v8383_v38  ;;  %v3776_v38 = vld [vmem:[#allocation3 + $0x220] sm:$0xff] }
 0x1cd   : > { %v2174_v55 = vsel %vm677_vm4, %v2142_v40, %v2054_v29  ;;  %v2052_v56 = vpop.permute.xlu0 %2051  ;;  %6996 = vmatpush1.bf16.msra.mxu0 %v6995_v19  ;;  %6925 = vmatpush1.bf16.msra.mxu1 %v6924_v9  ;;  %v3779_v19 = vld [vmem:[#allocation3 + $0x238] sm:$0xff]  ;;  %v3409_v40 = vld [vmem:[#allocation3 + $0xb0] sm:$0xff] }
 0x1ce   : > { %v2173_v63 = vsel %vm677_vm4, %v2141_v21, %v2052_v56  ;;  %6997 = vmatprep.subr.bf16.mxu0 %v10159_v39  ;;  %6620 = vmatprep.mubr.msk.f32.mxu1 %vm644_vm3, %v8410_v42  ;;  %v6930_v42 = vpack.c.bf16 %v3777_v3, %v3776_v38  ;;  %v3410_v29 = vld [vmem:[#allocation3 + $0xb8] sm:$0xff]  ;;  %v5963_v56 = vld [vmem:[%s7543_s21 + $0xc0] sm:$0xff] }
 0x1cf   : > { %6552 = vmatprep.mubr.msk.f32.mxu0 %vm1132_vm5, %v2173_v63  ;;  %6926 = vmatprep.subr.bf16.mxu1 %v10159_v39 }
 0x1d0   : > { %6553 = vmatmul.mubr.msk.f32.gmra.mrb[6].mxu0 %vm1132_vm5, %v2174_v55  ;;  %v1930_v60 = vpop.permute.xlu1 %1929  ;;  %6621 = vmatmul.mubr.msk.f32.gmra.mrb[18].mxu1 %vm644_vm3, %v8405_v33  ;;  %v7013_v55 = vpack.c.bf16 %v3410_v29, %v3409_v40  ;;  %v3780_v40 = vld [vmem:[#allocation3 + $0x240] sm:$0xff]  ;;  %v3781_v29 = vld [vmem:[#allocation3 + $0x248] sm:$0xff] }
 0x1d1   : > { %v1928_v17 = vpop.permute.xlu0 %1927  ;;  %6999 = vmatpush1.bf16.msra.mxu0 %v6998_v31  ;;  %v2144_v6 = vsel %vm644_vm3, %v5960_v30, %v1930_v60  ;;  %6928 = vmatpush1.bf16.msra.mxu1 %v6927_v51  ;;  %v5964_v31 = vld [vmem:[%s7543_s21 + $0xc8] sm:$0xff]  ;;  %v3413_v60 = vld [vmem:[#allocation3 + $0xd0] sm:$0xff]  ;;  %v5970_v51 = vld [vmem:[%s7543_s21 + $0x110] sm:$0xff] }
 0x1d2   : > { %7000 = vmatprep.subr.bf16.mxu0 %v10159_v39  ;;  %v2143_v27 = vsel %vm644_vm3, %v5959_v47, %v1928_v17  ;;  %6623 = vmatprep.mubr.msk.f32.mxu1 %vm644_vm3, %v8432_v4  ;;  %v6933_v4 = vpack.c.bf16 %v3779_v19, %v3778_v18  ;;  %v3414_v30 = vld [vmem:[#allocation3 + $0xd8] sm:$0xff]  ;;  %v5966_v17 = vld [vmem:[%s7543_s21 + $0xe0] sm:$0xff] }
 0x1d3   : > { %6929 = vmatprep.subr.bf16.mxu1 %v10159_v39  ;;  %v7019_v46 = vpack.c.bf16 %v3414_v30, %v3413_v60  ;;  %v3418_v30 = vld [vmem:[#allocation3 + $0xf8] sm:$0xff] }
 0x1d4   : > { %v2058_v26 = vpop.permute.xlu1 %2057  ;;  %6624 = vmatmul.mubr.msk.f32.gmra.mrb[20].mxu1 %vm644_vm3, %v8427_v34 }
 0x1d5   : > { %v2176_v7 = vsel %vm677_vm4, %v2144_v6, %v2058_v26  ;;  %v2056_v23 = vpop.permute.xlu0 %2055  ;;  %7002 = vmatpush1.bf16.msra.mxu0 %v7001_v36  ;;  %6931 = vmatpush1.bf16.msra.mxu1 %v6930_v42  ;;  %v5967_v26 = vld [vmem:[%s7543_s21 + $0xf0] sm:$0xff] }
 0x1d6   : > { %v2175_v11 = vsel %vm677_vm4, %v2143_v27, %v2056_v23  ;;  %7003 = vmatprep.subr.bf16.mxu0 %v10159_v39  ;;  %6626 = vmatprep.mubr.msk.f32.mxu1 %vm644_vm3, %v8454_v24  ;;  %v3412_v24 = vld [vmem:[#allocation3 + $0xc8] sm:$0xff] }
 0x1d7   : > { %6555 = vmatprep.mubr.msk.f32.mxu0 %vm1132_vm5, %v2175_v11  ;;  %6932 = vmatprep.subr.bf16.mxu1 %v10159_v39  ;;  %v7016_v16 = vpack.c.bf16 %v3412_v24, %v3411_v44 }
 0x1d8   : > { %6556 = vmatmul.mubr.msk.f32.gmra.mrb[8].mxu0 %vm1132_vm5, %v2176_v7  ;;  %v1934_v15 = vpop.permute.xlu1 %1933  ;;  %6627 = vmatmul.mubr.msk.f32.gmra.mrb[22].mxu1 %vm644_vm3, %v8449_v49 }
 0x1d9   : > { %v1932_v37 = vpop.permute.xlu0 %1931  ;;  %7005 = vmatpush1.bf16.msra.mxu0 %v7004_v28  ;;  %v2146_v33 = vsel %vm644_vm3, %v5962_v61, %v1934_v15  ;;  %6934 = vmatpush1.bf16.msra.mxu1 %v6933_v4 }
 0x1da   : > { %7006 = vmatprep.subr.bf16.mxu0 %v10159_v39  ;;  %v2145_v32 = vsel %vm644_vm3, %v5961_v13, %v1932_v37  ;;  %6629 = vmatprep.mubr.msk.f32.mxu1 %vm644_vm3, %v8476_v59  ;;  %v5971_v13 = vld [vmem:[%s7543_s21 + $0x120] sm:$0xff] }
 0x1db   : > { %6935 = vmatprep.subr.bf16.mxu1 %v10159_v39 }
 0x1dc   : > { %v2062_v58 = vpop.permute.xlu1 %2061  ;;  %6630 = vmatmul.mubr.msk.f32.gmra.mrb[24].mxu1 %vm644_vm3, %v8471_v50 }
 0x1dd   : > { %v2178_v41 = vsel %vm677_vm4, %v2146_v33, %v2062_v58  ;;  %v2060_v62 = vpop.permute.xlu0 %2059  ;;  %7008 = vmatpush1.bf16.msra.mxu0 %v7007_v54  ;;  %6632 = vmatprep.mubr.msk.f32.mxu1 %vm644_vm3, %v8498_v43  ;;  %v5965_v43 = vld [vmem:[%s7543_s21 + $0xd8] sm:$0xff] }
 0x1de   : > { %v2177_v1 = vsel %vm677_vm4, %v2145_v32, %v2060_v62  ;;  %7009 = vmatprep.subr.bf16.mxu0 %v10159_v39  ;;  %v5974_v62 = vld [vmem:[%s7543_s21 + $0x140] sm:$0xff] }
 0x1df   : > { %6558 = vmatprep.mubr.msk.f32.mxu0 %vm1132_vm5, %v2177_v1  ;;  %v5973_v1 = vld [vmem:[%s7543_s21 + $0x138] sm:$0xff] }
 0x1e0   : > { %6559 = vmatmul.mubr.msk.f32.gmra.mrb[10].mxu0 %vm1132_vm5, %v2178_v41  ;;  %v1938_v34 = vpop.permute.xlu1 %1937  ;;  %6633 = vmatmul.mubr.msk.f32.gmra.mrb[26].mxu1 %vm644_vm3, %v8493_v52 }
 0x1e1   : > { %v1936_v21 = vpop.permute.xlu0 %1935  ;;  %7011 = vmatpush1.bf16.msra.mxu0 %v7010_v57  ;;  %v2148_v0 = vsel %vm644_vm3, %v5964_v31, %v1938_v34  ;;  %6635 = vmatprep.mubr.msk.f32.mxu1 %vm644_vm3, %v8520_v53 }
 0x1e2   : > { %7012 = vmatprep.subr.bf16.mxu0 %v10159_v39  ;;  %v2147_v49 = vsel %vm644_vm3, %v5963_v56, %v1936_v21  ;;  %v6936_v21 = vpack.c.bf16 %v3781_v29, %v3780_v40  ;;  %v3416_v56 = vld [vmem:[#allocation3 + $0xe8] sm:$0xff] }
 0x1e4   : > { %v2066_v63 = vpop.permute.xlu1 %2065  ;;  %6636 = vmatmul.mubr.msk.f32.gmra.mrb[28].mxu1 %vm644_vm3, %v8515_v35  ;;  %v5968_v35 = vld [vmem:[%s7543_s21 + $0xf8] sm:$0xff] }
 0x1e5   : > { %v2180_v2 = vsel %vm677_vm4, %v2148_v0, %v2066_v63  ;;  %v2064_v45 = vpop.permute.xlu0 %2063  ;;  %7014 = vmatpush1.bf16.msra.mxu0 %v7013_v55  ;;  %6638 = vmatprep.mubr.msk.f32.mxu1 %vm644_vm3, %v8542_v10  ;;  %v3415_v55 = vld [vmem:[#allocation3 + $0xe0] sm:$0xff] }
 0x1e6   : > { %v2179_v59 = vsel %vm677_vm4, %v2147_v49, %v2064_v45  ;;  %7015 = vmatprep.subr.bf16.mxu0 %v10159_v39  ;;  %v7022_v63 = vpack.c.bf16 %v3416_v56, %v3415_v55  ;;  %6937 = vmatpush1.bf16.msra.mxu1 %v6936_v21  ;;  %v3783_v45 = vld [vmem:[#allocation3 + $0x258] sm:$0xff]  ;;  %v5058_v56 = vld [vmem:[#allocation3 + $0x400] sm:$0xff] }
 0x1e7   : > { %6561 = vmatprep.mubr.msk.f32.mxu0 %vm1132_vm5, %v2179_v59  ;;  %6938 = vmatprep.subr.bf16.mxu1 %v10159_v39 }
 0x1e8   : > { %6562 = vmatmul.mubr.msk.f32.gmra.mrb[12].mxu0 %vm1132_vm5, %v2180_v2  ;;  %v1942_v50 = vpop.permute.xlu1 %1941  ;;  %6639 = vmatmul.mubr.msk.f32.gmra.mrb[30].mxu1 %vm644_vm3, %v8537_v8  ;;  %v3782_v2 = vld [vmem:[#allocation3 + $0x250] sm:$0xff] }
 0x1e9   : > { %v1940_v36 = vpop.permute.xlu0 %1939  ;;  %7017 = vmatpush1.bf16.msra.mxu0 %v7016_v16  ;;  %v2150_v5 = vsel %vm644_vm3, %v5966_v17, %v1942_v50  ;;  %v3417_v16 = vld [vmem:[#allocation3 + $0xf0] sm:$0xff]  ;;  %v6939_v60 = vpack.c.bf16 %v3783_v45, %v3782_v2  ;;  %v7412_v50 = vmov 0.0   ;;  %v5976_v17 = vld [vmem:[%s7543_s21 + $0x158] sm:$0xff]  ;;  %v5062_v2 = vld [vmem:[#allocation3 + $0x420] sm:$0xff] }
 0x1ea   : > { %7018 = vmatprep.subr.bf16.mxu0 %v10159_v39  ;;  %v2149_v52 = vsel %vm644_vm3, %v5965_v43, %v1940_v36  ;;  %2629 = vst [vmem:[#allocation2] sm:$0xff] %v7412_v50  ;;  %2637 = vst [vmem:[#allocation2 + $0x18] sm:$0x1] %v7412_v50  ;;  %v5975_v43 = vld [vmem:[%s7543_s21 + $0x150] sm:$0xff]  ;;  %v5063_v45 = vld [vmem:[#allocation3 + $0x428] sm:$0xff] }
 0x1eb   : > { %2638 = vst [vmem:[#allocation2 + $0x30] sm:$0x1] %v7412_v50  ;;  %2639 = vst [vmem:[#allocation2 + $0x48] sm:$0x1] %v7412_v50  ;;  %6940 = vmatpush1.bf16.msra.mxu1 %v6939_v60  ;;  %v5065_v60 = vld [vmem:[#allocation3 + $0x438] sm:$0xff] }
 0x1ec   : > { %v2070_v9 = vpop.permute.xlu1 %2069  ;;  %2640 = vst [vmem:[#allocation2 + $0x60] sm:$0x1] %v7412_v50  ;;  %2641 = vst [vmem:[#allocation2 + $0x78] sm:$0x1] %v7412_v50  ;;  %6941 = vmatprep.subr.bf16.mxu1 %v10159_v39 }
 0x1ed   : > { %v2182_v47 = vsel %vm677_vm4, %v2150_v5, %v2070_v9  ;;  %v2068_v14 = vpop.permute.xlu0 %2067  ;;  %7020 = vmatpush1.bf16.msra.mxu0 %v7019_v46  ;;  %2642 = vst [vmem:[#allocation2 + $0x90] sm:$0x1] %v7412_v50  ;;  %2643 = vst [vmem:[#allocation2 + $0xa8] sm:$0x1] %v7412_v50  ;;  %v7025_v46 = vpack.c.bf16 %v3418_v30, %v3417_v16  ;;  %v3784_v5 = vld [vmem:[#allocation3 + $0x260] sm:$0xff]  ;;  %v3785_v9 = vld [vmem:[#allocation3 + $0x268] sm:$0xff]  ;;  %v7115_v16 = vpack.c.bf16 %v5063_v45, %v5062_v2 }
 0x1ee   : > { %v2181_v53 = vsel %vm677_vm4, %v2149_v52, %v2068_v14  ;;  %7021 = vmatprep.subr.bf16.mxu0 %v10159_v39  ;;  %2644 = vst [vmem:[#allocation2 + $0xc0] sm:$0x1] %v7412_v50  ;;  %2645 = vst [vmem:[#allocation2 + $0xd8] sm:$0x1] %v7412_v50  ;;  %v6942_v14 = vpack.c.bf16 %v3785_v9, %v3784_v5  ;;  %v8837_v9 = vld [vmem:[%s10133_s2] ss:$0 sm:$0xff] }
 0x1ef   : > { %6564 = vmatprep.mubr.msk.f32.mxu0 %vm1132_vm5, %v2181_v53  ;;  %2646 = vst [vmem:[#allocation2 + $0xf0] sm:$0x1] %v7412_v50  ;;  %2647 = vst [vmem:[#allocation2 + $0x108] sm:$0x1] %v7412_v50  ;;  %v3795_v2 = vld [vmem:[#allocation3 + $0x2b8] sm:$0xff] }
 0x1f0   : > { %6565 = vmatmul.mubr.msk.f32.gmra.mrb[14].mxu0 %vm1132_vm5, %v2182_v47  ;;  %v1946_v48 = vpop.permute.xlu1 %1945  ;;  %2648 = vst [vmem:[#allocation2 + $0x120] sm:$0x1] %v7412_v50  ;;  %2649 = vst [vmem:[#allocation2 + $0x138] sm:$0x1] %v7412_v50  ;;  %6943 = vmatpush1.bf16.msra.mxu1 %v6942_v14  ;;  %v5071_v14 = vld [vmem:[#allocation3 + $0x468] sm:$0xff] }
 0x1f1   : > { %v1944_v6 = vpop.permute.xlu0 %1943  ;;  %v2152_v28 = vsel %vm644_vm3, %v5968_v35, %v1946_v48  ;;  %7023 = vmatpush1.bf16.msra.mxu0 %v7022_v63  ;;  %2650 = vst [vmem:[#allocation2 + $0x150] sm:$0x1] %v7412_v50  ;;  %2651 = vst [vmem:[#allocation2 + $0x168] sm:$0x1] %v7412_v50  ;;  %6944 = vmatprep.subr.bf16.mxu1 %v10159_v39  ;;  %v5061_v63 = vld [vmem:[#allocation3 + $0x418] sm:$0xff] }
 0x1f2   : > { %v2151_v27 = vsel %vm644_vm3, %v5967_v26, %v1944_v6  ;;  %2652 = vst [vmem:[#allocation2 + $0x180] sm:$0x1] %v7412_v50  ;;  %2653 = vst [vmem:[#allocation2 + $0x29] sm:$0x7f] %v7412_v50  ;;  %7024 = vmatprep.subr.bf16.mxu0 %v10159_v39  ;;  %v3786_v26 = vld [vmem:[#allocation3 + $0x270] sm:$0xff] }
 0x1f3   : > { %2654 = vst [vmem:[#allocation2 + $0x41] sm:$0x7f] %v7412_v50  ;;  %2655 = vst [vmem:[#allocation2 + $0x59] sm:$0x7f] %v7412_v50 }
 0x1f4   : > { %v2074_v10 = vpop.permute.xlu1 %2073  ;;  %2656 = vst [vmem:[#allocation2 + $0x71] sm:$0x7f] %v7412_v50  ;;  %2657 = vst [vmem:[#allocation2 + $0x89] sm:$0x7f] %v7412_v50 }
 0x1f5   : > { %v2184_v7 = vsel %vm677_vm4, %v2152_v28, %v2074_v10  ;;  %v2072_v23 = vpop.permute.xlu0 %2071  ;;  %2658 = vst [vmem:[#allocation2 + $0xa1] sm:$0x7f] %v7412_v50  ;;  %2659 = vst [vmem:[#allocation2 + $0xb9] sm:$0x7f] %v7412_v50  ;;  %7026 = vmatpush1.bf16.msra.mxu0 %v7025_v46  ;;  %v3787_v28 = vld [vmem:[#allocation3 + $0x278] sm:$0xff]  ;;  %v5068_v46 = vld [vmem:[#allocation3 + $0x450] sm:$0xff] }
 0x1f6   : > { %v2183_v25 = vsel %vm677_vm4, %v2151_v27, %v2072_v23  ;;  %2660 = vst [vmem:[#allocation2 + $0xd1] sm:$0x7f] %v7412_v50  ;;  %2661 = vst [vmem:[#allocation2 + $0xe9] sm:$0x7f] %v7412_v50  ;;  %v6945_v27 = vpack.c.bf16 %v3787_v28, %v3786_v26 }
 0x1f7   : > { %6567 = vmatprep.mubr.msk.f32.mxu0 %vm1132_vm5, %v2183_v25  ;;  %2662 = vst [vmem:[#allocation2 + $0x101] sm:$0x7f] %v7412_v50  ;;  %2663 = vst [vmem:[#allocation2 + $0x119] sm:$0x7f] %v7412_v50  ;;  %v5977_v25 = vld [vmem:[%s7543_s21 + $0x168] sm:$0xff] }
 0x1f8   : > { %6568 = vmatmul.mubr.msk.f32.gmra.mrb[16].mxu0 %vm1132_vm5, %v2184_v7  ;;  %v1950_v8 = vpop.permute.xlu1 %1949  ;;  %2664 = vst [vmem:[#allocation2 + $0x131] sm:$0x7f] %v7412_v50  ;;  %2665 = vst [vmem:[#allocation2 + $0x149] sm:$0x7f] %v7412_v50  ;;  %v5978_v7 = vld [vmem:[%s7543_s21 + $0x170] sm:$0xff]  ;;  %6946 = vmatpush1.bf16.msra.mxu1 %v6945_v27  ;;  %v5073_v27 = vld [vmem:[#allocation3 + $0x478] sm:$0xff] }
 0x1f9   : > { %v1948_v11 = vpop.permute.xlu0 %1947  ;;  %v2154_v38 = vsel %vm644_vm3, %v5970_v51, %v1950_v8  ;;  %2666 = vst [vmem:[#allocation2 + $0x161] sm:$0x7f] %v7412_v50  ;;  %2667 = vst [vmem:[#allocation2 + $0x179] sm:$0x7f] %v7412_v50 }
 0x1fa   : > { %v2153_v15 = vsel %vm644_vm3, %v5969_v12, %v1948_v11  ;;  %2668 = vst [vmem:[#allocation2 + $0x191] sm:$0x7f] %v7412_v50 }
 0x1fc   : > { %v2078_v3 = vpop.permute.xlu1 %2077 }
 0x1fd   : > { %v2186_v61 = vsel %vm677_vm4, %v2154_v38, %v2078_v3  ;;  %v2076_v37 = vpop.permute.xlu0 %2075 }
 0x1fe   : > { %v2185_v54 = vsel %vm677_vm4, %v2153_v15, %v2076_v37 }
 0x1ff   : > { %6570 = vmatprep.mubr.msk.f32.mxu0 %vm1132_vm5, %v2185_v54  ;;  %v3788_v54 = vld [vmem:[#allocation3 + $0x280] sm:$0xff] }
 0x200   : > { %6571 = vmatmul.mubr.msk.f32.gmra.mrb[18].mxu0 %vm1132_vm5, %v2186_v61  ;;  %v1954_v20 = vpop.permute.xlu1 %1953  ;;  %v5980_v61 = vld [vmem:[%s7543_s21 + $0x188] sm:$0xff] }
 0x201   : > { %v1952_v42 = vpop.permute.xlu0 %1951  ;;  %v2156_v18 = vsel %vm644_vm3, %v5972_v22, %v1954_v20  ;;  %v3789_v20 = vld [vmem:[#allocation3 + $0x288] sm:$0xff]  ;;  %v5979_v22 = vld [vmem:[%s7543_s21 + $0x180] sm:$0xff] }
 0x202   : > { %v2155_v33 = vsel %vm644_vm3, %v5971_v13, %v1952_v42  ;;  %v8814_v42 = vpack.c.bf16 %v3789_v20, %v3788_v54  ;;  %v3791_v20 = vld [vmem:[#allocation3 + $0x298] sm:$0xff] }
 0x204   : > { %v2082_v19 = vpop.permute.xlu1 %2081  ;;  %6948 = vmatprep.subr.bf16.mxu1 %v8814_v42 }
 0x205   : > { %v2188_v58 = vsel %vm677_vm4, %v2156_v18, %v2082_v19  ;;  %v2080_v57 = vpop.permute.xlu0 %2079 }
 0x206   : > { %v2187_v32 = vsel %vm677_vm4, %v2155_v33, %v2080_v57 }
 0x207   : > { %6573 = vmatprep.mubr.msk.f32.mxu0 %vm1132_vm5, %v2187_v32 }
 0x208   : > { %6574 = vmatmul.mubr.msk.f32.gmra.mrb[20].mxu0 %vm1132_vm5, %v2188_v58  ;;  %v1958_v41 = vpop.permute.xlu1 %1957 }
 0x209   : > { %v1956_v4 = vpop.permute.xlu0 %1955  ;;  %v2158_v34 = vsel %vm644_vm3, %v5974_v62, %v1958_v41  ;;  %v5982_v41 = vld [vmem:[%s7543_s21 + $0x1a0] sm:$0xff] }
 0x20a   : > { %v2157_v44 = vsel %vm644_vm3, %v5973_v1, %v1956_v4  ;;  %v5981_v4 = vld [vmem:[%s7543_s21 + $0x198] sm:$0xff]  ;;  %v3162_v1 = vrot.slane %v7412_v50, 1 }
 0x20c   : > { %v2086_v31 = vpop.permute.xlu1 %2085 }
 0x20d   : > { %v2190_v24 = vsel %vm677_vm4, %v2158_v34, %v2086_v31  ;;  %v2084_v0 = vpop.permute.xlu0 %2083 }
 0x20e   : > { %v2189_v49 = vsel %vm677_vm4, %v2157_v44, %v2084_v0  ;;  %v5059_v44 = vld [vmem:[#allocation3 + $0x408] sm:$0xff]  ;;  %v5060_v0 = vld [vmem:[#allocation3 + $0x410] sm:$0xff] }
 0x20f   : > { %6576 = vmatprep.mubr.msk.f32.mxu0 %vm1132_vm5, %v2189_v49  ;;  %v7111_v49 = vpack.c.bf16 %v5061_v63, %v5060_v0 }
 0x210   : > { %6577 = vmatmul.mubr.msk.f32.gmra.mrb[22].mxu0 %vm1132_vm5, %v2190_v24  ;;  %v1962_v59 = vpop.permute.xlu1 %1961  ;;  %v7107_v24 = vpack.c.bf16 %v5059_v44, %v5058_v56 }
 0x211   : > { %v1960_v36 = vpop.permute.xlu0 %1959  ;;  %v2160_v52 = vsel %vm644_vm3, %v5976_v17, %v1962_v59  ;;  %v5064_v59 = vld [vmem:[#allocation3 + $0x430] sm:$0xff]  ;;  %v5067_v17 = vld [vmem:[#allocation3 + $0x448] sm:$0xff] }
 0x212   : > { %v2159_v53 = vsel %vm644_vm3, %v5975_v43, %v1960_v36  ;;  %7108 = vmatprep.subr.bf16.mxu0 %v7107_v24  ;;  %v7119_v30 = vpack.c.bf16 %v5065_v60, %v5064_v59  ;;  %v5069_v43 = vld [vmem:[#allocation3 + $0x458] sm:$0xff] }
 0x213   : > { %v7127_v5 = vpack.c.bf16 %v5069_v43, %v5068_v46 }
 0x214   : > { %v2090_v47 = vpop.permute.xlu1 %2089 }
 0x215   : > { %v2192_v48 = vsel %vm677_vm4, %v2160_v52, %v2090_v47  ;;  %v2088_v35 = vpop.permute.xlu0 %2087  ;;  %v5070_v47 = vld [vmem:[#allocation3 + $0x460] sm:$0xff] }
 0x216   : > { %v2191_v6 = vsel %vm677_vm4, %v2159_v53, %v2088_v35  ;;  %v7131_v35 = vpack.c.bf16 %v5071_v14, %v5070_v47  ;;  %v3797_v14 = vld [vmem:[#allocation3 + $0x2c8] sm:$0xff] }
 0x217   : > { %6579 = vmatprep.mubr.msk.f32.mxu0 %vm1132_vm5, %v2191_v6 }
 0x218   : > { %6580 = vmatmul.mubr.msk.f32.gmra.mrb[24].mxu0 %vm1132_vm5, %v2192_v48  ;;  %v1966_v10 = vpop.permute.xlu1 %1965 }
 0x219   : > { %v1964_v23 = vpop.permute.xlu0 %1963  ;;  %v2162_v8 = vsel %vm644_vm3, %v5978_v7, %v1966_v10  ;;  %v5072_v10 = vld [vmem:[#allocation3 + $0x470] sm:$0xff] }
 0x21a   : > { %v2161_v11 = vsel %vm644_vm3, %v5977_v25, %v1964_v23  ;;  %v7135_v7 = vpack.c.bf16 %v5073_v27, %v5072_v10  ;;  %v3798_v10 = vld [vmem:[#allocation3 + $0x2d0] sm:$0xff]  ;;  %v3799_v27 = vld [vmem:[#allocation3 + $0x2d8] sm:$0xff] }
 0x21c   : > { %v2094_v51 = vpop.permute.xlu1 %2093 }
 0x21d   : > { %v2194_v12 = vsel %vm677_vm4, %v2162_v8, %v2094_v51  ;;  %v2092_v38 = vpop.permute.xlu0 %2091 }
 0x21e   : > { %v2193_v3 = vsel %vm677_vm4, %v2161_v11, %v2092_v38 }
 0x21f   : > { %6582 = vmatprep.mubr.msk.f32.mxu0 %vm1132_vm5, %v2193_v3  ;;  %v3790_v3 = vld [vmem:[#allocation3 + $0x290] sm:$0xff] }
 0x220   : > { %6583 = vmatmul.mubr.msk.f32.gmra.mrb[26].mxu0 %vm1132_vm5, %v2194_v12  ;;  %v1970_v15 = vpop.permute.xlu1 %1969 }
 0x221   : > { %v1968_v37 = vpop.permute.xlu0 %1967  ;;  %v2164_v13 = vsel %vm644_vm3, %v5980_v61, %v1970_v15 }
 0x222   : > { %v2163_v19 = vsel %vm644_vm3, %v5979_v22, %v1968_v37 }
 0x224   : > { %v2098_v18 = vpop.permute.xlu1 %2097 }
 0x225   : > { %v2196_v33 = vsel %vm677_vm4, %v2164_v13, %v2098_v18  ;;  %v2096_v58 = vpop.permute.xlu0 %2095 }
 0x226   : > { %v2195_v57 = vsel %vm677_vm4, %v2163_v19, %v2096_v58 }
 0x227   : > { %6585 = vmatprep.mubr.msk.f32.mxu0 %vm1132_vm5, %v2195_v57  ;;  %v6951_v57 = vpack.c.bf16 %v3791_v20, %v3790_v3 }
 0x228   : > { %6586 = vmatmul.mubr.msk.f32.gmra.mrb[28].mxu0 %vm1132_vm5, %v2196_v33  ;;  %v1974_v32 = vpop.permute.xlu1 %1973 }
 0x229   : > { %v1972_v62 = vpop.permute.xlu0 %1971  ;;  %v2166_v40 = vsel %vm644_vm3, %v5982_v41, %v1974_v32 }
 0x22a   : > { %v2165_v34 = vsel %vm644_vm3, %v5981_v4, %v1972_v62  ;;  %v3792_v4 = vld [vmem:[#allocation3 + $0x2a0] sm:$0xff] }
 0x22c   : > { %v2102_v29 = vpop.permute.xlu1 %2101 }
 0x22d   : > { %v2198_v31 = vsel %vm677_vm4, %v2166_v40, %v2102_v29  ;;  %v2100_v21 = vpop.permute.xlu0 %2099 }
 0x22e   : > { %v2197_v55 = vsel %vm677_vm4, %v2165_v34, %v2100_v21 }
 0x22f   : > { %6588 = vmatprep.mubr.msk.f32.mxu0 %vm1132_vm5, %v2197_v55 }
 0x230   : > { %6589 = vmatmul.mubr.msk.f32.gmra.mrb[30].mxu0 %vm1132_vm5, %v2198_v31 }
 0x231   : > { %4318 = vmatprep.mubr.f32.mxu0 %v3162_v1 }
 0x234   : > { %4319 = vmatmul.mubr.f32.vlgmr.msra.gmra.mrb[32].mxu0 %v7412_v50 }
 0x235   : > { %4323 = vmatprep.mubr.f32.mxu0 %v3162_v1  ;;  %7110 = vmatpush3.bf16.msra.mxu0 %v7107_v24  ;;  %v3793_v1 = vld [vmem:[#allocation3 + $0x2a8] sm:$0xff] }
 0x236   : > { %7112 = vmatprep.subr.bf16.mxu0 %v7111_v49  ;;  %v6955_v56 = vpack.c.bf16 %v3793_v1, %v3792_v4 }
 0x238   : > { %4324 = vmatmul.mubr.f32.gmra.mrb[34].mxu0 %v7412_v50  ;;  %v5066_v50 = vld [vmem:[#allocation3 + $0x440] sm:$0xff] }
 0x239   : > { %7114 = vmatpush3.bf16.msra.mxu0 %v7111_v49  ;;  %v7123_v36 = vpack.c.bf16 %v5067_v17, %v5066_v50  ;;  %v3794_v49 = vld [vmem:[#allocation3 + $0x2b0] sm:$0xff] }
 0x23a   : > { %7116 = vmatprep.subr.bf16.mxu0 %v7115_v16 }
 0x23d   : > { %7118 = vmatpush3.bf16.msra.mxu0 %v7115_v16 }
 0x23e   : > { %7120 = vmatprep.subr.bf16.mxu0 %v7119_v30 }
 0x241   : > { %7122 = vmatpush3.bf16.msra.mxu0 %v7119_v30  ;;  %v6959_v30 = vpack.c.bf16 %v3795_v2, %v3794_v49  ;;  %v3803_v2 = vld [vmem:[#allocation3 + $0x2f8] sm:$0xff] }
 0x242   : > { %7124 = vmatprep.subr.bf16.mxu0 %v7123_v36 }
 0x245   : > { %7126 = vmatpush3.bf16.msra.mxu0 %v7123_v36 }
 0x246   : > { %7128 = vmatprep.subr.bf16.mxu0 %v7127_v5 }
 0x249   : > { %7130 = vmatpush3.bf16.msra.mxu0 %v7127_v5  ;;  %v3796_v5 = vld [vmem:[#allocation3 + $0x2c0] sm:$0xff] }
 0x24a   : > { %7132 = vmatprep.subr.bf16.mxu0 %v7131_v35 }
 0x24d   : > { %7134 = vmatpush3.bf16.msra.mxu0 %v7131_v35 }
 0x24e   : > { %7136 = vmatprep.subr.bf16.mxu0 %v7135_v7 }
 0x251   : > { %7138 = vmatpush3.bf16.msra.mxu0 %v7135_v7 }
 0x28b   : > { %v6545_v52 = vpop.f32.mrb[0].mxu0 }
 0x28c   : > { %v2566_v53 = vadd.f32 %v6545_v52, %v8837_v9  ;;  %v2367_v48 = vpop.f32.mrb[1].mxu0 }
 0x28d   : > { %v2565_v6 = vadd.f32 %v8837_v9, %v2367_v48 }
 0x28e   : > { %v2598_v26 = vmax.f32 %v2566_v53, 0.0 }
 0x28f   : > { %v2597_v28 = vmax.f32 %v2565_v6, 0.0 }
 0x290   : > { %2670 = vst [vmem:[#allocation2 + $0x21] sm:$0xff] %v2598_v26 }
 0x291   : > { %2669 = vst [vmem:[#allocation2 + $0x19] sm:$0xff] %v2597_v28  ;;  %v6963_v28 = vpack.c.bf16 %v3797_v14, %v3796_v5 }
 0x293   : > { %v6548_v23 = vpop.f32.mrb[2].mxu0 }
 0x294   : > { %v2568_v25 = vadd.f32 %v6548_v23, %v8837_v9  ;;  %v2377_v8 = vpop.f32.mrb[3].mxu0 }
 0x295   : > { %v2567_v51 = vadd.f32 %v8837_v9, %v2377_v8 }
 0x296   : > { %v2600_v11 = vmax.f32 %v2568_v25, 0.0 }
 0x297   : > { %v2599_v12 = vmax.f32 %v2567_v51, 0.0  ;;  %v3437_v38 = vld [vmem:[#allocation2 + $0x28] sm:$0xff] }
 0x298   : > { %2672 = vst [vmem:[#allocation2 + $0x39] sm:$0xff] %v2600_v11  ;;  %v3435_v15 = vld [vmem:[#allocation2 + $0x18] sm:$0xff]  ;;  %v3436_v61 = vld [vmem:[#allocation2 + $0x20] sm:$0xff]  ;;  %v3534_v37 = vrot.slane %v3437_v38, 1  ;;  %v3646_v54 = vrot.slane %v3437_v38, 2  ;;  %v6967_v11 = vpack.c.bf16 %v3799_v27, %v3798_v10 }
 0x299   : > { %2671 = vst [vmem:[#allocation2 + $0x31] sm:$0xff] %v2599_v12  ;;  %v3531_v22 = vrot.slane %v3435_v15, 1  ;;  %v3532_v13 = vrot.slane %v3436_v61, 1  ;;  %v3643_v18 = vrot.slane %v3435_v15, 2  ;;  %v3644_v19 = vrot.slane %v3436_v61, 2  ;;  %v8886_v12 = vpop.f32.mrb[0].mxu1 }
 0x29a   : > { %10204 = vst [vmem:[#allocation9_spill] sm:$0xff] %v8886_v12 }
 0x29b   : > { %v6551_v33 = vpop.f32.mrb[4].mxu0  ;;  %v3533_v58 = vsel %vm3161_vm6, %v3531_v22, %v3532_v13  ;;  %v8845_v32 = vsel %vm3274_vm7, %v3643_v18, %v3644_v19  ;;  %v8849_v40 = vsel %vm3274_vm7, %v3644_v19, %v3646_v54  ;;  %v3535_v34 = vsel %vm3161_vm6, %v3532_v13, %v3534_v37  ;;  %v3800_v13 = vld [vmem:[#allocation3 + $0x2e0] sm:$0xff]  ;;  %v3801_v18 = vld [vmem:[#allocation3 + $0x2e8] sm:$0xff] }
 0x29c   : > { %v2570_v41 = vadd.f32 %v6551_v33, %v8837_v9  ;;  %v2387_v62 = vpop.f32.mrb[5].mxu0  ;;  %3868 = vmatprep.mubr.f32.mxu1 %v3533_v58  ;;  %4328 = vmatprep.mubr.f32.mxu0 %v3533_v58  ;;  %v6971_v4 = vpack.c.bf16 %v3801_v18, %v3800_v13 }
 0x29d   : > { %v2569_v29 = vadd.f32 %v8837_v9, %v2387_v62  ;;  %3869 = vmatmul.mubr.f32.vlgmr.msra.gmra.mrb[32].mxu1 %v3435_v15  ;;  %4329 = vmatmul.mubr.f32.gmra.mrb[36].mxu0 %v3435_v15  ;;  %v8890_v15 = vpop.f32.mrb[1].mxu1 }
 0x29e   : > { %v2602_v31 = vmax.f32 %v2570_v41, 0.0  ;;  %6950 = vmatpush3.bf16.msra.mxu1 %v8814_v42  ;;  %3873 = vmatprep.mubr.f32.mxu1 %v3535_v34  ;;  %10205 = vst [vmem:[#allocation10_spill] sm:$0xff] %v8890_v15  ;;  %v8901_v19 = vpop.f32.mrb[2].mxu1 }
 0x29f   : > { %v2601_v21 = vmax.f32 %v2569_v29, 0.0  ;;  %4333 = vmatprep.mubr.f32.mxu0 %v3535_v34  ;;  %v8854_v55 = vld [vmem:[#allocation2 + $0x40] sm:$0xff]  ;;  %6952 = vmatprep.subr.bf16.mxu1 %v6951_v57  ;;  %10206 = vst [vmem:[#allocation11_spill] sm:$0xff] %v8901_v19 }
 0x2a0   : > { %2674 = vst [vmem:[#allocation2 + $0x51] sm:$0xff] %v2602_v31  ;;  %v8856_v44 = vld [vmem:[#allocation2 + $0x30] sm:$0xff]  ;;  %v8858_v24 = vld [vmem:[#allocation2 + $0x38] sm:$0xff]  ;;  %v3539_v42 = vrot.slane %v8854_v55, 1 }
 0x2a1   : > { %2673 = vst [vmem:[#allocation2 + $0x49] sm:$0xff] %v2601_v21  ;;  %3874 = vmatmul.mubr.f32.gmra.mrb[34].mxu1 %v3436_v61  ;;  %4334 = vmatmul.mubr.f32.gmra.mrb[38].mxu0 %v3436_v61  ;;  %v3536_v0 = vrot.slane %v8856_v44, 1  ;;  %v3537_v63 = vrot.slane %v8858_v24, 1 }
 0x2a2   : > { %6954 = vmatpush3.bf16.msra.mxu1 %v6951_v57  ;;  %v8904_v57 = vpop.f32.mrb[3].mxu1 }
 0x2a3   : > { %v6554_v45 = vpop.f32.mrb[6].mxu0  ;;  %v3538_v16 = vsel %vm3161_vm6, %v3536_v0, %v3537_v63  ;;  %6956 = vmatprep.subr.bf16.mxu1 %v6955_v56  ;;  %v3540_v17 = vsel %vm3161_vm6, %v3537_v63, %v3539_v42  ;;  %10207 = vst [vmem:[#allocation12_spill] sm:$0xff] %v8904_v57  ;;  %v8911_v31 = vpop.f32.mrb[4].mxu1  ;;  %v3802_v0 = vld [vmem:[#allocation3 + $0x2f0] sm:$0xff] }
 0x2a4   : > { %v2572_v59 = vadd.f32 %v6554_v45, %v8837_v9  ;;  %v2397_v60 = vpop.f32.mrb[7].mxu0  ;;  %3878 = vmatprep.mubr.f32.mxu1 %v3538_v16  ;;  %4338 = vmatprep.mubr.f32.mxu0 %v3538_v16  ;;  %10208 = vst [vmem:[#allocation13_spill] sm:$0xff] %v8911_v31  ;;  %v8915_v63 = vpop.f32.mrb[5].mxu1 }
 0x2a5   : > { %v2571_v50 = vadd.f32 %v8837_v9, %v2397_v60  ;;  %3879 = vmatmul.mubr.f32.gmra.mrb[36].mxu1 %v8856_v44  ;;  %4339 = vmatmul.mubr.f32.gmra.mrb[40].mxu0 %v8856_v44  ;;  %10209 = vst [vmem:[#allocation14_spill] sm:$0xff] %v8915_v63  ;;  %v8926_v60 = vpop.f32.mrb[6].mxu1 }
 0x2a6   : > { %v2604_v36 = vmax.f32 %v2572_v59, 0.0  ;;  %3883 = vmatprep.mubr.f32.mxu1 %v3540_v17  ;;  %4343 = vmatprep.mubr.f32.mxu0 %v3540_v17  ;;  %10210 = vst [vmem:[#allocation15_spill] sm:$0xff] %v8926_v60  ;;  %v6975_v17 = vpack.c.bf16 %v3803_v2, %v3802_v0  ;;  %v8929_v5 = vpop.f32.mrb[7].mxu1 }
 0x2a7   : > { %v2603_v46 = vmax.f32 %v2571_v50, 0.0  ;;  %v8869_v43 = vld [vmem:[#allocation2 + $0x58] sm:$0xff]  ;;  %6958 = vmatpush3.bf16.msra.mxu1 %v6955_v56  ;;  %10211 = vst [vmem:[#allocation16_spill] sm:$0xff] %v8929_v5 }
 0x2a8   : > { %2676 = vst [vmem:[#allocation2 + $0x69] sm:$0xff] %v2604_v36  ;;  %v8871_v52 = vld [vmem:[#allocation2 + $0x48] sm:$0xff]  ;;  %v8873_v47 = vld [vmem:[#allocation2 + $0x50] sm:$0xff]  ;;  %6960 = vmatprep.subr.bf16.mxu1 %v6959_v30  ;;  %v3544_v35 = vrot.slane %v8869_v43, 1 }
 0x2a9   : > { %2675 = vst [vmem:[#allocation2 + $0x61] sm:$0xff] %v2603_v46  ;;  %3884 = vmatmul.mubr.f32.gmra.mrb[38].mxu1 %v8858_v24  ;;  %4344 = vmatmul.mubr.f32.gmra.mrb[42].mxu0 %v8858_v24  ;;  %v3541_v53 = vrot.slane %v8871_v52, 1  ;;  %v3542_v48 = vrot.slane %v8873_v47, 1  ;;  %v3419_v36 = vld [vmem:[#allocation3 + $0x100] sm:$0xff]  ;;  %v3420_v46 = vld [vmem:[#allocation3 + $0x108] sm:$0xff] }
 0x2ab   : > { %v6557_v6 = vpop.f32.mrb[8].mxu0  ;;  %v3543_v26 = vsel %vm3161_vm6, %v3541_v53, %v3542_v48  ;;  %6962 = vmatpush3.bf16.msra.mxu1 %v6959_v30  ;;  %v3545_v8 = vsel %vm3161_vm6, %v3542_v48, %v3544_v35 }
 0x2ac   : > { %v2574_v7 = vadd.f32 %v6557_v6, %v8837_v9  ;;  %v2407_v23 = vpop.f32.mrb[9].mxu0  ;;  %3888 = vmatprep.mubr.f32.mxu1 %v3543_v26  ;;  %4348 = vmatprep.mubr.f32.mxu0 %v3543_v26  ;;  %v8936_v26 = vpack.c.bf16 %v3420_v46, %v3419_v36 }
 0x2ad   : > { %v2573_v25 = vadd.f32 %v8837_v9, %v2407_v23  ;;  %3889 = vmatmul.mubr.f32.gmra.mrb[40].mxu1 %v8871_v52  ;;  %4349 = vmatmul.mubr.f32.gmra.mrb[44].mxu0 %v8871_v52 }
 0x2ae   : > { %v2606_v51 = vmax.f32 %v2574_v7, 0.0  ;;  %3893 = vmatprep.mubr.f32.mxu1 %v3545_v8  ;;  %4353 = vmatprep.mubr.f32.mxu0 %v3545_v8 }
 0x2af   : > { %v2605_v38 = vmax.f32 %v2573_v25, 0.0  ;;  %v8888_v3 = vld [vmem:[#allocation2 + $0x70] sm:$0xff]  ;;  %6964 = vmatprep.subr.bf16.mxu1 %v6963_v28 }
 0x2b0   : > { %2678 = vst [vmem:[#allocation2 + $0x81] sm:$0xff] %v2606_v51  ;;  %v8892_v61 = vld [vmem:[#allocation2 + $0x60] sm:$0xff]  ;;  %v8894_v37 = vld [vmem:[#allocation2 + $0x68] sm:$0xff]  ;;  %6966 = vmatpush3.bf16.msra.mxu1 %v6963_v28  ;;  %v3549_v22 = vrot.slane %v8888_v3, 1  ;;  %v8938_v28 = vpop.f32.mrb[8].mxu1 }
 0x2b1   : > { %2677 = vst [vmem:[#allocation2 + $0x79] sm:$0xff] %v2605_v38  ;;  %3894 = vmatmul.mubr.f32.gmra.mrb[42].mxu1 %v8873_v47  ;;  %4354 = vmatmul.mubr.f32.gmra.mrb[46].mxu0 %v8873_v47  ;;  %v3546_v54 = vrot.slane %v8892_v61, 1  ;;  %v3547_v20 = vrot.slane %v8894_v37, 1  ;;  %10212 = vst [vmem:[#allocation17_spill] sm:$0xff] %v8938_v28  ;;  %v8942_v7 = vpop.f32.mrb[9].mxu1  ;;  %v4924_v63 = vrot.slane %v8894_v37, 2 }
 0x2b2   : > { %6968 = vmatprep.subr.bf16.mxu1 %v6967_v11  ;;  %10213 = vst [vmem:[#allocation19_spill] sm:$0xff] %v8942_v7  ;;  %v8954_v38 = vpop.f32.mrb[10].mxu1 }
 0x2b3   : > { %v6560_v33 = vpop.f32.mrb[10].mxu0  ;;  %v3548_v58 = vsel %vm3161_vm6, %v3546_v54, %v3547_v20  ;;  %v3550_v29 = vsel %vm3161_vm6, %v3547_v20, %v3549_v22  ;;  %10214 = vst [vmem:[#allocation20_spill] sm:$0xff] %v8954_v38  ;;  %v8957_v22 = vpop.f32.mrb[11].mxu1 }
 0x2b4   : > { %v2576_v41 = vadd.f32 %v6560_v33, %v8837_v9  ;;  %v2417_v62 = vpop.f32.mrb[11].mxu0  ;;  %3898 = vmatprep.mubr.f32.mxu1 %v3548_v58  ;;  %4358 = vmatprep.mubr.f32.mxu0 %v3548_v58  ;;  %10215 = vst [vmem:[#allocation21_spill] sm:$0xff] %v8957_v22 }
 0x2b5   : > { %v2575_v1 = vadd.f32 %v8837_v9, %v2417_v62  ;;  %3899 = vmatmul.mubr.f32.gmra.mrb[44].mxu1 %v8892_v61  ;;  %4359 = vmatmul.mubr.f32.gmra.mrb[48].mxu0 %v8892_v61  ;;  %v8964_v62 = vpop.f32.mrb[12].mxu1 }
 0x2b6   : > { %v2608_v34 = vmax.f32 %v2576_v41, 0.0  ;;  %3903 = vmatprep.mubr.f32.mxu1 %v3550_v29  ;;  %4363 = vmatprep.mubr.f32.mxu0 %v3550_v29  ;;  %10216 = vst [vmem:[#allocation18_spill] sm:$0xff] %v8964_v62  ;;  %v8968_v29 = vpop.f32.mrb[13].mxu1 }
 0x2b7   : > { %v2607_v21 = vmax.f32 %v2575_v1, 0.0  ;;  %v8913_v56 = vld [vmem:[#allocation2 + $0x88] sm:$0xff]  ;;  %6970 = vmatpush3.bf16.msra.mxu1 %v6967_v11  ;;  %10217 = vst [vmem:[#allocation22_spill] sm:$0xff] %v8968_v29 }
 0x2b8   : > { %2680 = vst [vmem:[#allocation2 + $0x99] sm:$0xff] %v2608_v34  ;;  %v8917_v42 = vld [vmem:[#allocation2 + $0x78] sm:$0xff]  ;;  %v8919_v49 = vld [vmem:[#allocation2 + $0x80] sm:$0xff]  ;;  %6972 = vmatprep.subr.bf16.mxu1 %v6971_v4  ;;  %v3554_v59 = vrot.slane %v8913_v56, 1 }
 0x2b9   : > { %2679 = vst [vmem:[#allocation2 + $0x91] sm:$0xff] %v2607_v21  ;;  %3904 = vmatmul.mubr.f32.gmra.mrb[46].mxu1 %v8894_v37  ;;  %4364 = vmatmul.mubr.f32.gmra.mrb[50].mxu0 %v8894_v37  ;;  %v3551_v45 = vrot.slane %v8917_v42, 1  ;;  %v3552_v16 = vrot.slane %v8919_v49, 1  ;;  %v4929_v37 = vrot.slane %v8919_v49, 2 }
 0x2bb   : > { %v6563_v30 = vpop.f32.mrb[12].mxu0  ;;  %v3553_v50 = vsel %vm3161_vm6, %v3551_v45, %v3552_v16  ;;  %6974 = vmatpush3.bf16.msra.mxu1 %v6971_v4  ;;  %v3555_v35 = vsel %vm3161_vm6, %v3552_v16, %v3554_v59  ;;  %v8979_v16 = vpop.f32.mrb[14].mxu1 }
 0x2bc   : > { %v2578_v14 = vadd.f32 %v6563_v30, %v8837_v9  ;;  %v2427_v53 = vpop.f32.mrb[13].mxu0  ;;  %3908 = vmatprep.mubr.f32.mxu1 %v3553_v50  ;;  %4368 = vmatprep.mubr.f32.mxu0 %v3553_v50  ;;  %10218 = vst [vmem:[#allocation23_spill] sm:$0xff] %v8979_v16  ;;  %v8982_v50 = vpop.f32.mrb[15].mxu1 }
 0x2bd   : > { %v2577_v48 = vadd.f32 %v8837_v9, %v2427_v53  ;;  %3909 = vmatmul.mubr.f32.gmra.mrb[48].mxu1 %v8917_v42  ;;  %4369 = vmatmul.mubr.f32.gmra.mrb[52].mxu0 %v8917_v42  ;;  %10219 = vst [vmem:[#allocation24_spill] sm:$0xff] %v8982_v50 }
 0x2be   : > { %v2610_v6 = vmax.f32 %v2578_v14, 0.0  ;;  %3913 = vmatprep.mubr.f32.mxu1 %v3555_v35  ;;  %4373 = vmatprep.mubr.f32.mxu0 %v3555_v35  ;;  %v6619_v35 = vpop.f32.mrb[16].mxu1 }
 0x2bf   : > { %v2609_v10 = vmax.f32 %v2577_v48, 0.0  ;;  %v8940_v27 = vld [vmem:[#allocation2 + $0xa0] sm:$0xff]  ;;  %6976 = vmatprep.subr.bf16.mxu1 %v6975_v17 }
 0x2c0   : > { %2682 = vst [vmem:[#allocation2 + $0xb1] sm:$0xff] %v2610_v6  ;;  %v8944_v23 = vld [vmem:[#allocation2 + $0x90] sm:$0xff]  ;;  %v8946_v25 = vld [vmem:[#allocation2 + $0x98] sm:$0xff]  ;;  %6978 = vmatpush3.bf16.msra.mxu1 %v6975_v17  ;;  %v3559_v11 = vrot.slane %v8940_v27, 1  ;;  %v8992_v48 = vld [vmem:[%s10137_s6] ss:$0 sm:$0xff] }
 0x2c1   : > { %2681 = vst [vmem:[#allocation2 + $0xa9] sm:$0xff] %v2609_v10  ;;  %3914 = vmatmul.mubr.f32.gmra.mrb[50].mxu1 %v8919_v49  ;;  %4374 = vmatmul.mubr.f32.gmra.mrb[54].mxu0 %v8919_v49  ;;  %v3556_v8 = vrot.slane %v8944_v23, 1  ;;  %v3557_v51 = vrot.slane %v8946_v25, 1 }
 0x2c2   : > { %7028 = vmatprep.subr.bf16.mxu1 %v8936_v26 }
 0x2c3   : > { %v6566_v54 = vpop.f32.mrb[14].mxu0  ;;  %v3558_v20 = vsel %vm3161_vm6, %v3556_v8, %v3557_v51  ;;  %v3560_v58 = vsel %vm3161_vm6, %v3557_v51, %v3559_v11  ;;  %v8997_v8 = vadd.f32 %v6619_v35, %v8992_v48  ;;  %v2986_v51 = vpop.f32.mrb[17].mxu1 }
 0x2c4   : > { %v2580_v13 = vadd.f32 %v6566_v54, %v8837_v9  ;;  %v2437_v18 = vpop.f32.mrb[15].mxu0  ;;  %3918 = vmatprep.mubr.f32.mxu1 %v3558_v20  ;;  %4378 = vmatprep.mubr.f32.mxu0 %v3558_v20  ;;  %v9004_v20 = vadd.f32 %v8992_v48, %v2986_v51 }
 0x2c5   : > { %v2579_v33 = vadd.f32 %v8837_v9, %v2437_v18  ;;  %3919 = vmatmul.mubr.f32.gmra.mrb[52].mxu1 %v8944_v23  ;;  %4379 = vmatmul.mubr.f32.gmra.mrb[56].mxu0 %v8944_v23  ;;  %10220 = vst [vmem:[#allocation25_spill] sm:$0xff] %v8997_v8 }
 0x2c6   : > { %v2612_v41 = vmax.f32 %v2580_v13, 0.0  ;;  %3923 = vmatprep.mubr.f32.mxu1 %v3560_v58  ;;  %4383 = vmatprep.mubr.f32.mxu0 %v3560_v58  ;;  %10221 = vst [vmem:[#allocation26_spill] sm:$0xff] %v9004_v20  ;;  %v6622_v58 = vpop.f32.mrb[18].mxu1 }
 0x2c7   : > { %v2611_v4 = vmax.f32 %v2579_v33, 0.0  ;;  %v8966_v1 = vld [vmem:[#allocation2 + $0xb8] sm:$0xff] }
 0x2c8   : > { %2684 = vst [vmem:[#allocation2 + $0xc9] sm:$0xff] %v2612_v41  ;;  %v8970_v34 = vld [vmem:[#allocation2 + $0xa8] sm:$0xff]  ;;  %v8972_v21 = vld [vmem:[#allocation2 + $0xb0] sm:$0xff]  ;;  %v3564_v45 = vrot.slane %v8966_v1, 1 }
 0x2c9   : > { %2683 = vst [vmem:[#allocation2 + $0xc1] sm:$0xff] %v2611_v4  ;;  %3924 = vmatmul.mubr.f32.gmra.mrb[54].mxu1 %v8946_v25  ;;  %4384 = vmatmul.mubr.f32.gmra.mrb[58].mxu0 %v8946_v25  ;;  %v3561_v0 = vrot.slane %v8970_v34, 1  ;;  %v3562_v2 = vrot.slane %v8972_v21, 1 }
 0x2cb   : > { %v6569_v59 = vpop.f32.mrb[16].mxu0  ;;  %v3563_v30 = vsel %vm3161_vm6, %v3561_v0, %v3562_v2  ;;  %v3565_v14 = vsel %vm3161_vm6, %v3562_v2, %v3564_v45  ;;  %v2996_v0 = vpop.f32.mrb[19].mxu1 }
 0x2cc   : > { %v2582_v17 = vadd.f32 %v6569_v59, %v8837_v9  ;;  %v2447_v36 = vpop.f32.mrb[17].mxu0  ;;  %3928 = vmatprep.mubr.f32.mxu1 %v3563_v30  ;;  %4388 = vmatprep.mubr.f32.mxu0 %v3563_v30  ;;  %v9014_v59 = vadd.f32 %v6622_v58, %v8992_v48  ;;  %v9017_v30 = vadd.f32 %v8992_v48, %v2996_v0 }
 0x2cd   : > { %v2581_v46 = vadd.f32 %v8837_v9, %v2447_v36  ;;  %3929 = vmatmul.mubr.f32.gmra.mrb[56].mxu1 %v8970_v34  ;;  %4389 = vmatmul.mubr.f32.gmra.mrb[60].mxu0 %v8970_v34 }
 0x2ce   : > { %v2614_v53 = vmax.f32 %v2582_v17, 0.0  ;;  %3933 = vmatprep.mubr.f32.mxu1 %v3565_v14  ;;  %4393 = vmatprep.mubr.f32.mxu0 %v3565_v14  ;;  %10222 = vst [vmem:[#allocation27_spill] sm:$0xff] %v9014_v59  ;;  %10223 = vst [vmem:[#allocation28_spill] sm:$0xff] %v9017_v30  ;;  %v6625_v14 = vpop.f32.mrb[20].mxu1 }
 0x2cf   : > { %v2613_v6 = vmax.f32 %v2581_v46, 0.0  ;;  %v8994_v10 = vld [vmem:[#allocation2 + $0xd0] sm:$0xff]  ;;  %v3006_v51 = vpop.f32.mrb[21].mxu1 }
 0x2d0   : > { %2686 = vst [vmem:[#allocation2 + $0xe1] sm:$0xff] %v2614_v53  ;;  %v8999_v11 = vld [vmem:[#allocation2 + $0xc0] sm:$0xff]  ;;  %v9001_v54 = vld [vmem:[#allocation2 + $0xc8] sm:$0xff]  ;;  %v3569_v33 = vrot.slane %v8994_v10, 1  ;;  %v6628_v0 = vpop.f32.mrb[22].mxu1  ;;  %v7283_v15 = vld [vmem:[#allocation2 + $0xd0] sm:$0xff] }
 0x2d1   : > { %2685 = vst [vmem:[#allocation2 + $0xd9] sm:$0xff] %v2613_v6  ;;  %3934 = vmatmul.mubr.f32.gmra.mrb[58].mxu1 %v8972_v21  ;;  %4394 = vmatmul.mubr.f32.gmra.mrb[62].mxu0 %v8972_v21  ;;  %v3566_v13 = vrot.slane %v8999_v11, 1  ;;  %v3567_v18 = vrot.slane %v9001_v54, 1  ;;  %v9026_v6 = vadd.f32 %v6625_v14, %v8992_v48  ;;  %v7281_v19 = vld [vmem:[#allocation2 + $0xc0] sm:$0xff]  ;;  %v7282_v12 = vld [vmem:[#allocation2 + $0xc8] sm:$0xff] }
 0x2d2   : > { %v4831_v57 = vrot.slane %v7281_v19, 1 }
 0x2d3   : > { %v6572_v41 = vpop.f32.mrb[18].mxu0  ;;  %v3568_v4 = vsel %vm3161_vm6, %v3566_v13, %v3567_v18  ;;  %v3570_v36 = vsel %vm3161_vm6, %v3567_v18, %v3569_v33  ;;  %10224 = vst [vmem:[#allocation29_spill] sm:$0xff] %v9026_v6 }
 0x2d4   : > { %v2584_v2 = vadd.f32 %v6572_v41, %v8837_v9  ;;  %v2457_v45 = vpop.f32.mrb[19].mxu0  ;;  %3938 = vmatprep.mubr.f32.mxu1 %v3568_v4  ;;  %4398 = vmatprep.mubr.f32.mxu0 %v3568_v4  ;;  %v9033_v41 = vadd.f32 %v8992_v48, %v3006_v51 }
 0x2d5   : > { %v2583_v17 = vadd.f32 %v8837_v9, %v2457_v45  ;;  %3939 = vmatmul.mubr.f32.gmra.mrb[60].mxu1 %v8999_v11  ;;  %4399 = vmatmul.mubr.f32.gmra.mrb[64].mxu0 %v8999_v11  ;;  %v3016_v45 = vpop.f32.mrb[23].mxu1 }
 0x2d6   : > { %v2616_v46 = vmax.f32 %v2584_v2, 0.0  ;;  %3943 = vmatprep.mubr.f32.mxu1 %v3570_v36  ;;  %4403 = vmatprep.mubr.f32.mxu0 %v3570_v36  ;;  %10225 = vst [vmem:[#allocation30_spill] sm:$0xff] %v9033_v41  ;;  %v9041_v2 = vadd.f32 %v6628_v0, %v8992_v48 }
 0x2d7   : > { %v2615_v53 = vmax.f32 %v2583_v17, 0.0  ;;  %v9023_v35 = vld [vmem:[#allocation2 + $0xe8] sm:$0xff] }
 0x2d8   : > { %2688 = vst [vmem:[#allocation2 + $0xf9] sm:$0xff] %v2616_v46  ;;  %v9028_v13 = vld [vmem:[#allocation2 + $0xd8] sm:$0xff]  ;;  %v9030_v58 = vld [vmem:[#allocation2 + $0xe0] sm:$0xff]  ;;  %v3574_v4 = vrot.slane %v9023_v35, 1  ;;  %10226 = vst [vmem:[#allocation31_spill] sm:$0xff] %v9041_v2 }
 0x2d9   : > { %2687 = vst [vmem:[#allocation2 + $0xf1] sm:$0xff] %v2615_v53  ;;  %3944 = vmatmul.mubr.f32.gmra.mrb[62].mxu1 %v9001_v54  ;;  %4404 = vmatmul.mubr.f32.gmra.mrb[66].mxu0 %v9001_v54  ;;  %v3571_v18 = vrot.slane %v9028_v13, 1  ;;  %v3572_v33 = vrot.slane %v9030_v58, 1  ;;  %v9046_v53 = vadd.f32 %v8992_v48, %v3016_v45 }
 0x2db   : > { %v6575_v17 = vpop.f32.mrb[20].mxu0  ;;  %v3573_v36 = vsel %vm3161_vm6, %v3571_v18, %v3572_v33  ;;  %10227 = vst [vmem:[#allocation32_spill] sm:$0xff] %v9046_v53  ;;  %v3575_v0 = vsel %vm3161_vm6, %v3572_v33, %v3574_v4  ;;  %v6631_v18 = vpop.f32.mrb[24].mxu1 }
 0x2dc   : > { %v2586_v46 = vadd.f32 %v6575_v17, %v8837_v9  ;;  %v2467_v14 = vpop.f32.mrb[21].mxu0  ;;  %3948 = vmatprep.mubr.f32.mxu1 %v3573_v36  ;;  %4408 = vmatprep.mubr.f32.mxu0 %v3573_v36  ;;  %v9055_v36 = vadd.f32 %v6631_v18, %v8992_v48  ;;  %v3026_v45 = vpop.f32.mrb[25].mxu1 }
 0x2dd   : > { %v2585_v51 = vadd.f32 %v8837_v9, %v2467_v14  ;;  %3949 = vmatmul.mubr.f32.gmra.mrb[64].mxu1 %v9028_v13  ;;  %4409 = vmatmul.mubr.f32.gmra.mrb[68].mxu0 %v9028_v13  ;;  %v9062_v6 = vadd.f32 %v8992_v48, %v3026_v45 }
 0x2de   : > { %v2618_v39 = vmax.f32 %v2586_v46, 0.0  ;;  %3953 = vmatprep.mubr.f32.mxu1 %v3575_v0  ;;  %4413 = vmatprep.mubr.f32.mxu0 %v3575_v0  ;;  %10228 = vst [vmem:[#allocation33_spill] sm:$0xff] %v9055_v36 }
 0x2df   : > { %v2617_v2 = vmax.f32 %v2585_v51, 0.0  ;;  %v9052_v17 = vld [vmem:[#allocation2 + $0x100] sm:$0xff]  ;;  %10229 = vst [vmem:[#allocation34_spill] sm:$0xff] %v9062_v6  ;;  %v6634_v51 = vpop.f32.mrb[26].mxu1 }
 0x2e0   : > { %2690 = vst [vmem:[#allocation2 + $0x111] sm:$0xff] %v2618_v39  ;;  %v9057_v53 = vld [vmem:[#allocation2 + $0xf0] sm:$0xff]  ;;  %v9059_v14 = vld [vmem:[#allocation2 + $0xf8] sm:$0xff]  ;;  %v3579_v46 = vrot.slane %v9052_v17, 1  ;;  %v3036_v18 = vpop.f32.mrb[27].mxu1 }
 0x2e1   : > { %2689 = vst [vmem:[#allocation2 + $0x109] sm:$0xff] %v2617_v2  ;;  %3954 = vmatmul.mubr.f32.gmra.mrb[66].mxu1 %v9030_v58  ;;  %4414 = vmatmul.mubr.f32.gmra.mrb[70].mxu0 %v9030_v58  ;;  %v3576_v33 = vrot.slane %v9057_v53, 1  ;;  %v3577_v4 = vrot.slane %v9059_v14, 1  ;;  %v9072_v2 = vadd.f32 %v6634_v51, %v8992_v48  ;;  %v9075_v6 = vadd.f32 %v8992_v48, %v3036_v18 }
 0x2e3   : > { %v6578_v39 = vpop.f32.mrb[22].mxu0  ;;  %v3578_v0 = vsel %vm3161_vm6, %v3576_v33, %v3577_v4  ;;  %10230 = vst [vmem:[#allocation35_spill] sm:$0xff] %v9072_v2  ;;  %10231 = vst [vmem:[#allocation36_spill] sm:$0xff] %v9075_v6  ;;  %v3580_v33 = vsel %vm3161_vm6, %v3577_v4, %v3579_v46 }
 0x2e4   : > { %v2588_v36 = vadd.f32 %v6578_v39, %v8837_v9  ;;  %v2477_v45 = vpop.f32.mrb[23].mxu0  ;;  %3958 = vmatprep.mubr.f32.mxu1 %v3578_v0  ;;  %4418 = vmatprep.mubr.f32.mxu0 %v3578_v0  ;;  %v6637_v39 = vpop.f32.mrb[28].mxu1 }
 0x2e5   : > { %v2587_v41 = vadd.f32 %v8837_v9, %v2477_v45  ;;  %3959 = vmatmul.mubr.f32.gmra.mrb[68].mxu1 %v9057_v53  ;;  %4419 = vmatmul.mubr.f32.gmra.mrb[72].mxu0 %v9057_v53  ;;  %v9084_v51 = vadd.f32 %v6637_v39, %v8992_v48  ;;  %v3046_v18 = vpop.f32.mrb[29].mxu1 }
 0x2e6   : > { %v2620_v59 = vmax.f32 %v2588_v36, 0.0  ;;  %3963 = vmatprep.mubr.f32.mxu1 %v3580_v33  ;;  %4423 = vmatprep.mubr.f32.mxu0 %v3580_v33  ;;  %v9091_v6 = vadd.f32 %v8992_v48, %v3046_v18  ;;  %v6640_v46 = vpop.f32.mrb[30].mxu1 }
 0x2e7   : > { %v2619_v30 = vmax.f32 %v2587_v41, 0.0  ;;  %v9081_v0 = vld [vmem:[#allocation2 + $0x118] sm:$0xff]  ;;  %10232 = vst [vmem:[#allocation37_spill] sm:$0xff] %v9084_v51  ;;  %v3056_v39 = vpop.f32.mrb[31].mxu1 }
 0x2e8   : > { %2692 = vst [vmem:[#allocation2 + $0x129] sm:$0xff] %v2620_v59  ;;  %v9086_v2 = vld [vmem:[#allocation2 + $0x108] sm:$0xff]  ;;  %v9088_v45 = vld [vmem:[#allocation2 + $0x110] sm:$0xff]  ;;  %10233 = vst [vmem:[#allocation38_spill] sm:$0xff] %v9091_v6  ;;  %v3584_v4 = vrot.slane %v9081_v0, 1  ;;  %v9104_v6 = vadd.f32 %v8992_v48, %v3056_v39 }
 0x2e9   : > { %2691 = vst [vmem:[#allocation2 + $0x121] sm:$0xff] %v2619_v30  ;;  %3964 = vmatmul.mubr.f32.gmra.mrb[70].mxu1 %v9059_v14  ;;  %4424 = vmatmul.mubr.f32.gmra.mrb[74].mxu0 %v9059_v14  ;;  %v3581_v41 = vrot.slane %v9086_v2, 1  ;;  %v3582_v36 = vrot.slane %v9088_v45, 1  ;;  %v9101_v30 = vadd.f32 %v6640_v46, %v8992_v48 }
 0x2ea   : > { %10235 = vst [vmem:[#allocation40_spill] sm:$0xff] %v9104_v6 }
 0x2eb   : > { %v6581_v59 = vpop.f32.mrb[24].mxu0  ;;  %v3583_v33 = vsel %vm3161_vm6, %v3581_v41, %v3582_v36  ;;  %10234 = vst [vmem:[#allocation39_spill] sm:$0xff] %v9101_v30  ;;  %v3585_v41 = vsel %vm3161_vm6, %v3582_v36, %v3584_v4 }
 0x2ec   : > { %v2590_v51 = vadd.f32 %v6581_v59, %v8837_v9  ;;  %v2487_v18 = vpop.f32.mrb[25].mxu0  ;;  %3968 = vmatprep.mubr.f32.mxu1 %v3583_v33  ;;  %4428 = vmatprep.mubr.f32.mxu0 %v3583_v33 }
 0x2ed   : > { %v2589_v8 = vadd.f32 %v8837_v9, %v2487_v18  ;;  %3969 = vmatmul.mubr.f32.gmra.mrb[72].mxu1 %v9086_v2  ;;  %4429 = vmatmul.mubr.f32.gmra.mrb[76].mxu0 %v9086_v2 }
 0x2ee   : > { %v2622_v20 = vmax.f32 %v2590_v51, 0.0  ;;  %3973 = vmatprep.mubr.f32.mxu1 %v3585_v41  ;;  %4433 = vmatprep.mubr.f32.mxu0 %v3585_v41 }
 0x2ef   : > { %v2621_v59 = vmax.f32 %v2589_v8, 0.0  ;;  %v9110_v16 = vld [vmem:[#allocation2 + $0x130] sm:$0xff] }
 0x2f0   : > { %2694 = vst [vmem:[#allocation2 + $0x141] sm:$0xff] %v2622_v20  ;;  %v9112_v46 = vld [vmem:[#allocation2 + $0x120] sm:$0xff]  ;;  %v9114_v33 = vld [vmem:[#allocation2 + $0x128] sm:$0xff]  ;;  %v3589_v51 = vrot.slane %v9110_v16, 1 }
 0x2f1   : > { %2693 = vst [vmem:[#allocation2 + $0x139] sm:$0xff] %v2621_v59  ;;  %3974 = vmatmul.mubr.f32.gmra.mrb[74].mxu1 %v9088_v45  ;;  %4434 = vmatmul.mubr.f32.gmra.mrb[78].mxu0 %v9088_v45  ;;  %v3586_v48 = vrot.slane %v9112_v46, 1  ;;  %v3587_v36 = vrot.slane %v9114_v33, 1 }
 0x2f3   : > { %v6584_v4 = vpop.f32.mrb[26].mxu0  ;;  %v3588_v8 = vsel %vm3161_vm6, %v3586_v48, %v3587_v36  ;;  %v3590_v41 = vsel %vm3161_vm6, %v3587_v36, %v3589_v51 }
 0x2f4   : > { %v2592_v20 = vadd.f32 %v6584_v4, %v8837_v9  ;;  %v2497_v39 = vpop.f32.mrb[27].mxu0  ;;  %3978 = vmatprep.mubr.f32.mxu1 %v3588_v8  ;;  %4438 = vmatprep.mubr.f32.mxu0 %v3588_v8 }
 0x2f5   : > { %v2591_v18 = vadd.f32 %v8837_v9, %v2497_v39  ;;  %3979 = vmatmul.mubr.f32.gmra.mrb[76].mxu1 %v9112_v46  ;;  %4439 = vmatmul.mubr.f32.gmra.mrb[80].mxu0 %v9112_v46 }
 0x2f6   : > { %v2624_v59 = vmax.f32 %v2592_v20, 0.0  ;;  %3983 = vmatprep.mubr.f32.mxu1 %v3590_v41  ;;  %4443 = vmatprep.mubr.f32.mxu0 %v3590_v41 }
 0x2f7   : > { %v2623_v30 = vmax.f32 %v2591_v18, 0.0  ;;  %v9127_v6 = vld [vmem:[#allocation2 + $0x148] sm:$0xff] }
 0x2f8   : > { %2696 = vst [vmem:[#allocation2 + $0x159] sm:$0xff] %v2624_v59  ;;  %v9129_v48 = vld [vmem:[#allocation2 + $0x138] sm:$0xff]  ;;  %v9131_v4 = vld [vmem:[#allocation2 + $0x140] sm:$0xff]  ;;  %v3594_v51 = vrot.slane %v9127_v6, 1 }
 0x2f9   : > { %2695 = vst [vmem:[#allocation2 + $0x151] sm:$0xff] %v2623_v30  ;;  %3984 = vmatmul.mubr.f32.gmra.mrb[78].mxu1 %v9114_v33  ;;  %4444 = vmatmul.mubr.f32.gmra.mrb[82].mxu0 %v9114_v33  ;;  %v3591_v8 = vrot.slane %v9129_v48, 1  ;;  %v3592_v36 = vrot.slane %v9131_v4, 1 }
 0x2fb   : > { %v6587_v20 = vpop.f32.mrb[28].mxu0  ;;  %v3593_v39 = vsel %vm3161_vm6, %v3591_v8, %v3592_v36  ;;  %v3595_v59 = vsel %vm3161_vm6, %v3592_v36, %v3594_v51 }
 0x2fc   : > { %v2594_v18 = vadd.f32 %v6587_v20, %v8837_v9  ;;  %v2507_v41 = vpop.f32.mrb[29].mxu0  ;;  %3988 = vmatprep.mubr.f32.mxu1 %v3593_v39  ;;  %4448 = vmatprep.mubr.f32.mxu0 %v3593_v39 }
 0x2fd   : > { %v2593_v30 = vadd.f32 %v8837_v9, %v2507_v41  ;;  %3989 = vmatmul.mubr.f32.gmra.mrb[80].mxu1 %v9129_v48  ;;  %4449 = vmatmul.mubr.f32.gmra.mrb[84].mxu0 %v9129_v48 }
 0x2fe   : > { %v2626_v50 = vmax.f32 %v2594_v18, 0.0  ;;  %3993 = vmatprep.mubr.f32.mxu1 %v3595_v59  ;;  %4453 = vmatprep.mubr.f32.mxu0 %v3595_v59 }
 0x2ff   : > { %v2625_v62 = vmax.f32 %v2593_v30, 0.0  ;;  %v9144_v29 = vld [vmem:[#allocation2 + $0x160] sm:$0xff] }
 0x300   : > { %2698 = vst [vmem:[#allocation2 + $0x171] sm:$0xff] %v2626_v50  ;;  %v9146_v8 = vld [vmem:[#allocation2 + $0x150] sm:$0xff]  ;;  %v9148_v20 = vld [vmem:[#allocation2 + $0x158] sm:$0xff]  ;;  %v3599_v51 = vrot.slane %v9144_v29, 1 }
 0x301   : > { %2697 = vst [vmem:[#allocation2 + $0x169] sm:$0xff] %v2625_v62  ;;  %3994 = vmatmul.mubr.f32.gmra.mrb[82].mxu1 %v9131_v4  ;;  %4454 = vmatmul.mubr.f32.gmra.mrb[86].mxu0 %v9131_v4  ;;  %v3596_v39 = vrot.slane %v9146_v8, 1  ;;  %v3597_v36 = vrot.slane %v9148_v20, 1 }
 0x303   : > { %v6590_v18 = vpop.f32.mrb[30].mxu0  ;;  %v3598_v41 = vsel %vm3161_vm6, %v3596_v39, %v3597_v36  ;;  %v3600_v59 = vsel %vm3161_vm6, %v3597_v36, %v3599_v51 }
 0x304   : > { %v2596_v50 = vadd.f32 %v6590_v18, %v8837_v9  ;;  %v2517_v30 = vpop.f32.mrb[31].mxu0  ;;  %3998 = vmatprep.mubr.f32.mxu1 %v3598_v41  ;;  %4458 = vmatprep.mubr.f32.mxu0 %v3598_v41 }
 0x305   : > { %v2595_v62 = vadd.f32 %v8837_v9, %v2517_v30  ;;  %3999 = vmatmul.mubr.f32.gmra.mrb[84].mxu1 %v9146_v8  ;;  %4459 = vmatmul.mubr.f32.gmra.mrb[88].mxu0 %v9146_v8 }
 0x306   : > { %v2628_v38 = vmax.f32 %v2596_v50, 0.0  ;;  %4003 = vmatprep.mubr.f32.mxu1 %v3600_v59  ;;  %4463 = vmatprep.mubr.f32.mxu0 %v3600_v59 }
 0x307   : > { %v2627_v22 = vmax.f32 %v2595_v62, 0.0  ;;  %v9161_v28 = vld [vmem:[#allocation2 + $0x178] sm:$0xff]  ;;  %v9163_v39 = vpop.f32.mrb[32].mxu0 }
 0x308   : > { %2700 = vst [vmem:[#allocation2 + $0x189] sm:$0xff] %v2628_v38  ;;  %v9165_v18 = vld [vmem:[#allocation2 + $0x168] sm:$0xff]  ;;  %v9167_v41 = vld [vmem:[#allocation2 + $0x170] sm:$0xff]  ;;  %v4322_v9 = vpop.f32.mrb[33].mxu0  ;;  %v3604_v50 = vrot.slane %v9161_v28, 1  ;;  %v4913_v38 = vrot.slane %v8856_v44, 2 }
 0x309   : > { %2699 = vst [vmem:[#allocation2 + $0x181] sm:$0xff] %v2627_v22  ;;  %4004 = vmatmul.mubr.f32.gmra.mrb[86].mxu1 %v9148_v20  ;;  %4464 = vmatmul.mubr.f32.gmra.mrb[90].mxu0 %v9148_v20  ;;  %v3601_v36 = vrot.slane %v9165_v18, 1  ;;  %v3602_v51 = vrot.slane %v9167_v41, 1  ;;  %v4914_v22 = vrot.slane %v8858_v24, 2  ;;  %v4916_v44 = vrot.slane %v8854_v55, 2 }
 0x30a   : > { %v4918_v24 = vrot.slane %v8871_v52, 2  ;;  %v4921_v52 = vrot.slane %v8869_v43, 2  ;;  %v4926_v43 = vrot.slane %v8888_v3, 2 }
 0x30b   : > { %v3603_v30 = vsel %vm3161_vm6, %v3601_v36, %v3602_v51  ;;  %v9175_v62 = vpop.f32.mrb[34].mxu0  ;;  %v3605_v9 = vsel %vm3161_vm6, %v3602_v51, %v3604_v50  ;;  %v9185_v36 = vsel %vm3274_vm7, %v4913_v38, %v4914_v22  ;;  %v4919_v38 = vrot.slane %v8873_v47, 2 }
 0x30c   : > { %4008 = vmatprep.mubr.f32.mxu1 %v3603_v30  ;;  %4468 = vmatprep.mubr.f32.mxu0 %v3603_v30  ;;  %v4327_v59 = vpop.f32.mrb[35].mxu0  ;;  %v9202_v55 = vsel %vm3274_vm7, %v4914_v22, %v4916_v44  ;;  %v4923_v47 = vrot.slane %v8892_v61, 2  ;;  %v3421_v44 = vld [vmem:[#allocation3 + $0x110] sm:$0xff]  ;;  %v4928_v61 = vrot.slane %v8917_v42, 2  ;;  %v9228_v3 = vsel %vm3274_vm7, %v4924_v63, %v4926_v43  ;;  %v3426_v43 = vld [vmem:[#allocation3 + $0x138] sm:$0xff] }
 0x30d   : > { %4009 = vmatmul.mubr.f32.gmra.mrb[88].mxu1 %v9165_v18  ;;  %4469 = vmatmul.mubr.f32.gmra.mrb[92].mxu0 %v9165_v18  ;;  %v9209_v31 = vsel %vm3274_vm7, %v4918_v24, %v4919_v38  ;;  %v9215_v22 = vsel %vm3274_vm7, %v4919_v38, %v4921_v52  ;;  %v4934_v38 = vrot.slane %v8946_v25, 2  ;;  %v3424_v52 = vld [vmem:[#allocation3 + $0x128] sm:$0xff]  ;;  %v4939_v25 = vrot.slane %v8972_v21, 2 }
 0x30e   : > { %4013 = vmatprep.mubr.f32.mxu1 %v3605_v9  ;;  %4473 = vmatprep.mubr.f32.mxu0 %v3605_v9  ;;  %v9221_v24 = vsel %vm3274_vm7, %v4923_v47, %v4924_v63  ;;  %v9238_v42 = vsel %vm3274_vm7, %v4928_v61, %v4929_v37  ;;  %v4936_v63 = vrot.slane %v8940_v27, 2  ;;  %v3425_v47 = vld [vmem:[#allocation3 + $0x130] sm:$0xff]  ;;  %v4943_v21 = vrot.slane %v8999_v11, 2 }
 0x30f   : > { %v9182_v7 = vld [vmem:[#allocation2 + $0x190] sm:$0xff]  ;;  %v4944_v61 = vrot.slane %v9001_v54, 2  ;;  %v4948_v54 = vrot.slane %v9028_v13, 2 }
 0x310   : > { %v9187_v60 = vld [vmem:[#allocation2 + $0x180] sm:$0xff]  ;;  %v9189_v30 = vld [vmem:[#allocation2 + $0x188] sm:$0xff]  ;;  %v3609_v59 = vrot.slane %v9182_v7, 1  ;;  %v9255_v27 = vsel %vm3274_vm7, %v4934_v38, %v4936_v63  ;;  %v4951_v63 = vrot.slane %v9023_v35, 2 }
 0x311   : > { %4014 = vmatmul.mubr.f32.gmra.mrb[90].mxu1 %v9167_v41  ;;  %4474 = vmatmul.mubr.f32.gmra.mrb[94].mxu0 %v9167_v41  ;;  %v3606_v51 = vrot.slane %v9187_v60, 1  ;;  %v3607_v50 = vrot.slane %v9189_v30, 1  ;;  %v9274_v11 = vsel %vm3274_vm7, %v4943_v21, %v4944_v61  ;;  %v3433_v21 = vld [vmem:[#allocation3 + $0x170] sm:$0xff] }
 0x312   : > { %6833 = vmatprep.mubr.f32.mxu0 %v9185_v36 }
 0x313   : > { %v3608_v9 = vsel %vm3161_vm6, %v3606_v51, %v3607_v50  ;;  %v3610_v5 = vsel %vm3161_vm6, %v3607_v50, %v3609_v59  ;;  %v3422_v51 = vld [vmem:[#allocation3 + $0x118] sm:$0xff]  ;;  %v4931_v50 = vrot.slane %v8913_v56, 2  ;;  %v4933_v59 = vrot.slane %v8944_v23, 2 }
 0x314   : > { %4018 = vmatprep.mubr.f32.mxu1 %v3608_v9  ;;  %v3423_v9 = vld [vmem:[#allocation3 + $0x120] sm:$0xff]  ;;  %v4938_v23 = vrot.slane %v8970_v34, 2 }
 0x315   : > { %4019 = vmatmul.mubr.f32.gmra.mrb[92].mxu1 %v9187_v60  ;;  %6834 = vmatmul.mubr.f32.vlgmr.msra.gmra.mrb[96].mxu0 %v9202_v55  ;;  %v9242_v56 = vsel %vm3274_vm7, %v4929_v37, %v4931_v50  ;;  %v7035_v49 = vpack.c.bf16 %v3424_v52, %v3423_v9  ;;  %v3427_v37 = vld [vmem:[#allocation3 + $0x140] sm:$0xff]  ;;  %v4946_v50 = vrot.slane %v8994_v10, 2  ;;  %v3429_v9 = vld [vmem:[#allocation3 + $0x150] sm:$0xff]  ;;  %v3430_v52 = vld [vmem:[#allocation3 + $0x158] sm:$0xff] }
 0x316   : > { %4023 = vmatprep.mubr.f32.mxu1 %v3610_v5  ;;  %6836 = vmatprep.mubr.f32.mxu0 %v9209_v31  ;;  %v7031_v5 = vpack.c.bf16 %v3422_v51, %v3421_v44  ;;  %v4941_v44 = vrot.slane %v8966_v1, 2  ;;  %v7039_v51 = vpack.c.bf16 %v3426_v43, %v3425_v47  ;;  %v9261_v34 = vsel %vm3274_vm7, %v4938_v23, %v4939_v25  ;;  %v3432_v47 = vld [vmem:[#allocation3 + $0x168] sm:$0xff] }
 0x317   : > { %v9281_v10 = vsel %vm3274_vm7, %v4944_v61, %v4946_v50  ;;  %v4954_v23 = vrot.slane %v9059_v14, 2  ;;  %v4956_v43 = vrot.slane %v9052_v17, 2  ;;  %v4958_v14 = vrot.slane %v9086_v2, 2  ;;  %v3434_v61 = vld [vmem:[#allocation3 + $0x178] sm:$0xff] }
 0x318   : > { %v9268_v1 = vsel %vm3274_vm7, %v4939_v25, %v4941_v44  ;;  %v3431_v25 = vld [vmem:[#allocation3 + $0x160] sm:$0xff]  ;;  %v4964_v50 = vrot.slane %v9114_v33, 2  ;;  %v4969_v33 = vrot.slane %v9131_v4, 2  ;;  %v4973_v4 = vrot.slane %v9146_v8, 2 }
 0x319   : > { %4024 = vmatmul.mubr.f32.gmra.mrb[94].mxu1 %v9189_v30  ;;  %6837 = vmatmul.mubr.f32.gmra.mrb[98].mxu0 %v9215_v22  ;;  %v7051_v44 = vpack.c.bf16 %v3432_v47, %v3431_v25  ;;  %v9307_v17 = vsel %vm3274_vm7, %v4954_v23, %v4956_v43  ;;  %v4978_v8 = vrot.slane %v9165_v18, 2  ;;  %v4983_v18 = vrot.slane %v9187_v60, 2  ;;  %v5026_v43 = vld [vmem:[#allocation3 + $0x300] sm:$0xff] }
 0x31a   : > { %6673 = vmatprep.mubr.f32.mxu1 %v8845_v32  ;;  %6839 = vmatprep.mubr.f32.mxu0 %v9221_v24 }
 0x31d   : > { %6674 = vmatmul.mubr.f32.vlgmr.msra.gmra.mrb[96].mxu1 %v8849_v40  ;;  %6840 = vmatmul.mubr.f32.gmra.mrb[100].mxu0 %v9228_v3 }
 0x31e   : > { %7030 = vmatpush3.bf16.msra.mxu1 %v8936_v26  ;;  %6676 = vmatprep.mubr.f32.mxu1 %v9185_v36  ;;  %v9248_v26 = vsel %vm3274_vm7, %v4933_v59, %v4934_v38  ;;  %v4949_v38 = vrot.slane %v9030_v58, 2  ;;  %v4953_v58 = vrot.slane %v9057_v53, 2 }
 0x31f   : > { %6842 = vmatprep.mubr.f32.mxu0 %v9238_v42  ;;  %7032 = vmatprep.subr.bf16.mxu1 %v7031_v5 }
 0x320   : > { %v9287_v13 = vsel %vm3274_vm7, %v4948_v54, %v4949_v38  ;;  %v9294_v35 = vsel %vm3274_vm7, %v4949_v38, %v4951_v63  ;;  %v9300_v53 = vsel %vm3274_vm7, %v4953_v58, %v4954_v23 }
 0x321   : > { %6677 = vmatmul.mubr.f32.gmra.mrb[98].mxu1 %v9202_v55  ;;  %6843 = vmatmul.mubr.f32.gmra.mrb[102].mxu0 %v9242_v56 }
 0x322   : > { %6679 = vmatprep.mubr.f32.mxu1 %v9209_v31  ;;  %6845 = vmatprep.mubr.f32.mxu0 %v9248_v26 }
 0x323   : > { %7034 = vmatpush3.bf16.msra.mxu1 %v7031_v5  ;;  %v3428_v5 = vld [vmem:[#allocation3 + $0x148] sm:$0xff] }
 0x324   : > { %7036 = vmatprep.subr.bf16.mxu1 %v7035_v49  ;;  %v7043_v59 = vpack.c.bf16 %v3428_v5, %v3427_v37  ;;  %v4961_v37 = vrot.slane %v9081_v0, 2  ;;  %v7055_v5 = vpack.c.bf16 %v3434_v61, %v3433_v21  ;;  %v5028_v21 = vld [vmem:[#allocation3 + $0x310] sm:$0xff]  ;;  %v5029_v61 = vld [vmem:[#allocation3 + $0x318] sm:$0xff] }
 0x325   : > { %6680 = vmatmul.mubr.f32.gmra.mrb[100].mxu1 %v9215_v22  ;;  %6846 = vmatmul.mubr.f32.gmra.mrb[104].mxu0 %v9255_v27 }
 0x326   : > { %6682 = vmatprep.mubr.f32.mxu1 %v9221_v24  ;;  %6848 = vmatprep.mubr.f32.mxu0 %v9261_v34 }
 0x327   : > { %7038 = vmatpush3.bf16.msra.mxu1 %v7035_v49  ;;  %v7047_v49 = vpack.c.bf16 %v3430_v52, %v3429_v9  ;;  %v10236_v9 = vmov 0.0|0.0   ;;  %v4974_v52 = vrot.slane %v9148_v20, 2  ;;  %v4979_v20 = vrot.slane %v9167_v41, 2 }
 0x328   : > { %7040 = vmatprep.subr.bf16.mxu1 %v7039_v51  ;;  %v4984_v41 = vrot.slane %v9189_v30, 2 }
 0x329   : > { %6683 = vmatmul.mubr.f32.gmra.mrb[102].mxu1 %v9228_v3  ;;  %6849 = vmatmul.mubr.f32.gmra.mrb[106].mxu0 %v9268_v1  ;;  %v9366_v23 = vsel %vm3274_vm7, %v4978_v8, %v4979_v20 }
 0x32a   : > { %6685 = vmatprep.mubr.f32.mxu1 %v9238_v42  ;;  %6851 = vmatprep.mubr.f32.mxu0 %v9274_v11  ;;  %v4985_v47 = vsel %vm3274_vm7, %v4983_v18, %v4984_v41 }
 0x32b   : > { %7042 = vmatpush3.bf16.msra.mxu1 %v7039_v51  ;;  %v4959_v51 = vrot.slane %v9088_v45, 2  ;;  %v4963_v45 = vrot.slane %v9112_v46, 2  ;;  %v4968_v46 = vrot.slane %v9129_v48, 2 }
 0x32c   : > { %7044 = vmatprep.subr.bf16.mxu1 %v7043_v59 }
 0x32d   : > { %6686 = vmatmul.mubr.f32.gmra.mrb[104].mxu1 %v9242_v56  ;;  %6852 = vmatmul.mubr.f32.gmra.mrb[108].mxu0 %v9281_v10  ;;  %v9313_v2 = vsel %vm3274_vm7, %v4958_v14, %v4959_v51  ;;  %v9320_v0 = vsel %vm3274_vm7, %v4959_v51, %v4961_v37  ;;  %v9326_v54 = vsel %vm3274_vm7, %v4963_v45, %v4964_v50  ;;  %v5031_v45 = vld [vmem:[#allocation3 + $0x328] sm:$0xff] }
 0x32e   : > { %6688 = vmatprep.mubr.f32.mxu1 %v9248_v26  ;;  %6854 = vmatprep.mubr.f32.mxu0 %v9287_v13  ;;  %v9340_v48 = vsel %vm3274_vm7, %v4968_v46, %v4969_v33  ;;  %v7063_v37 = vpack.c.bf16 %v5029_v61, %v5028_v21  ;;  %v5033_v46 = vld [vmem:[#allocation3 + $0x338] sm:$0xff] }
 0x32f   : > { %7046 = vmatpush3.bf16.msra.mxu1 %v7043_v59  ;;  %v4966_v59 = vrot.slane %v9110_v16, 2  ;;  %v4971_v16 = vrot.slane %v9127_v6, 2  ;;  %v4976_v6 = vrot.slane %v9144_v29, 2  ;;  %v4981_v29 = vrot.slane %v9161_v28, 2 }
 0x330   : > { %7048 = vmatprep.subr.bf16.mxu1 %v7047_v49  ;;  %v4986_v28 = vrot.slane %v9182_v7, 2  ;;  %v9385_v7 = vld [vmem:[#allocation2] sm:$0xff] }
 0x331   : > { %6689 = vmatmul.mubr.f32.gmra.mrb[106].mxu1 %v9255_v27  ;;  %6855 = vmatmul.mubr.f32.gmra.mrb[110].mxu0 %v9294_v35  ;;  %v9333_v38 = vsel %vm3274_vm7, %v4964_v50, %v4966_v59  ;;  %v9347_v63 = vsel %vm3274_vm7, %v4969_v33, %v4971_v16  ;;  %v9360_v58 = vsel %vm3274_vm7, %v4974_v52, %v4976_v6  ;;  %v9388_v30 = vrot.slane %v9385_v7, 2  ;;  %v5032_v59 = vld [vmem:[#allocation3 + $0x330] sm:$0xff]  ;;  %v5034_v33 = vld [vmem:[#allocation3 + $0x340] sm:$0xff]  ;;  %v5035_v16 = vld [vmem:[#allocation3 + $0x348] sm:$0xff] }
 0x332   : > { %6691 = vmatprep.mubr.f32.mxu1 %v9261_v34  ;;  %6857 = vmatprep.mubr.f32.mxu0 %v9300_v53  ;;  %v9373_v25 = vsel %vm3274_vm7, %v4979_v20, %v4981_v29  ;;  %v4987_v60 = vsel %vm3274_vm7, %v4984_v41, %v4986_v28  ;;  %v5041_v20 = vld [vmem:[#allocation3 + $0x378] sm:$0xff] }
 0x333   : > { %7050 = vmatpush3.bf16.msra.mxu1 %v7047_v49  ;;  %v9353_v49 = vsel %vm3274_vm7, %v4973_v4, %v4974_v52  ;;  %v3279_v14 = vsel %vm3274_vm7, %v9388_v30, %v9388_v30  ;;  %v5037_v4 = vld [vmem:[#allocation3 + $0x358] sm:$0xff]  ;;  %v5039_v52 = vld [vmem:[#allocation3 + $0x368] sm:$0xff] }
 0x334   : > { %7052 = vmatprep.subr.bf16.mxu1 %v7051_v44 }
 0x335   : > { %6692 = vmatmul.mubr.f32.gmra.mrb[108].mxu1 %v9268_v1  ;;  %6858 = vmatmul.mubr.f32.gmra.mrb[112].mxu0 %v9307_v17 }
 0x336   : > { %6694 = vmatprep.mubr.f32.mxu1 %v9274_v11  ;;  %6860 = vmatprep.mubr.f32.mxu0 %v9313_v2 }
 0x337   : > { %7054 = vmatpush3.bf16.msra.mxu1 %v7051_v44  ;;  %v5027_v44 = vld [vmem:[#allocation3 + $0x308] sm:$0xff] }
 0x338   : > { %7056 = vmatprep.subr.bf16.mxu1 %v7055_v5  ;;  %v7060_v51 = vpack.c.bf16 %v5027_v44, %v5026_v43 }
 0x339   : > { %6695 = vmatmul.mubr.f32.gmra.mrb[110].mxu1 %v9281_v10  ;;  %6861 = vmatmul.mubr.f32.gmra.mrb[114].mxu0 %v9320_v0 }
 0x33a   : > { %6697 = vmatprep.mubr.f32.mxu1 %v9287_v13  ;;  %6863 = vmatprep.mubr.f32.mxu0 %v9326_v54 }
 0x33b   : > { %7058 = vmatpush3.bf16.msra.mxu1 %v7055_v5  ;;  %v5030_v5 = vld [vmem:[#allocation3 + $0x320] sm:$0xff] }
 0x33c   : > { %7059 = vmatprep.subr.bf16.mxu1 %v10236_v9  ;;  %v7066_v50 = vpack.c.bf16 %v5031_v45, %v5030_v5  ;;  %v5047_v45 = vld [vmem:[#allocation3 + $0x3a8] sm:$0xff] }
 0x33d   : > { %6698 = vmatmul.mubr.f32.gmra.mrb[112].mxu1 %v9294_v35  ;;  %6864 = vmatmul.mubr.f32.gmra.mrb[116].mxu0 %v9333_v38 }
 0x33e   : > { %6700 = vmatprep.mubr.f32.mxu1 %v9300_v53  ;;  %6866 = vmatprep.mubr.f32.mxu0 %v9340_v48 }
 0x341   : > { %6701 = vmatmul.mubr.f32.gmra.mrb[114].mxu1 %v9307_v17  ;;  %6867 = vmatmul.mubr.f32.gmra.mrb[118].mxu0 %v9347_v63 }
 0x342   : > { %6703 = vmatprep.mubr.f32.mxu1 %v9313_v2  ;;  %6869 = vmatprep.mubr.f32.mxu0 %v9353_v49 }
 0x345   : > { %6704 = vmatmul.mubr.f32.gmra.mrb[116].mxu1 %v9320_v0  ;;  %6870 = vmatmul.mubr.f32.gmra.mrb[120].mxu0 %v9360_v58 }
 0x346   : > { %6706 = vmatprep.mubr.f32.mxu1 %v9326_v54  ;;  %6872 = vmatprep.mubr.f32.mxu0 %v9366_v23 }
 0x349   : > { %6707 = vmatmul.mubr.f32.gmra.mrb[118].mxu1 %v9333_v38  ;;  %6873 = vmatmul.mubr.f32.gmra.mrb[122].mxu0 %v9373_v25 }
 0x34a   : > { %6709 = vmatprep.mubr.f32.mxu1 %v9340_v48  ;;  %6875 = vmatprep.mubr.f32.mxu0 %v4985_v47 }
 0x34d   : > { %6710 = vmatmul.mubr.f32.gmra.mrb[120].mxu1 %v9347_v63  ;;  %6876 = vmatmul.mubr.f32.gmra.mrb[124].mxu0 %v4987_v60 }
 0x34e   : > { %6712 = vmatprep.mubr.f32.mxu1 %v9353_v49  ;;  %6878 = vmatprep.mubr.f32.mxu0 %v9388_v30 }
 0x351   : > { %6713 = vmatmul.mubr.f32.gmra.mrb[122].mxu1 %v9360_v58  ;;  %6879 = vmatmul.mubr.f32.gmra.mrb[126].mxu0 %v9388_v30 }
 0x352   : > { %6715 = vmatprep.mubr.f32.mxu1 %v9366_v23 }
 0x355   : > { %6716 = vmatmul.mubr.f32.gmra.mrb[124].mxu1 %v9373_v25 }
 0x356   : > { %6718 = vmatprep.mubr.f32.mxu1 %v4985_v47  ;;  %v5043_v47 = vld [vmem:[#allocation3 + $0x388] sm:$0xff] }
 0x359   : > { %6719 = vmatmul.mubr.f32.gmra.mrb[126].mxu1 %v4987_v60 }
 0x35a   : > { %6753 = vmatprep.mubr.f32.mxu1 %v9388_v30 }
 0x35d   : > { %6754 = vmatmul.mubr.f32.vlgmr.msra.gmra.mrb[128].mxu1 %v3279_v14 }
 0x35e   : > { %7061 = vmatpush1.bf16.msra.mxu1 %v7060_v51  ;;  %6756 = vmatprep.mubr.f32.mxu1 %v8845_v32  ;;  %v7069_v32 = vpack.c.bf16 %v5033_v46, %v5032_v59  ;;  %v5045_v51 = vld [vmem:[#allocation3 + $0x398] sm:$0xff] }
 0x35f   : > { %7062 = vmatprep.subr.bf16.mxu1 %v10236_v9 }
 0x361   : > { %6757 = vmatmul.mubr.f32.gmra.mrb[130].mxu1 %v8849_v40  ;;  %v7072_v40 = vpack.c.bf16 %v5035_v16, %v5034_v33  ;;  %v5049_v33 = vld [vmem:[#allocation3 + $0x3b8] sm:$0xff] }
 0x362   : > { %7064 = vmatpush1.bf16.msra.mxu1 %v7063_v37  ;;  %6759 = vmatprep.mubr.f32.mxu1 %v9185_v36  ;;  %v5036_v36 = vld [vmem:[#allocation3 + $0x350] sm:$0xff] }
 0x363   : > { %7065 = vmatprep.subr.bf16.mxu1 %v10236_v9 }
 0x365   : > { %6760 = vmatmul.mubr.f32.gmra.mrb[132].mxu1 %v9202_v55  ;;  %v5038_v55 = vld [vmem:[#allocation3 + $0x360] sm:$0xff] }
 0x366   : > { %7067 = vmatpush1.bf16.msra.mxu1 %v7066_v50  ;;  %6762 = vmatprep.mubr.f32.mxu1 %v9209_v31  ;;  %v7075_v31 = vpack.c.bf16 %v5037_v4, %v5036_v36 }
 0x367   : > { %7068 = vmatprep.subr.bf16.mxu1 %v10236_v9 }
 0x369   : > { %6763 = vmatmul.mubr.f32.gmra.mrb[134].mxu1 %v9215_v22 }
 0x36a   : > { %7070 = vmatpush1.bf16.msra.mxu1 %v7069_v32  ;;  %6765 = vmatprep.mubr.f32.mxu1 %v9221_v24 }
 0x36b   : > { %7071 = vmatprep.subr.bf16.mxu1 %v10236_v9 }
 0x36d   : > { %6766 = vmatmul.mubr.f32.gmra.mrb[136].mxu1 %v9228_v3  ;;  %v7078_v3 = vpack.c.bf16 %v5039_v52, %v5038_v55 }
 0x36e   : > { %7073 = vmatpush1.bf16.msra.mxu1 %v7072_v40  ;;  %6768 = vmatprep.mubr.f32.mxu1 %v9238_v42  ;;  %v5040_v42 = vld [vmem:[#allocation3 + $0x370] sm:$0xff] }
 0x36f   : > { %7074 = vmatprep.subr.bf16.mxu1 %v10236_v9 }
 0x370   : > { %v9409_v6 = vpop.f32.mrb[32].mxu1  ;;  %v9411_v22 = vpop.f32.mrb[36].mxu0 }
 0x371   : > { %v3872_v24 = vpop.f32.mrb[33].mxu1  ;;  %v4332_v8 = vpop.f32.mrb[37].mxu0  ;;  %6769 = vmatmul.mubr.f32.gmra.mrb[138].mxu1 %v9242_v56  ;;  %v7081_v56 = vpack.c.bf16 %v5041_v20, %v5040_v42 }
 0x372   : > { %7076 = vmatpush1.bf16.msra.mxu1 %v7075_v31  ;;  %6771 = vmatprep.mubr.f32.mxu1 %v9248_v26  ;;  %v5042_v26 = vld [vmem:[#allocation3 + $0x380] sm:$0xff]  ;;  %v5051_v31 = vld [vmem:[#allocation3 + $0x3c8] sm:$0xff] }
 0x373   : > { %7077 = vmatprep.subr.bf16.mxu1 %v10236_v9 }
 0x374   : > { %v9416_v29 = vpop.f32.mrb[34].mxu1  ;;  %v9418_v18 = vpop.f32.mrb[38].mxu0 }
 0x375   : > { %v3877_v41 = vpop.f32.mrb[35].mxu1  ;;  %v4337_v28 = vpop.f32.mrb[39].mxu0  ;;  %6772 = vmatmul.mubr.f32.gmra.mrb[140].mxu1 %v9255_v27  ;;  %v7084_v27 = vpack.c.bf16 %v5043_v47, %v5042_v26 }
 0x376   : > { %7079 = vmatpush1.bf16.msra.mxu1 %v7078_v3  ;;  %6774 = vmatprep.mubr.f32.mxu1 %v9261_v34  ;;  %v5044_v34 = vld [vmem:[#allocation3 + $0x390] sm:$0xff]  ;;  %v5053_v3 = vld [vmem:[#allocation3 + $0x3d8] sm:$0xff] }
 0x377   : > { %7080 = vmatprep.subr.bf16.mxu1 %v10236_v9 }
 0x378   : > { %v9423_v60 = vpop.f32.mrb[36].mxu1  ;;  %v9425_v43 = vpop.f32.mrb[40].mxu0 }
 0x379   : > { %v3882_v44 = vpop.f32.mrb[37].mxu1  ;;  %v4342_v14 = vpop.f32.mrb[41].mxu0  ;;  %6775 = vmatmul.mubr.f32.gmra.mrb[142].mxu1 %v9268_v1  ;;  %v7087_v1 = vpack.c.bf16 %v5045_v51, %v5044_v34 }
 0x37a   : > { %7082 = vmatpush1.bf16.msra.mxu1 %v7081_v56  ;;  %6777 = vmatprep.mubr.f32.mxu1 %v9274_v11  ;;  %v5046_v11 = vld [vmem:[#allocation3 + $0x3a0] sm:$0xff]  ;;  %v5055_v56 = vld [vmem:[#allocation3 + $0x3e8] sm:$0xff] }
 0x37b   : > { %7083 = vmatprep.subr.bf16.mxu1 %v10236_v9 }
 0x37c   : > { %v9430_v21 = vpop.f32.mrb[38].mxu1  ;;  %v9432_v61 = vpop.f32.mrb[42].mxu0 }
 0x37d   : > { %v3887_v37 = vpop.f32.mrb[39].mxu1  ;;  %v4347_v5 = vpop.f32.mrb[43].mxu0  ;;  %6778 = vmatmul.mubr.f32.gmra.mrb[144].mxu1 %v9281_v10  ;;  %v7090_v10 = vpack.c.bf16 %v5047_v45, %v5046_v11  ;;  %v7264_v45 = vld [vmem:[#allocation2 + $0x38] sm:$0xff] }
 0x37e   : > { %7085 = vmatpush1.bf16.msra.mxu1 %v7084_v27  ;;  %6780 = vmatprep.mubr.f32.mxu1 %v9287_v13  ;;  %v5048_v13 = vld [vmem:[#allocation3 + $0x3b0] sm:$0xff]  ;;  %v5057_v27 = vld [vmem:[#allocation3 + $0x3f8] sm:$0xff] }
 0x37f   : > { %7086 = vmatprep.subr.bf16.mxu1 %v10236_v9 }
 0x380   : > { %v9437_v50 = vpop.f32.mrb[40].mxu1  ;;  %v9439_v59 = vpop.f32.mrb[44].mxu0 }
 0x381   : > { %v3892_v46 = vpop.f32.mrb[41].mxu1  ;;  %v4352_v32 = vpop.f32.mrb[45].mxu0  ;;  %6781 = vmatmul.mubr.f32.gmra.mrb[146].mxu1 %v9294_v35  ;;  %v7093_v35 = vpack.c.bf16 %v5049_v33, %v5048_v13  ;;  %v7265_v33 = vld [vmem:[#allocation2 + $0x40] sm:$0xff] }
 0x382   : > { %7088 = vmatpush1.bf16.msra.mxu1 %v7087_v1  ;;  %6783 = vmatprep.mubr.f32.mxu1 %v9300_v53  ;;  %v5050_v53 = vld [vmem:[#allocation3 + $0x3c0] sm:$0xff] }
 0x383   : > { %7089 = vmatprep.subr.bf16.mxu1 %v10236_v9  ;;  %v7263_v1 = vld [vmem:[#allocation2 + $0x30] sm:$0xff] }
 0x384   : > { %v9444_v16 = vpop.f32.mrb[42].mxu1  ;;  %v9446_v40 = vpop.f32.mrb[46].mxu0  ;;  %v4801_v11 = vrot.slane %v7263_v1, 1 }
 0x385   : > { %v3897_v36 = vpop.f32.mrb[43].mxu1  ;;  %v4357_v4 = vpop.f32.mrb[47].mxu0  ;;  %6784 = vmatmul.mubr.f32.gmra.mrb[148].mxu1 %v9307_v17  ;;  %v7096_v17 = vpack.c.bf16 %v5051_v31, %v5050_v53  ;;  %v7266_v53 = vld [vmem:[#allocation2 + $0x48] sm:$0xff] }
 0x386   : > { %7091 = vmatpush1.bf16.msra.mxu1 %v7090_v10  ;;  %6786 = vmatprep.mubr.f32.mxu1 %v9313_v2  ;;  %v5052_v2 = vld [vmem:[#allocation3 + $0x3d0] sm:$0xff]  ;;  %v4804_v36 = vrot.slane %v7265_v33, 1  ;;  %v4806_v31 = vrot.slane %v7266_v53, 1 }
 0x387   : > { %7092 = vmatprep.subr.bf16.mxu1 %v10236_v9 }
 0x388   : > { %v9451_v55 = vpop.f32.mrb[44].mxu1  ;;  %v9453_v52 = vpop.f32.mrb[48].mxu0 }
 0x389   : > { %v3902_v24 = vpop.f32.mrb[45].mxu1  ;;  %v4362_v8 = vpop.f32.mrb[49].mxu0  ;;  %6787 = vmatmul.mubr.f32.gmra.mrb[150].mxu1 %v9320_v0  ;;  %v7099_v0 = vpack.c.bf16 %v5053_v3, %v5052_v2 }
 0x38a   : > { %7094 = vmatpush1.bf16.msra.mxu1 %v7093_v35  ;;  %6789 = vmatprep.mubr.f32.mxu1 %v9326_v54  ;;  %v5054_v54 = vld [vmem:[#allocation3 + $0x3e0] sm:$0xff] }
 0x38b   : > { %7095 = vmatprep.subr.bf16.mxu1 %v10236_v9  ;;  %v7267_v24 = vld [vmem:[#allocation2 + $0x50] sm:$0xff] }
 0x38c   : > { %v9458_v42 = vpop.f32.mrb[46].mxu1  ;;  %v9460_v20 = vpop.f32.mrb[50].mxu0  ;;  %v4807_v8 = vrot.slane %v7267_v24, 1 }
 0x38d   : > { %v3907_v41 = vpop.f32.mrb[47].mxu1  ;;  %v4367_v28 = vpop.f32.mrb[51].mxu0  ;;  %6790 = vmatmul.mubr.f32.gmra.mrb[152].mxu1 %v9333_v38  ;;  %v7102_v38 = vpack.c.bf16 %v5055_v56, %v5054_v54 }
 0x38e   : > { %7097 = vmatpush1.bf16.msra.mxu1 %v7096_v17  ;;  %6792 = vmatprep.mubr.f32.mxu1 %v9340_v48  ;;  %v5056_v48 = vld [vmem:[#allocation3 + $0x3f0] sm:$0xff]  ;;  %v4808_v41 = vsel %vm3161_vm6, %v4806_v31, %v4807_v8  ;;  %v7268_v28 = vld [vmem:[#allocation2 + $0x58] sm:$0xff] }
 0x38f   : > { %7098 = vmatprep.subr.bf16.mxu1 %v10236_v9  ;;  %v7273_v31 = vld [vmem:[#allocation2 + $0x80] sm:$0xff] }
 0x390   : > { %v9465_v26 = vpop.f32.mrb[48].mxu1  ;;  %v9467_v47 = vpop.f32.mrb[52].mxu0 }
 0x391   : > { %v3912_v44 = vpop.f32.mrb[49].mxu1  ;;  %v4372_v14 = vpop.f32.mrb[53].mxu0  ;;  %6793 = vmatmul.mubr.f32.gmra.mrb[154].mxu1 %v9347_v63  ;;  %v4802_v63 = vrot.slane %v7264_v45, 1 }
 0x392   : > { %7100 = vmatpush1.bf16.msra.mxu1 %v7099_v0  ;;  %6795 = vmatprep.mubr.f32.mxu1 %v9353_v49  ;;  %v7105_v49 = vpack.c.bf16 %v5057_v27, %v5056_v48  ;;  %v4809_v0 = vrot.slane %v7268_v28, 1  ;;  %v7269_v48 = vld [vmem:[#allocation2 + $0x60] sm:$0xff] }
 0x393   : > { %7101 = vmatprep.subr.bf16.mxu1 %v10236_v9  ;;  %v4803_v13 = vsel %vm3161_vm6, %v4801_v11, %v4802_v63  ;;  %v4805_v35 = vsel %vm3161_vm6, %v4802_v63, %v4804_v36  ;;  %v4811_v27 = vrot.slane %v7269_v48, 1 }
 0x394   : > { %v9472_v34 = vpop.f32.mrb[50].mxu1  ;;  %v9474_v51 = vpop.f32.mrb[54].mxu0 }
 0x395   : > { %v3917_v37 = vpop.f32.mrb[51].mxu1  ;;  %v4377_v5 = vpop.f32.mrb[55].mxu0  ;;  %6796 = vmatmul.mubr.f32.gmra.mrb[156].mxu1 %v9360_v58 }
 0x396   : > { %7103 = vmatpush1.bf16.msra.mxu1 %v7102_v38  ;;  %6798 = vmatprep.mubr.f32.mxu1 %v9366_v23  ;;  %v4810_v38 = vsel %vm3161_vm6, %v4807_v8, %v4809_v0  ;;  %v7270_v37 = vld [vmem:[#allocation2 + $0x68] sm:$0xff]  ;;  %v4817_v8 = vrot.slane %v7273_v31, 1 }
 0x397   : > { %7104 = vmatprep.subr.bf16.mxu1 %v10236_v9  ;;  %v4812_v5 = vrot.slane %v7270_v37, 1  ;;  %v7274_v0 = vld [vmem:[#allocation2 + $0x88] sm:$0xff] }
 0x398   : > { %v9481_v46 = vpop.f32.mrb[52].mxu1  ;;  %v9483_v32 = vpop.f32.mrb[56].mxu0 }
 0x399   : > { %v3922_v10 = vpop.f32.mrb[53].mxu1  ;;  %v4382_v58 = vpop.f32.mrb[57].mxu0  ;;  %6799 = vmatmul.mubr.f32.gmra.mrb[158].mxu1 %v9373_v25 }
 0x39a   : > { %7106 = vmatpush1.bf16.msra.mxu1 %v7105_v49  ;;  %5138 = vmatprep.mubr.f32.mxu1 %v4803_v13  ;;  %v4813_v49 = vsel %vm3161_vm6, %v4811_v27, %v4812_v5  ;;  %v7271_v10 = vld [vmem:[#allocation2 + $0x70] sm:$0xff] }
 0x39b   : > { %v4814_v58 = vrot.slane %v7271_v10, 1 }
 0x39c   : > { %v9487_v23 = vpop.f32.mrb[54].mxu1  ;;  %v9489_v4 = vpop.f32.mrb[58].mxu0 }
 0x39d   : > { %v3927_v9 = vpop.f32.mrb[55].mxu1  ;;  %v4387_v30 = vpop.f32.mrb[59].mxu0  ;;  %5139 = vmatmul.mubr.f32.vlgmr.msra.gmra.mrb[160].mxu1 %v7263_v1 }
 0x39e   : > { %5143 = vmatprep.mubr.f32.mxu1 %v4805_v35  ;;  %v4815_v30 = vsel %vm3161_vm6, %v4812_v5, %v4814_v58  ;;  %v7272_v35 = vld [vmem:[#allocation2 + $0x78] sm:$0xff] }
 0x3a0   : > { %v9492_v25 = vpop.f32.mrb[56].mxu1  ;;  %v9494_v17 = vpop.f32.mrb[60].mxu0 }
 0x3a1   : > { %v3932_v2 = vpop.f32.mrb[57].mxu1  ;;  %v4392_v3 = vpop.f32.mrb[61].mxu0  ;;  %5144 = vmatmul.mubr.f32.gmra.mrb[162].mxu1 %v7264_v45 }
 0x3a2   : > { %5148 = vmatprep.mubr.f32.mxu1 %v4808_v41 }
 0x3a4   : > { %v9497_v54 = vpop.f32.mrb[58].mxu1  ;;  %v9499_v56 = vpop.f32.mrb[62].mxu0 }
 0x3a5   : > { %v3937_v44 = vpop.f32.mrb[59].mxu1  ;;  %v4397_v14 = vpop.f32.mrb[63].mxu0  ;;  %5149 = vmatmul.mubr.f32.gmra.mrb[164].mxu1 %v7266_v53  ;;  %v4816_v53 = vrot.slane %v7272_v35, 1 }
 0x3a6   : > { %5153 = vmatprep.mubr.f32.mxu1 %v4810_v38  ;;  %v4819_v44 = vrot.slane %v7274_v0, 1 }
 0x3a7   : > { %v4818_v28 = vsel %vm3161_vm6, %v4816_v53, %v4817_v8  ;;  %v7277_v53 = vld [vmem:[#allocation2 + $0xa0] sm:$0xff] }
 0x3a8   : > { %v9502_v1 = vpop.f32.mrb[60].mxu1  ;;  %v9504_v11 = vpop.f32.mrb[64].mxu0  ;;  %v4820_v5 = vsel %vm3161_vm6, %v4817_v8, %v4819_v44  ;;  %v7278_v44 = vld [vmem:[#allocation2 + $0xa8] sm:$0xff] }
 0x3a9   : > { %v3942_v45 = vpop.f32.mrb[61].mxu1  ;;  %v4402_v63 = vpop.f32.mrb[65].mxu0  ;;  %5154 = vmatmul.mubr.f32.gmra.mrb[166].mxu1 %v7267_v24 }
 0x3aa   : > { %5158 = vmatprep.mubr.f32.mxu1 %v4813_v49  ;;  %v7275_v45 = vld [vmem:[#allocation2 + $0x90] sm:$0xff]  ;;  %v7276_v49 = vld [vmem:[#allocation2 + $0x98] sm:$0xff] }
 0x3ab   : > { %v4821_v63 = vrot.slane %v7275_v45, 1  ;;  %v4822_v10 = vrot.slane %v7276_v49, 1 }
 0x3ac   : > { %v9507_v13 = vpop.f32.mrb[62].mxu1  ;;  %v9509_v33 = vpop.f32.mrb[66].mxu0 }
 0x3ad   : > { %v3947_v36 = vpop.f32.mrb[63].mxu1  ;;  %v4407_v9 = vpop.f32.mrb[67].mxu0  ;;  %5159 = vmatmul.mubr.f32.gmra.mrb[168].mxu1 %v7269_v48 }
 0x3ae   : > { %5163 = vmatprep.mubr.f32.mxu1 %v4815_v30  ;;  %v4823_v30 = vsel %vm3161_vm6, %v4821_v63, %v4822_v10 }
 0x3b0   : > { %v9512_v24 = vpop.f32.mrb[64].mxu1  ;;  %v9514_v2 = vpop.f32.mrb[68].mxu0 }
 0x3b1   : > { %v3952_v3 = vpop.f32.mrb[65].mxu1  ;;  %v4412_v41 = vpop.f32.mrb[69].mxu0  ;;  %5164 = vmatmul.mubr.f32.gmra.mrb[170].mxu1 %v7270_v37 }
 0x3b2   : > { %5168 = vmatprep.mubr.f32.mxu1 %v4818_v28  ;;  %v4824_v3 = vrot.slane %v7277_v53, 1  ;;  %v7280_v53 = vld [vmem:[#allocation2 + $0xb8] sm:$0xff] }
 0x3b4   : > { %v9517_v14 = vpop.f32.mrb[66].mxu1  ;;  %v9519_v38 = vpop.f32.mrb[70].mxu0  ;;  %v4825_v0 = vsel %vm3161_vm6, %v4822_v10, %v4824_v3 }
 0x3b5   : > { %v3957_v48 = vpop.f32.mrb[67].mxu1  ;;  %v4417_v27 = vpop.f32.mrb[71].mxu0  ;;  %5169 = vmatmul.mubr.f32.gmra.mrb[172].mxu1 %v7272_v35 }
 0x3b6   : > { %5173 = vmatprep.mubr.f32.mxu1 %v4820_v5  ;;  %v4826_v48 = vrot.slane %v7278_v44, 1  ;;  %v7279_v27 = vld [vmem:[#allocation2 + $0xb0] sm:$0xff] }
 0x3b7   : > { %v4827_v5 = vrot.slane %v7279_v27, 1 }
 0x3b8   : > { %v9522_v37 = vpop.f32.mrb[68].mxu1  ;;  %v9524_v58 = vpop.f32.mrb[72].mxu0 }
 0x3b9   : > { %v3962_v36 = vpop.f32.mrb[69].mxu1  ;;  %v4422_v9 = vpop.f32.mrb[73].mxu0  ;;  %5174 = vmatmul.mubr.f32.gmra.mrb[174].mxu1 %v7273_v31 }
 0x3ba   : > { %5178 = vmatprep.mubr.f32.mxu1 %v4823_v30  ;;  %v4828_v30 = vsel %vm3161_vm6, %v4826_v48, %v4827_v5 }
 0x3bc   : > { %v9527_v35 = vpop.f32.mrb[70].mxu1  ;;  %v9529_v8 = vpop.f32.mrb[74].mxu0 }
 0x3bd   : > { %v3967_v41 = vpop.f32.mrb[71].mxu1  ;;  %v4427_v28 = vpop.f32.mrb[75].mxu0  ;;  %5179 = vmatmul.mubr.f32.gmra.mrb[176].mxu1 %v7275_v45 }
 0x3be   : > { %5183 = vmatprep.mubr.f32.mxu1 %v4825_v0  ;;  %v4829_v41 = vrot.slane %v7280_v53, 1 }
 0x3c0   : > { %v9532_v31 = vpop.f32.mrb[72].mxu1  ;;  %v9534_v63 = vpop.f32.mrb[76].mxu0  ;;  %v4830_v0 = vsel %vm3161_vm6, %v4827_v5, %v4829_v41 }
 0x3c1   : > { %10237 = vst [vmem:[#allocation41_spill] sm:$0xff] %v9534_v63  ;;  %v3972_v36 = vpop.f32.mrb[73].mxu1  ;;  %v4432_v9 = vpop.f32.mrb[77].mxu0  ;;  %5184 = vmatmul.mubr.f32.gmra.mrb[178].mxu1 %v7276_v49  ;;  %v7284_v63 = vld [vmem:[#allocation2 + $0xd8] sm:$0xff] }
 0x3c2   : > { %5188 = vmatprep.mubr.f32.mxu1 %v4828_v30  ;;  %v4832_v36 = vrot.slane %v7282_v12, 1 }
 0x3c4   : > { %v9537_v45 = vpop.f32.mrb[74].mxu1  ;;  %v9539_v10 = vpop.f32.mrb[78].mxu0  ;;  %v4833_v53 = vsel %vm3161_vm6, %v4831_v57, %v4832_v36 }
 0x3c5   : > { %10238 = vst [vmem:[#allocation42_spill] sm:$0xff] %v9539_v10  ;;  %v3977_v3 = vpop.f32.mrb[75].mxu1  ;;  %v4437_v28 = vpop.f32.mrb[79].mxu0  ;;  %5189 = vmatmul.mubr.f32.gmra.mrb[180].mxu1 %v7278_v44  ;;  %v4836_v10 = vrot.slane %v7284_v63, 1 }
 0x3c6   : > { %5193 = vmatprep.mubr.f32.mxu1 %v4830_v0  ;;  %v4834_v3 = vrot.slane %v7283_v15, 1 }
 0x3c8   : > { %v9542_v49 = vpop.f32.mrb[76].mxu1  ;;  %v9544_v48 = vpop.f32.mrb[80].mxu0  ;;  %v4835_v0 = vsel %vm3161_vm6, %v4832_v36, %v4834_v3 }
 0x3c9   : > { %10239 = vst [vmem:[#allocation43_spill] sm:$0xff] %v9542_v49  ;;  %10240 = vst [vmem:[#allocation44_spill] sm:$0xff] %v9544_v48  ;;  %v3982_v9 = vpop.f32.mrb[77].mxu1  ;;  %v4442_v30 = vpop.f32.mrb[81].mxu0  ;;  %5194 = vmatmul.mubr.f32.gmra.mrb[182].mxu1 %v7279_v27  ;;  %v7285_v48 = vld [vmem:[#allocation2 + $0xe0] sm:$0xff] }
 0x3ca   : > { %5198 = vmatprep.mubr.f32.mxu1 %v4833_v53  ;;  %v4837_v9 = vrot.slane %v7285_v48, 1 }
 0x3cc   : > { %v9547_v44 = vpop.f32.mrb[78].mxu1  ;;  %v9549_v5 = vpop.f32.mrb[82].mxu0  ;;  %v4838_v53 = vsel %vm3161_vm6, %v4836_v10, %v4837_v9 }
 0x3cd   : > { %10241 = vst [vmem:[#allocation45_spill] sm:$0xff] %v9549_v5  ;;  %v3987_v41 = vpop.f32.mrb[79].mxu1  ;;  %v4447_v28 = vpop.f32.mrb[83].mxu0  ;;  %5199 = vmatmul.mubr.f32.gmra.mrb[184].mxu1 %v7281_v19  ;;  %v7286_v5 = vld [vmem:[#allocation2 + $0xe8] sm:$0xff] }
 0x3ce   : > { %5203 = vmatprep.mubr.f32.mxu1 %v4835_v0  ;;  %v4839_v41 = vrot.slane %v7286_v5, 1 }
 0x3d0   : > { %v9552_v27 = vpop.f32.mrb[80].mxu1  ;;  %v9554_v57 = vpop.f32.mrb[84].mxu0  ;;  %v4840_v0 = vsel %vm3161_vm6, %v4837_v9, %v4839_v41 }
 0x3d1   : > { %10242 = vst [vmem:[#allocation46_spill] sm:$0xff] %v9552_v27  ;;  %10243 = vst [vmem:[#allocation47_spill] sm:$0xff] %v9554_v57  ;;  %v3992_v15 = vpop.f32.mrb[81].mxu1  ;;  %v4452_v30 = vpop.f32.mrb[85].mxu0  ;;  %5204 = vmatmul.mubr.f32.gmra.mrb[186].mxu1 %v7282_v12  ;;  %v7287_v27 = vld [vmem:[#allocation2 + $0xf0] sm:$0xff]  ;;  %v7288_v57 = vld [vmem:[#allocation2 + $0xf8] sm:$0xff] }
 0x3d2   : > { %5208 = vmatprep.mubr.f32.mxu1 %v4838_v53  ;;  %v4841_v49 = vrot.slane %v7287_v27, 1  ;;  %v4842_v15 = vrot.slane %v7288_v57, 1 }
 0x3d4   : > { %v9557_v19 = vpop.f32.mrb[82].mxu1  ;;  %v9559_v36 = vpop.f32.mrb[86].mxu0  ;;  %v4843_v53 = vsel %vm3161_vm6, %v4841_v49, %v4842_v15 }
 0x3d5   : > { %10244 = vst [vmem:[#allocation48_spill] sm:$0xff] %v9557_v19  ;;  %10245 = vst [vmem:[#allocation49_spill] sm:$0xff] %v9559_v36  ;;  %v3997_v3 = vpop.f32.mrb[83].mxu1  ;;  %v4457_v28 = vpop.f32.mrb[87].mxu0  ;;  %5209 = vmatmul.mubr.f32.gmra.mrb[188].mxu1 %v7284_v63  ;;  %v7289_v36 = vld [vmem:[#allocation2 + $0x100] sm:$0xff] }
 0x3d6   : > { %5213 = vmatprep.mubr.f32.mxu1 %v4840_v0  ;;  %v4844_v3 = vrot.slane %v7289_v36, 1 }
 0x3d8   : > { %v9562_v12 = vpop.f32.mrb[84].mxu1  ;;  %v9564_v10 = vpop.f32.mrb[88].mxu0  ;;  %v4845_v0 = vsel %vm3161_vm6, %v4842_v15, %v4844_v3 }
 0x3d9   : > { %10246 = vst [vmem:[#allocation50_spill] sm:$0xff] %v9562_v12  ;;  %10247 = vst [vmem:[#allocation51_spill] sm:$0xff] %v9564_v10  ;;  %v4002_v5 = vpop.f32.mrb[85].mxu1  ;;  %v4462_v30 = vpop.f32.mrb[89].mxu0  ;;  %5214 = vmatmul.mubr.f32.gmra.mrb[190].mxu1 %v7285_v48  ;;  %v7290_v12 = vld [vmem:[#allocation2 + $0x108] sm:$0xff]  ;;  %v7291_v10 = vld [vmem:[#allocation2 + $0x110] sm:$0xff] }
 0x3da   : > { %5218 = vmatprep.mubr.f32.mxu1 %v4843_v53  ;;  %v4846_v19 = vrot.slane %v7290_v12, 1  ;;  %v4847_v5 = vrot.slane %v7291_v10, 1 }
 0x3dc   : > { %v9567_v63 = vpop.f32.mrb[86].mxu1  ;;  %v9569_v9 = vpop.f32.mrb[90].mxu0  ;;  %v4848_v53 = vsel %vm3161_vm6, %v4846_v19, %v4847_v5 }
 0x3dd   : > { %10248 = vst [vmem:[#allocation52_spill] sm:$0xff] %v9567_v63  ;;  %10249 = vst [vmem:[#allocation53_spill] sm:$0xff] %v9569_v9  ;;  %v4007_v41 = vpop.f32.mrb[87].mxu1  ;;  %v4467_v28 = vpop.f32.mrb[91].mxu0  ;;  %5219 = vmatmul.mubr.f32.gmra.mrb[192].mxu1 %v7287_v27  ;;  %v7292_v9 = vld [vmem:[#allocation2 + $0x118] sm:$0xff] }
 0x3de   : > { %5223 = vmatprep.mubr.f32.mxu1 %v4845_v0  ;;  %v4849_v41 = vrot.slane %v7292_v9, 1 }
 0x3e0   : > { %v9572_v48 = vpop.f32.mrb[88].mxu1  ;;  %v9574_v49 = vpop.f32.mrb[92].mxu0  ;;  %v4850_v0 = vsel %vm3161_vm6, %v4847_v5, %v4849_v41 }
 0x3e1   : > { %10250 = vst [vmem:[#allocation54_spill] sm:$0xff] %v9572_v48  ;;  %10251 = vst [vmem:[#allocation55_spill] sm:$0xff] %v9574_v49  ;;  %v4012_v36 = vpop.f32.mrb[89].mxu1  ;;  %v4472_v30 = vpop.f32.mrb[93].mxu0  ;;  %5224 = vmatmul.mubr.f32.gmra.mrb[194].mxu1 %v7288_v57  ;;  %v7293_v48 = vld [vmem:[#allocation2 + $0x120] sm:$0xff]  ;;  %v7294_v49 = vld [vmem:[#allocation2 + $0x128] sm:$0xff] }
 0x3e2   : > { %5228 = vmatprep.mubr.f32.mxu1 %v4848_v53  ;;  %v4851_v63 = vrot.slane %v7293_v48, 1  ;;  %v4852_v36 = vrot.slane %v7294_v49, 1 }
 0x3e4   : > { %v9577_v27 = vpop.f32.mrb[90].mxu1  ;;  %v9579_v15 = vpop.f32.mrb[94].mxu0  ;;  %v4853_v53 = vsel %vm3161_vm6, %v4851_v63, %v4852_v36 }
 0x3e5   : > { %10252 = vst [vmem:[#allocation56_spill] sm:$0xff] %v9579_v15  ;;  %v4017_v3 = vpop.f32.mrb[91].mxu1  ;;  %v4477_v28 = vpop.f32.mrb[95].mxu0  ;;  %5229 = vmatmul.mubr.f32.gmra.mrb[196].mxu1 %v7290_v12 }
 0x3e6   : > { %5233 = vmatprep.mubr.f32.mxu1 %v4850_v0  ;;  %v7295_v3 = vld [vmem:[#allocation2 + $0x130] sm:$0xff] }
 0x3e7   : > { %v4854_v28 = vrot.slane %v7295_v3, 1 }
 0x3e8   : > { %v9582_v57 = vpop.f32.mrb[92].mxu1  ;;  %v9584_v19 = vpop.f32.mrb[96].mxu0 }
 0x3e9   : > { %10253 = vst [vmem:[#allocation57_spill] sm:$0xff] %v9582_v57  ;;  %10254 = vst [vmem:[#allocation58_spill] sm:$0xff] %v9584_v19  ;;  %v4022_v9 = vpop.f32.mrb[93].mxu1  ;;  %5234 = vmatmul.mubr.f32.gmra.mrb[198].mxu1 %v7291_v10  ;;  %v9586_v30 = vpop.f32.mrb[97].mxu0  ;;  %v4855_v15 = vsel %vm3161_vm6, %v4852_v36, %v4854_v28  ;;  %v7296_v19 = vld [vmem:[#allocation2 + $0x138] sm:$0xff]  ;;  %v7297_v10 = vld [vmem:[#allocation2 + $0x140] sm:$0xff] }
 0x3ea   : > { %10255 = vst [vmem:[#allocation59_spill] sm:$0xff] %v9586_v30  ;;  %5238 = vmatprep.mubr.f32.mxu1 %v4853_v53  ;;  %v4856_v9 = vrot.slane %v7296_v19, 1  ;;  %v4857_v57 = vrot.slane %v7297_v10, 1 }
 0x3ec   : > { %v9589_v12 = vpop.f32.mrb[94].mxu1  ;;  %v9591_v5 = vpop.f32.mrb[98].mxu0 }
 0x3ed   : > { %10256 = vst [vmem:[#allocation60_spill] sm:$0xff] %v9589_v12  ;;  %10257 = vst [vmem:[#allocation61_spill] sm:$0xff] %v9591_v5  ;;  %v4027_v41 = vpop.f32.mrb[95].mxu1  ;;  %5239 = vmatmul.mubr.f32.gmra.mrb[200].mxu1 %v7293_v48  ;;  %v9593_v0 = vpop.f32.mrb[99].mxu0  ;;  %v4858_v48 = vsel %vm3161_vm6, %v4856_v9, %v4857_v57 }
 0x3ee   : > { %10258 = vst [vmem:[#allocation62_spill] sm:$0xff] %v9593_v0  ;;  %5243 = vmatprep.mubr.f32.mxu1 %v4855_v15  ;;  %v7298_v41 = vld [vmem:[#allocation2 + $0x148] sm:$0xff] }
 0x3ef   : > { %v4859_v5 = vrot.slane %v7298_v41, 1  ;;  %v7299_v41 = vld [vmem:[#allocation2 + $0x150] sm:$0xff] }
 0x3f0   : > { %v6675_v30 = vpop.f32.mrb[96].mxu1  ;;  %v9596_v63 = vpop.f32.mrb[100].mxu0 }
 0x3f1   : > { %10259 = vst [vmem:[#allocation63_spill] sm:$0xff] %v9596_v63  ;;  %v4101_v53 = vadd.f32 %v6675_v30, %v9416_v29  ;;  %v4095_v3 = vpop.f32.mrb[97].mxu1  ;;  %5244 = vmatmul.mubr.f32.gmra.mrb[202].mxu1 %v7294_v49  ;;  %v9599_v12 = vpop.f32.mrb[101].mxu0  ;;  %v4860_v9 = vsel %vm3161_vm6, %v4857_v57, %v4859_v5 }
 0x3f2   : > { %v4096_v36 = vadd.f32 %v4095_v3, %v9409_v6  ;;  %5248 = vmatprep.mubr.f32.mxu1 %v4858_v48  ;;  %v4861_v6 = vrot.slane %v7299_v41, 1  ;;  %v7300_v3 = vld [vmem:[#allocation2 + $0x158] sm:$0xff] }
 0x3f3   : > { %v9604_v28 = vadd.f32 %v9175_v62, %v4101_v53  ;;  %v4862_v48 = vrot.slane %v7300_v3, 1 }
 0x3f4   : > { %v6678_v15 = vpop.f32.mrb[98].mxu1  ;;  %v9606_v0 = vpop.f32.mrb[102].mxu0  ;;  %v9609_v63 = vadd.f32 %v9163_v39, %v4096_v36 }
 0x3f5   : > { %10260 = vst [vmem:[#allocation64_spill] sm:$0xff] %v9606_v0  ;;  %v4111_v29 = vadd.f32 %v6678_v15, %v9430_v21  ;;  %v4105_v49 = vpop.f32.mrb[99].mxu1  ;;  %5249 = vmatmul.mubr.f32.gmra.mrb[204].mxu1 %v7296_v19  ;;  %v9612_v30 = vpop.f32.mrb[103].mxu0  ;;  %v4863_v5 = vsel %vm3161_vm6, %v4861_v6, %v4862_v48  ;;  %v7301_v0 = vld [vmem:[#allocation2 + $0x160] sm:$0xff]  ;;  %v7302_v6 = vld [vmem:[#allocation2 + $0x168] sm:$0xff] }
 0x3f6   : > { %v4106_v62 = vadd.f32 %v4105_v49, %v9423_v60  ;;  %5253 = vmatprep.mubr.f32.mxu1 %v4860_v9  ;;  %v4864_v60 = vrot.slane %v7301_v0, 1 }
 0x3f7   : > { %v9617_v53 = vadd.f32 %v9418_v18, %v4111_v29 }
 0x3f8   : > { %v6681_v39 = vpop.f32.mrb[100].mxu1  ;;  %v9619_v36 = vpop.f32.mrb[104].mxu0  ;;  %v9622_v21 = vadd.f32 %v9411_v22, %v4106_v62  ;;  %v4865_v0 = vsel %vm3161_vm6, %v4862_v48, %v4864_v60 }
 0x3f9   : > { %v4121_v19 = vadd.f32 %v6681_v39, %v9444_v16  ;;  %v4115_v15 = vpop.f32.mrb[101].mxu1  ;;  %5254 = vmatmul.mubr.f32.gmra.mrb[206].mxu1 %v7297_v10  ;;  %v9625_v57 = vpop.f32.mrb[105].mxu0  ;;  %v7303_v39 = vld [vmem:[#allocation2 + $0x170] sm:$0xff] }
 0x3fa   : > { %v4116_v49 = vadd.f32 %v4115_v15, %v9437_v50  ;;  %5258 = vmatprep.mubr.f32.mxu1 %v4863_v5  ;;  %v4866_v50 = vrot.slane %v7302_v6, 1  ;;  %v4867_v15 = vrot.slane %v7303_v39, 1 }
 0x3fb   : > { %v9630_v18 = vadd.f32 %v9432_v61, %v4121_v19 }
 0x3fc   : > { %v6684_v29 = vpop.f32.mrb[102].mxu1  ;;  %v9632_v9 = vpop.f32.mrb[106].mxu0  ;;  %v9635_v22 = vadd.f32 %v9425_v43, %v4116_v49  ;;  %v4868_v60 = vsel %vm3161_vm6, %v4866_v50, %v4867_v15 }
 0x3fd   : > { %v4131_v16 = vadd.f32 %v6684_v29, %v9458_v42  ;;  %v4125_v10 = vpop.f32.mrb[103].mxu1  ;;  %5259 = vmatmul.mubr.f32.gmra.mrb[208].mxu1 %v7299_v41  ;;  %v9638_v62 = vpop.f32.mrb[107].mxu0  ;;  %v7304_v29 = vld [vmem:[#allocation2 + $0x178] sm:$0xff] }
 0x3fe   : > { %v4126_v61 = vadd.f32 %v4125_v10, %v9451_v55  ;;  %5263 = vmatprep.mubr.f32.mxu1 %v4865_v0  ;;  %v4869_v55 = vrot.slane %v7304_v29, 1 }
 0x3ff   : > { %v9643_v19 = vadd.f32 %v9446_v40, %v4131_v16 }
 0x400   : > { %v6687_v43 = vpop.f32.mrb[104].mxu1  ;;  %v9645_v5 = vpop.f32.mrb[108].mxu0  ;;  %v9648_v42 = vadd.f32 %v9439_v59, %v4126_v61  ;;  %v4870_v50 = vsel %vm3161_vm6, %v4867_v15, %v4869_v55 }
 0x401   : > { %v4141_v41 = vadd.f32 %v6687_v43, %v9472_v34  ;;  %v4135_v49 = vpop.f32.mrb[105].mxu1  ;;  %5264 = vmatmul.mubr.f32.gmra.mrb[210].mxu1 %v7300_v3  ;;  %v9651_v48 = vpop.f32.mrb[109].mxu0  ;;  %v7305_v43 = vld [vmem:[#allocation2 + $0x180] sm:$0xff] }
 0x402   : > { %v4136_v10 = vadd.f32 %v4135_v49, %v9465_v26  ;;  %5268 = vmatprep.mubr.f32.mxu1 %v4868_v60  ;;  %v4871_v26 = vrot.slane %v7305_v43, 1  ;;  %v7306_v49 = vld [vmem:[#allocation2 + $0x188] sm:$0xff] }
 0x403   : > { %v9656_v40 = vadd.f32 %v9460_v20, %v4141_v41  ;;  %v4872_v60 = vrot.slane %v7306_v49, 1 }
 0x404   : > { %v6690_v16 = vpop.f32.mrb[106].mxu1  ;;  %v9658_v0 = vpop.f32.mrb[110].mxu0  ;;  %v9661_v59 = vadd.f32 %v9453_v52, %v4136_v10 }
 0x405   : > { %v4151_v34 = vadd.f32 %v6690_v16, %v9487_v23  ;;  %v4145_v3 = vpop.f32.mrb[107].mxu1  ;;  %5269 = vmatmul.mubr.f32.gmra.mrb[212].mxu1 %v7302_v6  ;;  %v9664_v61 = vpop.f32.mrb[111].mxu0  ;;  %v4873_v55 = vsel %vm3161_vm6, %v4871_v26, %v4872_v60  ;;  %v7307_v16 = vld [vmem:[#allocation2 + $0x190] sm:$0xff] }
 0x406   : > { %v4146_v20 = vadd.f32 %v4145_v3, %v9481_v46  ;;  %5273 = vmatprep.mubr.f32.mxu1 %v4870_v50  ;;  %v4874_v46 = vrot.slane %v7307_v16, 1 }
 0x407   : > { %v9669_v41 = vadd.f32 %v9474_v51, %v4151_v34  ;;  %v4876_v51 = vrot.slane %v9385_v7, 1 }
 0x408   : > { %v6693_v52 = vpop.f32.mrb[108].mxu1  ;;  %v9671_v29 = vpop.f32.mrb[112].mxu0  ;;  %v9674_v23 = vadd.f32 %v9467_v47, %v4146_v20 }
 0x409   : > { %v4161_v6 = vadd.f32 %v6693_v52, %v9497_v54  ;;  %v4155_v10 = vpop.f32.mrb[109].mxu1  ;;  %5274 = vmatmul.mubr.f32.gmra.mrb[214].mxu1 %v7303_v39  ;;  %v9677_v15 = vpop.f32.mrb[113].mxu0 }
 0x40a   : > { %v4156_v3 = vadd.f32 %v4155_v10, %v9492_v25  ;;  %5278 = vmatprep.mubr.f32.mxu1 %v4873_v55  ;;  %v4875_v25 = vsel %vm3161_vm6, %v4872_v60, %v4874_v46 }
 0x40b   : > { %v9683_v34 = vadd.f32 %v9489_v4, %v4161_v6 }
 0x40c   : > { %v6696_v47 = vpop.f32.mrb[110].mxu1  ;;  %v9685_v50 = vpop.f32.mrb[114].mxu0  ;;  %v9688_v54 = vadd.f32 %v9483_v32, %v4156_v3 }
 0x40d   : > { %v4171_v39 = vadd.f32 %v6696_v47, %v9507_v13  ;;  %v4165_v20 = vpop.f32.mrb[111].mxu1  ;;  %5279 = vmatmul.mubr.f32.gmra.mrb[216].mxu1 %v7305_v43  ;;  %v9691_v26 = vpop.f32.mrb[115].mxu0 }
 0x40e   : > { %v4166_v52 = vadd.f32 %v4165_v20, %v9502_v1  ;;  %5283 = vmatprep.mubr.f32.mxu1 %v4875_v25 }
 0x40f   : > { %v9696_v4 = vadd.f32 %v9499_v56, %v4171_v39 }
 0x410   : > { %v6699_v6 = vpop.f32.mrb[112].mxu1  ;;  %v9698_v10 = vpop.f32.mrb[116].mxu0  ;;  %v9701_v32 = vadd.f32 %v9494_v17, %v4166_v52 }
 0x411   : > { %v4181_v13 = vadd.f32 %v6699_v6, %v9517_v14  ;;  %v4175_v55 = vpop.f32.mrb[113].mxu1  ;;  %5284 = vmatmul.mubr.f32.gmra.mrb[218].mxu1 %v7306_v49  ;;  %v9704_v43 = vpop.f32.mrb[117].mxu0 }
 0x412   : > { %v4176_v60 = vadd.f32 %v4175_v55, %v9512_v24  ;;  %5288 = vmatprep.mubr.f32.mxu1 %v4876_v51  ;;  %v10267_v55 = vld [vmem:[#allocation42_spill] sm:$0xff] }
 0x413   : > { %v9708_v1 = vadd.f32 %v9509_v33, %v4181_v13  ;;  %v10266_v13 = vld [vmem:[#allocation43_spill] sm:$0xff] }
 0x414   : > { %v6702_v56 = vpop.f32.mrb[114].mxu1  ;;  %v9710_v16 = vpop.f32.mrb[118].mxu0  ;;  %v9713_v46 = vadd.f32 %v9504_v11, %v4176_v60 }
 0x415   : > { %10261 = vst [vmem:[#allocation65_spill] sm:$0xff] %v9710_v16  ;;  %v4191_v17 = vadd.f32 %v6702_v56, %v9527_v35  ;;  %v4185_v3 = vpop.f32.mrb[115].mxu1  ;;  %5289 = vmatmul.mubr.f32.gmra.mrb[220].mxu1 %v9385_v7  ;;  %v9717_v14 = vpop.f32.mrb[119].mxu0  ;;  %v10284_v16 = vld [vmem:[#allocation56_spill] sm:$0xff] }
 0x416   : > { %v4186_v49 = vadd.f32 %v4185_v3, %v9522_v37  ;;  %5293 = vmatprep.mubr.f32.mxu1 %v4876_v51  ;;  %v10270_v3 = vld [vmem:[#allocation48_spill] sm:$0xff] }
 0x417   : > { %v9721_v24 = vadd.f32 %v9519_v38, %v4191_v17 }
 0x418   : > { %v6705_v33 = vpop.f32.mrb[116].mxu1  ;;  %v9723_v47 = vpop.f32.mrb[120].mxu0  ;;  %v9726_v39 = vadd.f32 %v9514_v2, %v4186_v49 }
 0x419   : > { %10262 = vst [vmem:[#allocation66_spill] sm:$0xff] %v9723_v47  ;;  %v4201_v11 = vadd.f32 %v6705_v33, %v9537_v45  ;;  %v4195_v35 = vpop.f32.mrb[117].mxu1  ;;  %5294 = vmatmul.mubr.f32.gmra.mrb[222].mxu1 %v9385_v7  ;;  %v9730_v20 = vpop.f32.mrb[121].mxu0  ;;  %v10280_v47 = vld [vmem:[#allocation53_spill] sm:$0xff] }
 0x41a   : > { %10263 = vst [vmem:[#allocation67_spill] sm:$0xff] %v9730_v20  ;;  %v4196_v25 = vadd.f32 %v4195_v35, %v9532_v31  ;;  %v10273_v35 = vld [vmem:[#allocation45_spill] sm:$0xff] }
 0x41b   : > { %v9734_v37 = vadd.f32 %v9529_v8, %v4201_v11  ;;  %v10269_v8 = vld [vmem:[#allocation41_spill] sm:$0xff] }
 0x41c   : > { %v6708_v38 = vpop.f32.mrb[118].mxu1  ;;  %v9736_v51 = vpop.f32.mrb[122].mxu0  ;;  %v9739_v52 = vadd.f32 %v9524_v58, %v4196_v25 }
 0x41d   : > { %10264 = vst [vmem:[#allocation68_spill] sm:$0xff] %v9736_v51  ;;  %v4211_v2 = vadd.f32 %v6708_v38, %v9547_v44  ;;  %v4205_v6 = vpop.f32.mrb[119].mxu1  ;;  %v9742_v45 = vpop.f32.mrb[123].mxu0  ;;  %v10272_v44 = vld [vmem:[#allocation46_spill] sm:$0xff] }
 0x41e   : > { %10265 = vst [vmem:[#allocation69_spill] sm:$0xff] %v9742_v45  ;;  %v4206_v7 = vadd.f32 %v4205_v6, %v10266_v13  ;;  %v10274_v6 = vld [vmem:[#allocation44_spill] sm:$0xff]  ;;  %v10276_v51 = vld [vmem:[#allocation50_spill] sm:$0xff] }
 0x41f   : > { %v9746_v60 = vadd.f32 %v10267_v55, %v4211_v2  ;;  %v10275_v13 = vld [vmem:[#allocation52_spill] sm:$0xff] }
 0x420   : > { %v6711_v31 = vpop.f32.mrb[120].mxu1  ;;  %v9748_v56 = vpop.f32.mrb[124].mxu0  ;;  %v9751_v17 = vadd.f32 %v10269_v8, %v4206_v7  ;;  %v10277_v8 = vld [vmem:[#allocation49_spill] sm:$0xff] }
 0x421   : > { %10268 = vst [vmem:[#allocation43_spill] sm:$0xff] %v9748_v56  ;;  %v4221_v49 = vadd.f32 %v6711_v31, %v10270_v3  ;;  %v4215_v58 = vpop.f32.mrb[121].mxu1  ;;  %v9754_v33 = vpop.f32.mrb[125].mxu0  ;;  %v10278_v3 = vld [vmem:[#allocation47_spill] sm:$0xff] }
 0x422   : > { %10271 = vst [vmem:[#allocation42_spill] sm:$0xff] %v9754_v33  ;;  %v4216_v11 = vadd.f32 %v4215_v58, %v10272_v44  ;;  %v10279_v44 = vld [vmem:[#allocation54_spill] sm:$0xff] }
 0x423   : > { %v9758_v25 = vadd.f32 %v10273_v35, %v4221_v49 }
 0x424   : > { %v6714_v38 = vpop.f32.mrb[122].mxu1  ;;  %v9761_v2 = vadd.f32 %v10274_v6, %v4216_v11 }
 0x425   : > { %v4231_v55 = vadd.f32 %v6714_v38, %v10275_v13  ;;  %v4225_v56 = vpop.f32.mrb[123].mxu1  ;;  %v10281_v38 = vld [vmem:[#allocation51_spill] sm:$0xff] }
 0x426   : > { %v4226_v7 = vadd.f32 %v4225_v56, %v10276_v51  ;;  %v10282_v51 = vld [vmem:[#allocation60_spill] sm:$0xff] }
 0x427   : > { %v9766_v45 = vadd.f32 %v10277_v8, %v4231_v55  ;;  %v10283_v8 = vld [vmem:[#allocation57_spill] sm:$0xff] }
 0x428   : > { %v6717_v31 = vpop.f32.mrb[124].mxu1  ;;  %v9769_v33 = vadd.f32 %v10278_v3, %v4226_v7 }
 0x429   : > { %v4241_v58 = vadd.f32 %v6717_v31, %v9577_v27  ;;  %v4235_v49 = vpop.f32.mrb[125].mxu1  ;;  %v10285_v27 = vld [vmem:[#allocation55_spill] sm:$0xff] }
 0x42a   : > { %v4236_v35 = vadd.f32 %v4235_v49, %v10279_v44 }
 0x42b   : > { %v9774_v11 = vadd.f32 %v10280_v47, %v4241_v58 }
 0x42c   : > { %v6720_v6 = vpop.f32.mrb[126].mxu1  ;;  %v9777_v13 = vadd.f32 %v10281_v38, %v4236_v35 }
 0x42d   : > { %v4251_v56 = vadd.f32 %v6720_v6, %v10282_v51  ;;  %v4245_v55 = vpop.f32.mrb[127].mxu1 }
 0x42e   : > { %v4246_v20 = vadd.f32 %v4245_v55, %v10283_v8 }
 0x42f   : > { %v9782_v7 = vadd.f32 %v10284_v16, %v4251_v56 }
 0x430   : > { %v6755_v3 = vpop.f32.mrb[128].mxu1  ;;  %v9785_v31 = vadd.f32 %v10285_v27, %v4246_v20 }
 0x431   : > { %v9788_v49 = vadd.f32 %v6755_v3, %v9604_v28  ;;  %v4545_v47 = vpop.f32.mrb[129].mxu1 }
 0x432   : > { %v9791_v58 = vadd.f32 %v4545_v47, %v9609_v63 }
 0x434   : > { %v6758_v44 = vpop.f32.mrb[130].mxu1 }
 0x435   : > { %v9794_v35 = vadd.f32 %v6758_v44, %v9617_v53  ;;  %v4555_v6 = vpop.f32.mrb[131].mxu1 }
 0x436   : > { %v9797_v38 = vadd.f32 %v4555_v6, %v9622_v21 }
 0x438   : > { %v6761_v16 = vpop.f32.mrb[132].mxu1 }
 0x439   : > { %v9800_v51 = vadd.f32 %v6761_v16, %v9630_v18  ;;  %v4565_v20 = vpop.f32.mrb[133].mxu1 }
 0x43a   : > { %v9803_v28 = vadd.f32 %v4565_v20, %v9635_v22 }
 0x43c   : > { %v6764_v56 = vpop.f32.mrb[134].mxu1 }
 0x43d   : > { %v9806_v63 = vadd.f32 %v6764_v56, %v9643_v19  ;;  %v4575_v55 = vpop.f32.mrb[135].mxu1 }
 0x43e   : > { %v9809_v53 = vadd.f32 %v4575_v55, %v9648_v42 }
 0x440   : > { %v6767_v8 = vpop.f32.mrb[136].mxu1 }
 0x441   : > { %v9812_v21 = vadd.f32 %v6767_v8, %v9656_v40  ;;  %v4585_v3 = vpop.f32.mrb[137].mxu1 }
 0x442   : > { %v9815_v18 = vadd.f32 %v4585_v3, %v9661_v59 }
 0x444   : > { %v6770_v27 = vpop.f32.mrb[138].mxu1 }
 0x445   : > { %v9818_v22 = vadd.f32 %v6770_v27, %v9669_v41  ;;  %v4595_v47 = vpop.f32.mrb[139].mxu1 }
 0x446   : > { %v9821_v19 = vadd.f32 %v4595_v47, %v9674_v23 }
 0x448   : > { %v6773_v44 = vpop.f32.mrb[140].mxu1 }
 0x449   : > { %v9824_v42 = vadd.f32 %v6773_v44, %v9683_v34  ;;  %v4605_v6 = vpop.f32.mrb[141].mxu1 }
 0x44a   : > { %v9827_v40 = vadd.f32 %v4605_v6, %v9688_v54 }
 0x44c   : > { %v6776_v16 = vpop.f32.mrb[142].mxu1 }
 0x44d   : > { %v9830_v59 = vadd.f32 %v6776_v16, %v9696_v4  ;;  %v4615_v20 = vpop.f32.mrb[143].mxu1 }
 0x44e   : > { %v9833_v41 = vadd.f32 %v4615_v20, %v9701_v32 }
 0x450   : > { %v6779_v56 = vpop.f32.mrb[144].mxu1 }
 0x451   : > { %v9836_v23 = vadd.f32 %v6779_v56, %v9708_v1  ;;  %v4625_v55 = vpop.f32.mrb[145].mxu1 }
 0x452   : > { %v9839_v34 = vadd.f32 %v4625_v55, %v9713_v46 }
 0x454   : > { %v6782_v8 = vpop.f32.mrb[146].mxu1 }
 0x455   : > { %v9842_v54 = vadd.f32 %v6782_v8, %v9721_v24  ;;  %v4635_v3 = vpop.f32.mrb[147].mxu1 }
 0x456   : > { %v9845_v4 = vadd.f32 %v4635_v3, %v9726_v39 }
 0x458   : > { %v6785_v27 = vpop.f32.mrb[148].mxu1 }
 0x459   : > { %v9848_v32 = vadd.f32 %v6785_v27, %v9734_v37  ;;  %v4645_v47 = vpop.f32.mrb[149].mxu1 }
 0x45a   : > { %v9851_v1 = vadd.f32 %v4645_v47, %v9739_v52 }
 0x45c   : > { %v6788_v44 = vpop.f32.mrb[150].mxu1 }
 0x45d   : > { %v9854_v46 = vadd.f32 %v6788_v44, %v9746_v60  ;;  %v4655_v6 = vpop.f32.mrb[151].mxu1 }
 0x45e   : > { %v9857_v24 = vadd.f32 %v4655_v6, %v9751_v17 }
 0x460   : > { %v6791_v16 = vpop.f32.mrb[152].mxu1 }
 0x461   : > { %v9860_v39 = vadd.f32 %v6791_v16, %v9758_v25  ;;  %v4665_v20 = vpop.f32.mrb[153].mxu1 }
 0x462   : > { %v9863_v37 = vadd.f32 %v4665_v20, %v9761_v2  ;;  %v9877_v2 = vpop.f32.mrb[126].mxu0 }
 0x463   : > { %10287 = vst [vmem:[#allocation48_spill] sm:$0xff] %v9877_v2  ;;  %v9879_v27 = vpop.f32.mrb[127].mxu0 }
 0x464   : > { %v6794_v56 = vpop.f32.mrb[154].mxu1  ;;  %10288 = vst [vmem:[#allocation46_spill] sm:$0xff] %v9879_v27  ;;  %v10295_v27 = vld [vmem:[#allocation62_spill] sm:$0xff] }
 0x465   : > { %v9866_v52 = vadd.f32 %v6794_v56, %v9766_v45  ;;  %v4675_v55 = vpop.f32.mrb[155].mxu1 }
 0x466   : > { %v9869_v60 = vadd.f32 %v4675_v55, %v9769_v33 }
 0x468   : > { %v6797_v8 = vpop.f32.mrb[156].mxu1 }
 0x469   : > { %v9872_v17 = vadd.f32 %v6797_v8, %v9774_v11  ;;  %v4685_v3 = vpop.f32.mrb[157].mxu1  ;;  %v10291_v11 = vld [vmem:[#allocation59_spill] sm:$0xff] }
 0x46a   : > { %v9875_v25 = vadd.f32 %v4685_v3, %v9777_v13  ;;  %v9892_v13 = vld [vmem:[%s10135_s4] ss:$0 sm:$0xff] }
 0x46b   : > { %10286 = vst [vmem:[#allocation41_spill] sm:$0xff] %v9872_v17 }
 0x46c   : > { %v6800_v45 = vpop.f32.mrb[158].mxu1 }
 0x46d   : > { %v9882_v47 = vadd.f32 %v6800_v45, %v9782_v7  ;;  %v4695_v44 = vpop.f32.mrb[159].mxu1  ;;  %v9898_v7 = vld [vmem:[%s10137_s6] ss:$0 sm:$0xff]  ;;  %v10293_v45 = vld [vmem:[#allocation58_spill] sm:$0xff] }
 0x46e   : > { %v9885_v33 = vadd.f32 %v4695_v44, %v9785_v31  ;;  %v10292_v31 = vld [vmem:[#allocation10_spill] sm:$0xff] }
 0x46f   : > { %10289 = vst [vmem:[#allocation45_spill] sm:$0xff] %v9882_v47  ;;  %v2907_v8 = vadd.f32 %v9898_v7, %v10292_v31 }
 0x470   : > { %10290 = vst [vmem:[#allocation44_spill] sm:$0xff] %v9885_v33  ;;  %v5140_v6 = vpop.f32.mrb[160].mxu1 }
 0x471   : > { %v5366_v16 = vadd.f32 %v10291_v11, %v5140_v6  ;;  %v5142_v20 = vpop.f32.mrb[161].mxu1 }
 0x473   : > { %v5524_v56 = vadd.f32 %v5366_v16, %v9791_v58  ;;  %v10294_v16 = vld [vmem:[#allocation9_spill] sm:$0xff] }
 0x474   : > { %v5145_v55 = vpop.f32.mrb[162].mxu1  ;;  %v2912_v47 = vadd.f32 %v9898_v7, %v10294_v16 }
 0x475   : > { %v5563_v3 = vadd.f32 %v9892_v13, %v5524_v56  ;;  %v5371_v44 = vadd.f32 %v10293_v45, %v5145_v55  ;;  %v5147_v6 = vpop.f32.mrb[163].mxu1 }
 0x476   : > { %v10297_v6 = vld [vmem:[#allocation61_spill] sm:$0xff] }
 0x477   : > { %v5595_v11 = vadd.f32 %v5563_v3, %v2907_v8  ;;  %v5525_v20 = vadd.f32 %v5371_v44, %v9788_v49  ;;  %v10296_v8 = vld [vmem:[#allocation12_spill] sm:$0xff] }
 0x478   : > { %v5150_v58 = vpop.f32.mrb[164].mxu1  ;;  %v2917_v3 = vadd.f32 %v9898_v7, %v10296_v8  ;;  %v10299_v8 = vld [vmem:[#allocation14_spill] sm:$0xff] }
 0x479   : > { %v5627_v2 = vmax.f32 %v5595_v11, 0.0  ;;  %v5564_v33 = vadd.f32 %v9892_v13, %v5525_v20  ;;  %v5376_v17 = vadd.f32 %v10295_v27, %v5150_v58  ;;  %v5152_v31 = vpop.f32.mrb[165].mxu1 }
 0x47b   : > { %5659 = vst [vmem:[%s9911_s22] sm:$0xff] %v5627_v2  ;;  %v5596_v56 = vadd.f32 %v5564_v33, %v2912_v47  ;;  %v5526_v55 = vadd.f32 %v5376_v17, %v9797_v38  ;;  %v10298_v47 = vld [vmem:[#allocation11_spill] sm:$0xff] }
 0x47c   : > { %v5155_v49 = vpop.f32.mrb[166].mxu1  ;;  %v2922_v38 = vadd.f32 %v9898_v7, %v10298_v47 }
 0x47d   : > { %v5628_v45 = vmax.f32 %v5596_v56, 0.0  ;;  %v5565_v44 = vadd.f32 %v9892_v13, %v5526_v55  ;;  %v5381_v11 = vadd.f32 %v10297_v6, %v5155_v49  ;;  %v5157_v27 = vpop.f32.mrb[167].mxu1 }
 0x47f   : > { %5660 = vst [vmem:[%s9911_s22 + $0x8] sm:$0xff] %v5628_v45  ;;  %v5597_v20 = vadd.f32 %v5565_v44, %v2917_v3  ;;  %v5527_v58 = vadd.f32 %v5381_v11, %v9794_v35  ;;  %v2927_v35 = vadd.f32 %v9898_v7, %v10299_v8  ;;  %v10300_v44 = vld [vmem:[#allocation63_spill] sm:$0xff]  ;;  %v10303_v8 = vld [vmem:[#allocation64_spill] sm:$0xff] }
 0x480   : > { %v5160_v2 = vpop.f32.mrb[168].mxu1 }
 0x481   : > { %v5629_v17 = vmax.f32 %v5597_v20, 0.0  ;;  %v5566_v33 = vadd.f32 %v9892_v13, %v5527_v58  ;;  %v5386_v16 = vadd.f32 %v9599_v12, %v5160_v2  ;;  %v5162_v31 = vpop.f32.mrb[169].mxu1  ;;  %v10301_v58 = vld [vmem:[#allocation13_spill] sm:$0xff] }
 0x483   : > { %5661 = vst [vmem:[%s9911_s22 + $0x10] sm:$0xff] %v5629_v17  ;;  %v5598_v56 = vadd.f32 %v5566_v33, %v2922_v38  ;;  %v5528_v55 = vadd.f32 %v5386_v16, %v9803_v28  ;;  %v2932_v28 = vadd.f32 %v9898_v7, %v10301_v58 }
 0x484   : > { %v5165_v49 = vpop.f32.mrb[170].mxu1 }
 0x485   : > { %v5630_v3 = vmax.f32 %v5598_v56, 0.0  ;;  %v5567_v45 = vadd.f32 %v9892_v13, %v5528_v55  ;;  %v5391_v6 = vadd.f32 %v10300_v44, %v5165_v49  ;;  %v5167_v11 = vpop.f32.mrb[171].mxu1  ;;  %v10302_v56 = vld [vmem:[#allocation16_spill] sm:$0xff] }
 0x487   : > { %5662 = vst [vmem:[%s9911_s22 + $0x18] sm:$0xff] %v5630_v3  ;;  %v5599_v27 = vadd.f32 %v5567_v45, %v2927_v35  ;;  %v5529_v12 = vadd.f32 %v5391_v6, %v9800_v51  ;;  %v2937_v51 = vadd.f32 %v9898_v7, %v10302_v56  ;;  %v10304_v6 = vld [vmem:[#allocation15_spill] sm:$0xff] }
 0x488   : > { %v5170_v20 = vpop.f32.mrb[172].mxu1 }
 0x489   : > { %v5631_v2 = vmax.f32 %v5599_v27, 0.0  ;;  %v5568_v47 = vadd.f32 %v9892_v13, %v5529_v12  ;;  %v5396_v38 = vadd.f32 %v9612_v30, %v5170_v20  ;;  %v5172_v17 = vpop.f32.mrb[173].mxu1 }
 0x48b   : > { %5663 = vst [vmem:[%s9911_s22 + $0x20] sm:$0xff] %v5631_v2  ;;  %v5600_v33 = vadd.f32 %v5568_v47, %v2932_v28  ;;  %v5530_v16 = vadd.f32 %v5396_v38, %v9809_v53  ;;  %v2942_v53 = vadd.f32 %v9898_v7, %v10304_v6  ;;  %v10305_v47 = vld [vmem:[#allocation19_spill] sm:$0xff] }
 0x48c   : > { %v5175_v31 = vpop.f32.mrb[174].mxu1 }
 0x48d   : > { %v5632_v55 = vmax.f32 %v5600_v33, 0.0  ;;  %v5569_v49 = vadd.f32 %v9892_v13, %v5530_v16  ;;  %v5401_v35 = vadd.f32 %v10303_v8, %v5175_v31  ;;  %v5177_v3 = vpop.f32.mrb[175].mxu1 }
 0x48f   : > { %5664 = vst [vmem:[%s9911_s22 + $0x28] sm:$0xff] %v5632_v55  ;;  %v5601_v45 = vadd.f32 %v5569_v49, %v2937_v51  ;;  %v5531_v30 = vadd.f32 %v5401_v35, %v9806_v63  ;;  %v2947_v63 = vadd.f32 %v9898_v7, %v10305_v47  ;;  %v10306_v51 = vld [vmem:[#allocation17_spill] sm:$0xff] }
 0x490   : > { %v5180_v44 = vpop.f32.mrb[176].mxu1 }
 0x491   : > { %v5633_v11 = vmax.f32 %v5601_v45, 0.0  ;;  %v5570_v27 = vadd.f32 %v9892_v13, %v5531_v30  ;;  %v5406_v12 = vadd.f32 %v9625_v57, %v5180_v44  ;;  %v5182_v20 = vpop.f32.mrb[177].mxu1  ;;  %v10307_v30 = vld [vmem:[#allocation21_spill] sm:$0xff] }
 0x492   : > { %v10308_v20 = vld [vmem:[#allocation20_spill] sm:$0xff] }
 0x493   : > { %5665 = vst [vmem:[%s9911_s22 + $0x30] sm:$0xff] %v5633_v11  ;;  %v5602_v58 = vadd.f32 %v5570_v27, %v2942_v53  ;;  %v5532_v28 = vadd.f32 %v5406_v12, %v9815_v18  ;;  %v2952_v18 = vadd.f32 %v9898_v7, %v10306_v51 }
 0x494   : > { %v5185_v2 = vpop.f32.mrb[178].mxu1 }
 0x495   : > { %v5634_v38 = vmax.f32 %v5602_v58, 0.0  ;;  %v5571_v17 = vadd.f32 %v9892_v13, %v5532_v28  ;;  %v5411_v33 = vadd.f32 %v9619_v36, %v5185_v2  ;;  %v5187_v16 = vpop.f32.mrb[179].mxu1 }
 0x497   : > { %5666 = vst [vmem:[%s9911_s22 + $0x38] sm:$0xff] %v5634_v38  ;;  %v5603_v31 = vadd.f32 %v5571_v17, %v2947_v63  ;;  %v5533_v57 = vadd.f32 %v5411_v33, %v9812_v21  ;;  %v2957_v21 = vadd.f32 %v9898_v7, %v10307_v30  ;;  %v10309_v17 = vld [vmem:[#allocation22_spill] sm:$0xff] }
 0x498   : > { %v5190_v56 = vpop.f32.mrb[180].mxu1 }
 0x499   : > { %v5635_v55 = vmax.f32 %v5603_v31, 0.0  ;;  %v5572_v49 = vadd.f32 %v9892_v13, %v5533_v57  ;;  %v5416_v8 = vadd.f32 %v9638_v62, %v5190_v56  ;;  %v5192_v35 = vpop.f32.mrb[181].mxu1 }
 0x49b   : > { %5667 = vst [vmem:[%s9911_s22 + $0x40] sm:$0xff] %v5635_v55  ;;  %v5604_v3 = vadd.f32 %v5572_v49, %v2952_v18  ;;  %v5534_v36 = vadd.f32 %v5416_v8, %v9821_v19  ;;  %v2962_v19 = vadd.f32 %v9898_v7, %v10308_v20  ;;  %v10310_v18 = vld [vmem:[#allocation18_spill] sm:$0xff] }
 0x49c   : > { %v5195_v45 = vpop.f32.mrb[182].mxu1 }
 0x49d   : > { %v5636_v44 = vmax.f32 %v5604_v3, 0.0  ;;  %v5573_v6 = vadd.f32 %v9892_v13, %v5534_v36  ;;  %v5421_v53 = vadd.f32 %v9632_v9, %v5195_v45  ;;  %v5197_v11 = vpop.f32.mrb[183].mxu1  ;;  %v10311_v45 = vld [vmem:[#allocation24_spill] sm:$0xff] }
 0x49f   : > { %5668 = vst [vmem:[%s9911_s22 + $0x48] sm:$0xff] %v5636_v44  ;;  %v5605_v27 = vadd.f32 %v5573_v6, %v2957_v21  ;;  %v5535_v62 = vadd.f32 %v5421_v53, %v9818_v22  ;;  %v2967_v22 = vadd.f32 %v9898_v7, %v10309_v17 }
 0x4a0   : > { %v5200_v12 = vpop.f32.mrb[184].mxu1 }
 0x4a1   : > { %v5637_v58 = vmax.f32 %v5605_v27, 0.0  ;;  %v5574_v28 = vadd.f32 %v9892_v13, %v5535_v62  ;;  %v5426_v2 = vadd.f32 %v9651_v48, %v5200_v12  ;;  %v5202_v47 = vpop.f32.mrb[185].mxu1  ;;  %v10312_v27 = vld [vmem:[#allocation23_spill] sm:$0xff] }
 0x4a3   : > { %5669 = vst [vmem:[%s9911_s22 + $0x50] sm:$0xff] %v5637_v58  ;;  %v5606_v63 = vadd.f32 %v5574_v28, %v2962_v19  ;;  %v5536_v9 = vadd.f32 %v5426_v2, %v9827_v40  ;;  %v2972_v40 = vadd.f32 %v9898_v7, %v10310_v18  ;;  %v10315_v18 = vld [vmem:[#allocation28_spill] sm:$0xff] }
 0x4a4   : > { %v5205_v38 = vpop.f32.mrb[186].mxu1 }
 0x4a5   : > { %v5638_v33 = vmax.f32 %v5606_v63, 0.0  ;;  %v5575_v16 = vadd.f32 %v9892_v13, %v5536_v9  ;;  %v5431_v31 = vadd.f32 %v9645_v5, %v5205_v38  ;;  %v5207_v57 = vpop.f32.mrb[187].mxu1 }
 0x4a7   : > { %5670 = vst [vmem:[%s9911_s22 + $0x58] sm:$0xff] %v5638_v33  ;;  %v5607_v56 = vadd.f32 %v5575_v16, %v2967_v22  ;;  %v5537_v48 = vadd.f32 %v5431_v31, %v9824_v42  ;;  %v2977_v42 = vadd.f32 %v9898_v7, %v10311_v45  ;;  %v10314_v16 = vld [vmem:[#allocation25_spill] sm:$0xff] }
 0x4a8   : > { %v5210_v51 = vpop.f32.mrb[188].mxu1 }
 0x4a9   : > { %v5639_v55 = vmax.f32 %v5607_v56, 0.0  ;;  %v5576_v49 = vadd.f32 %v9892_v13, %v5537_v48  ;;  %v5436_v8 = vadd.f32 %v9664_v61, %v5210_v51  ;;  %v5212_v35 = vpop.f32.mrb[189].mxu1 }
 0x4ab   : > { %5671 = vst [vmem:[%s9911_s22 + $0x60] sm:$0xff] %v5639_v55  ;;  %v5608_v3 = vadd.f32 %v5576_v49, %v2972_v40  ;;  %v5538_v5 = vadd.f32 %v5436_v8, %v9833_v41  ;;  %v2982_v41 = vadd.f32 %v9898_v7, %v10312_v27  ;;  %v10313_v7 = vld [vmem:[#allocation26_spill] sm:$0xff]  ;;  %v10318_v27 = vld [vmem:[#allocation29_spill] sm:$0xff] }
 0x4ac   : > { %v5215_v36 = vpop.f32.mrb[190].mxu1 }
 0x4ad   : > { %v5640_v30 = vmax.f32 %v5608_v3, 0.0  ;;  %v5577_v21 = vadd.f32 %v9892_v13, %v5538_v5  ;;  %v5441_v44 = vadd.f32 %v9658_v0, %v5215_v36  ;;  %v5217_v6 = vpop.f32.mrb[191].mxu1  ;;  %v10316_v3 = vld [vmem:[#allocation27_spill] sm:$0xff] }
 0x4af   : > { %5672 = vst [vmem:[%s9911_s22 + $0x68] sm:$0xff] %v5640_v30  ;;  %v5609_v53 = vadd.f32 %v5577_v21, %v2977_v42  ;;  %v5539_v61 = vadd.f32 %v5441_v44, %v9830_v59  ;;  %v10317_v21 = vld [vmem:[#allocation30_spill] sm:$0xff] }
 0x4b0   : > { %v5220_v11 = vpop.f32.mrb[192].mxu1 }
 0x4b1   : > { %v5641_v62 = vmax.f32 %v5609_v53, 0.0  ;;  %v5578_v12 = vadd.f32 %v9892_v13, %v5539_v61  ;;  %v5446_v20 = vadd.f32 %v9677_v15, %v5220_v11  ;;  %v5222_v19 = vpop.f32.mrb[193].mxu1 }
 0x4b2   : > { %v10319_v19 = vld [vmem:[#allocation65_spill] sm:$0xff] }
 0x4b3   : > { %5673 = vst [vmem:[%s9911_s22 + $0x70] sm:$0xff] %v5641_v62  ;;  %v5610_v58 = vadd.f32 %v5578_v12, %v2982_v41  ;;  %v5540_v0 = vadd.f32 %v5446_v20, %v9839_v34 }
 0x4b4   : > { %v5225_v28 = vpop.f32.mrb[194].mxu1 }
 0x4b5   : > { %v5642_v2 = vmax.f32 %v5610_v58, 0.0  ;;  %v5579_v47 = vadd.f32 %v9892_v13, %v5540_v0  ;;  %v5451_v59 = vadd.f32 %v9671_v29, %v5225_v28  ;;  %v5227_v63 = vpop.f32.mrb[195].mxu1  ;;  %v10320_v0 = vld [vmem:[#allocation32_spill] sm:$0xff] }
 0x4b6   : > { %v10321_v63 = vld [vmem:[#allocation67_spill] sm:$0xff] }
 0x4b7   : > { %5674 = vst [vmem:[%s9911_s22 + $0x78] sm:$0xff] %v5642_v2  ;;  %v5611_v9 = vadd.f32 %v5579_v47, %v10313_v7  ;;  %v5541_v38 = vadd.f32 %v5451_v59, %v9836_v23 }
 0x4b8   : > { %v5230_v15 = vpop.f32.mrb[196].mxu1 }
 0x4b9   : > { %v5643_v17 = vmax.f32 %v5611_v9, 0.0  ;;  %v5580_v22 = vadd.f32 %v9892_v13, %v5541_v38  ;;  %v5456_v33 = vadd.f32 %v9691_v26, %v5230_v15  ;;  %v5232_v34 = vpop.f32.mrb[197].mxu1  ;;  %v10322_v9 = vld [vmem:[#allocation31_spill] sm:$0xff] }
 0x4ba   : > { %v10323_v34 = vld [vmem:[#allocation66_spill] sm:$0xff] }
 0x4bb   : > { %5675 = vst [vmem:[%s9911_s22 + $0x80] sm:$0xff] %v5643_v17  ;;  %v5612_v31 = vadd.f32 %v5580_v22, %v10314_v16  ;;  %v5542_v29 = vadd.f32 %v5456_v33, %v9845_v4 }
 0x4bc   : > { %v5235_v57 = vpop.f32.mrb[198].mxu1 }
 0x4bd   : > { %v5644_v56 = vmax.f32 %v5612_v31, 0.0  ;;  %v5581_v48 = vadd.f32 %v9892_v13, %v5542_v29  ;;  %v5461_v51 = vadd.f32 %v9685_v50, %v5235_v57  ;;  %v5237_v23 = vpop.f32.mrb[199].mxu1  ;;  %v10324_v31 = vld [vmem:[#allocation34_spill] sm:$0xff] }
 0x4be   : > { %v10325_v23 = vld [vmem:[#allocation69_spill] sm:$0xff] }
 0x4bf   : > { %5676 = vst [vmem:[%s9911_s22 + $0x88] sm:$0xff] %v5644_v56  ;;  %v5613_v40 = vadd.f32 %v5581_v48, %v10315_v18  ;;  %v5543_v26 = vadd.f32 %v5461_v51, %v9842_v54 }
 0x4c0   : > { %v5240_v55 = vpop.f32.mrb[200].mxu1 }
 0x4c1   : > { %v5645_v49 = vmax.f32 %v5613_v40, 0.0  ;;  %v5582_v8 = vadd.f32 %v9892_v13, %v5543_v26  ;;  %v5466_v35 = vadd.f32 %v9704_v43, %v5240_v55  ;;  %v5242_v4 = vpop.f32.mrb[201].mxu1  ;;  %v10326_v40 = vld [vmem:[#allocation33_spill] sm:$0xff] }
 0x4c2   : > { %v10327_v4 = vld [vmem:[#allocation68_spill] sm:$0xff] }
 0x4c3   : > { %5677 = vst [vmem:[%s9911_s22 + $0x90] sm:$0xff] %v5645_v49  ;;  %v5614_v5 = vadd.f32 %v5582_v8, %v10316_v3  ;;  %v5544_v50 = vadd.f32 %v5466_v35, %v9851_v1 }
 0x4c4   : > { %v5245_v36 = vpop.f32.mrb[202].mxu1 }
 0x4c5   : > { %v5646_v45 = vmax.f32 %v5614_v5, 0.0  ;;  %v5583_v42 = vadd.f32 %v9892_v13, %v5544_v50  ;;  %v5471_v30 = vadd.f32 %v9698_v10, %v5245_v36  ;;  %v5247_v54 = vpop.f32.mrb[203].mxu1  ;;  %v10328_v5 = vld [vmem:[#allocation36_spill] sm:$0xff] }
 0x4c6   : > { %v10329_v54 = vld [vmem:[#allocation42_spill] sm:$0xff] }
 0x4c7   : > { %5678 = vst [vmem:[%s9911_s22 + $0x98] sm:$0xff] %v5646_v45  ;;  %v5615_v44 = vadd.f32 %v5583_v42, %v10317_v21  ;;  %v5545_v43 = vadd.f32 %v5471_v30, %v9848_v32 }
 0x4c8   : > { %v5250_v6 = vpop.f32.mrb[204].mxu1 }
 0x4c9   : > { %v5647_v53 = vmax.f32 %v5615_v44, 0.0  ;;  %v5584_v61 = vadd.f32 %v9892_v13, %v5545_v43  ;;  %v5476_v11 = vadd.f32 %v9717_v14, %v5250_v6  ;;  %v5252_v1 = vpop.f32.mrb[205].mxu1  ;;  %v10330_v44 = vld [vmem:[#allocation35_spill] sm:$0xff] }
 0x4ca   : > { %v10331_v1 = vld [vmem:[#allocation43_spill] sm:$0xff] }
 0x4cb   : > { %5679 = vst [vmem:[%s9911_s22 + $0xa0] sm:$0xff] %v5647_v53  ;;  %v5616_v41 = vadd.f32 %v5584_v61, %v10318_v27  ;;  %v5546_v10 = vadd.f32 %v5476_v11, %v9857_v24 }
 0x4cc   : > { %v5255_v62 = vpop.f32.mrb[206].mxu1 }
 0x4cd   : > { %v5648_v12 = vmax.f32 %v5616_v41, 0.0  ;;  %v5585_v20 = vadd.f32 %v9892_v13, %v5546_v10  ;;  %v5481_v58 = vadd.f32 %v10319_v19, %v5255_v62  ;;  %v5257_v32 = vpop.f32.mrb[207].mxu1  ;;  %v10332_v41 = vld [vmem:[#allocation38_spill] sm:$0xff]  ;;  %v10333_v62 = vld [vmem:[#allocation41_spill] sm:$0xff] }
 0x4ce   : > { %v10334_v32 = vld [vmem:[#allocation46_spill] sm:$0xff] }
 0x4cf   : > { %5680 = vst [vmem:[%s9911_s22 + $0xa8] sm:$0xff] %v5648_v12  ;;  %v5617_v28 = vadd.f32 %v5585_v20, %v10320_v0  ;;  %v5547_v14 = vadd.f32 %v5481_v58, %v9854_v46 }
 0x4d0   : > { %v5260_v2 = vpop.f32.mrb[208].mxu1 }
 0x4d1   : > { %v5649_v47 = vmax.f32 %v5617_v28, 0.0  ;;  %v5586_v59 = vadd.f32 %v9892_v13, %v5547_v14  ;;  %v5486_v7 = vadd.f32 %v10321_v63, %v5260_v2  ;;  %v5262_v24 = vpop.f32.mrb[209].mxu1  ;;  %v10335_v28 = vld [vmem:[#allocation37_spill] sm:$0xff]  ;;  %v10336_v2 = vld [vmem:[#allocation44_spill] sm:$0xff] }
 0x4d2   : > { %v10337_v24 = vld [vmem:[#allocation48_spill] sm:$0xff] }
 0x4d3   : > { %5681 = vst [vmem:[%s9911_s22 + $0xb0] sm:$0xff] %v5649_v47  ;;  %v5618_v38 = vadd.f32 %v5586_v59, %v10322_v9  ;;  %v5548_v15 = vadd.f32 %v5486_v7, %v9863_v37 }
 0x4d4   : > { %v5265_v17 = vpop.f32.mrb[210].mxu1 }
 0x4d5   : > { %v5650_v22 = vmax.f32 %v5618_v38, 0.0  ;;  %v5587_v33 = vadd.f32 %v9892_v13, %v5548_v15  ;;  %v5491_v16 = vadd.f32 %v10323_v34, %v5265_v17  ;;  %v5267_v46 = vpop.f32.mrb[211].mxu1  ;;  %v10338_v15 = vld [vmem:[#allocation40_spill] sm:$0xff] }
 0x4d6   : > { %v10340_v46 = vld [vmem:[#allocation39_spill] sm:$0xff] }
 0x4d7   : > { %5682 = vst [vmem:[%s9911_s22 + $0xb8] sm:$0xff] %v5650_v22  ;;  %v5619_v29 = vadd.f32 %v5587_v33, %v10324_v31  ;;  %v5549_v57 = vadd.f32 %v5491_v16, %v9860_v39  ;;  %v10339_v22 = vld [vmem:[#allocation45_spill] sm:$0xff] }
 0x4d8   : > { %v5270_v56 = vpop.f32.mrb[212].mxu1 }
 0x4d9   : > { %v5651_v48 = vmax.f32 %v5619_v29, 0.0  ;;  %v5588_v51 = vadd.f32 %v9892_v13, %v5549_v57  ;;  %v5496_v18 = vadd.f32 %v10325_v23, %v5270_v56  ;;  %v5272_v37 = vpop.f32.mrb[213].mxu1 }
 0x4db   : > { %5683 = vst [vmem:[%s9911_s22 + $0xc0] sm:$0xff] %v5651_v48  ;;  %v5620_v26 = vadd.f32 %v5588_v51, %v10326_v40  ;;  %v5550_v55 = vadd.f32 %v5496_v18, %v9869_v60 }
 0x4dc   : > { %v5275_v49 = vpop.f32.mrb[214].mxu1 }
 0x4dd   : > { %v5652_v8 = vmax.f32 %v5620_v26, 0.0  ;;  %v5589_v35 = vadd.f32 %v9892_v13, %v5550_v55  ;;  %v5501_v3 = vadd.f32 %v10327_v4, %v5275_v49  ;;  %v5277_v39 = vpop.f32.mrb[215].mxu1 }
 0x4df   : > { %5684 = vst [vmem:[%s9911_s22 + $0xc8] sm:$0xff] %v5652_v8  ;;  %v5621_v50 = vadd.f32 %v5589_v35, %v10328_v5  ;;  %v5551_v36 = vadd.f32 %v5501_v3, %v9866_v52 }
 0x4e0   : > { %v5280_v45 = vpop.f32.mrb[216].mxu1 }
 0x4e1   : > { %v5653_v42 = vmax.f32 %v5621_v50, 0.0  ;;  %v5590_v30 = vadd.f32 %v9892_v13, %v5551_v36  ;;  %v5506_v21 = vadd.f32 %v10329_v54, %v5280_v45  ;;  %v5282_v60 = vpop.f32.mrb[217].mxu1 }
 0x4e3   : > { %5685 = vst [vmem:[%s9911_s22 + $0xd0] sm:$0xff] %v5653_v42  ;;  %v5622_v43 = vadd.f32 %v5590_v30, %v10330_v44  ;;  %v5552_v6 = vadd.f32 %v5506_v21, %v9875_v25 }
 0x4e4   : > { %v5285_v53 = vpop.f32.mrb[218].mxu1 }
 0x4e5   : > { %v5654_v61 = vmax.f32 %v5622_v43, 0.0  ;;  %v5591_v11 = vadd.f32 %v9892_v13, %v5552_v6  ;;  %v5511_v27 = vadd.f32 %v10331_v1, %v5285_v53  ;;  %v5287_v52 = vpop.f32.mrb[219].mxu1 }
 0x4e7   : > { %5686 = vst [vmem:[%s9911_s22 + $0xd8] sm:$0xff] %v5654_v61  ;;  %v5623_v10 = vadd.f32 %v5591_v11, %v10332_v41  ;;  %v5553_v12 = vadd.f32 %v5511_v27, %v10333_v62 }
 0x4e8   : > { %v5290_v20 = vpop.f32.mrb[220].mxu1 }
 0x4e9   : > { %v5655_v19 = vmax.f32 %v5623_v10, 0.0  ;;  %v5592_v58 = vadd.f32 %v9892_v13, %v5553_v12  ;;  %v5516_v25 = vadd.f32 %v10334_v32, %v5290_v20  ;;  %v5292_v0 = vpop.f32.mrb[221].mxu1 }
 0x4eb   : > { %5687 = vst [vmem:[%s9911_s22 + $0xe0] sm:$0xff] %v5655_v19  ;;  %v5624_v14 = vadd.f32 %v5592_v58, %v10335_v28  ;;  %v5554_v47 = vadd.f32 %v5516_v25, %v10336_v2 }
 0x4ec   : > { %v5295_v59 = vpop.f32.mrb[222].mxu1 }
 0x4ed   : > { %v5656_v63 = vmax.f32 %v5624_v14, 0.0  ;;  %v5593_v7 = vadd.f32 %v9892_v13, %v5554_v47  ;;  %v5521_v9 = vadd.f32 %v10337_v24, %v5295_v59  ;;  %v5297_v38 = vpop.f32.mrb[223].mxu1 }
 0x4ef   : > { %5688 = vst [vmem:[%s9911_s22 + $0xe8] sm:$0xff] %v5656_v63  ;;  %v5625_v17 = vadd.f32 %v5593_v7, %v10338_v15  ;;  %v5555_v33 = vadd.f32 %v5521_v9, %v10339_v22 }
 0x4f1   : > { %v5657_v34 = vmax.f32 %v5625_v17, 0.0  ;;  %v5594_v16 = vadd.f32 %v9892_v13, %v5555_v33 }
 0x4f3   : > { %5689 = vst [vmem:[%s9911_s22 + $0xf0] sm:$0xff] %v5657_v34  ;;  %v5626_v31 = vadd.f32 %v5594_v16, %v10340_v46 }
 0x4f5   : > { %v5658_v29 = vmax.f32 %v5626_v31, 0.0 }
 0x4f7   : > { %5690 = vst [vmem:[%s9911_s22 + $0xf8] sm:$0xff] %v5658_v29 }
 0x4f8   : > { %7350 = shalt.err (!%p7347_p7)
}
 0x4f9   : > { %s7351_s14 = scalar_lea.hbm %s10082_s8, 4096  ;;  %s7355_s22 = scalar_lea.hbm %s10138_s7, 8192 }
 0x4fa   : > { %p7352_p8 = scmp.ne.s32.totalorder %s10082_s8, %s7351_s14  ;;  %p7356_p1 = scmp.lt.u32.totalorder %s10082_s8, %s10138_s7 }
 0x4fb   : > { %p7357_p0 = scmp.lt.u32.totalorder %s7355_s22, %s7351_s14  ;;  %p7359_p6 = scmp.lt.u32.totalorder %s7351_s14, %s10082_s8 }
 0x4fc   : > { %p7353_p11 = pnand %p7352_p8, %p10341_p9 }
 0x4fd   : > { %p7358_p5 = por %p7357_p0, %p7356_p1 }
 0x4fe   : > { %p7354_p13 = pneg %p7353_p11 }
 0x4ff   : > { %p7360_p10 = por %p7359_p6, %p7358_p5 }
 0x501   : > { %p7361_p12 = pnand %p7360_p10, %p7354_p13 }
 0x503   : > { %7364 = shalt.err (!%p7361_p12)
}
 0x504   : > { %s7414_s15 = smov 128  }
 0x505   : > { %7208 = dma.vmem_to_hbm [thread:$0]  (%p10341_p9), %s10084_s29, 4096, %s10082_s8, %s10089_s9, %s7414_s15, %s7414_s15, %s7408_s13  }
 0x506 PF: > { %p7220_p2 = scmp.ge.s32.totalorder %s7403_s27, 2  ;;  %s5720_s28 = sand.u32 1, %s7391_s24  }
 0x507   : > { %p10342_p3 = scmp.ne.s32.totalorder %s10162_s12, 0  ;;  %s5721_s17 = scalar_lea.sflag [#allocation5], %s5720_s28 }
 0x509   : > { %p7215_p4 = pnand %p7220_p2, %p10342_p3 }
 0x50b   : > { %7386 = dma.done.wait (!%p7215_p4), %s5721_s17, 4096  }
 0x50c   : > { %7388 = vsyncadd (!%p7215_p4), %s5721_s17, 4294963200  ;;  %p18_p7 = scmp.ge.s32.totalorder %s7480_s30, 4   ;;  %s10343_s24 = smov %s7395_s25 }
 0x50d   : > { %s10344_s25 = smov %s7399_s26  ;;  %s10345_s26 = smov %s7491_s10 }
 0x50e   : > { %s10346_s27 = smov %s7480_s30  ;;  %20 = sbr.rel (!%p18_p7) target bundleno = 4 (0x4), region = 97 }
 0x515   :  { %5726 = vsyncpa [#allocation4], 1 }
 0x516   :  { %5728 = vsyncpa [#allocation4 + $0x1], 1 }
 0x517   :  { %5729 = vsyncpa [#allocation5], 1 }
 0x518   :  { %5731 = vsyncpa [#allocation5 + $0x1], 1 }

</bundles_post_ra>
